<compile_context>
chip_gen: v6e
topology: v6e:2x2x1
jax: 0.10.0
libtpu: 0.0.40
codegen_flags: <defaults>
</compile_context>

<pallas_src>
import jax
import jax.numpy as jnp
from jax.experimental import pallas as pl
from jax.experimental.pallas import tpu as pltpu


def _round_up(x, m):
    return (x + m - 1) // m * m


def _cdiv(a, b):
    return -(-a // b)


def _make_conv_kernel(tap_offsets, tm):
    """Conv-as-shifted-matmuls kernel.

    Refs:
      x_ref:   (Lin, Cin)        channels-last flattened padded image (whole image)
      w_ref:   (KH*KW, Cout, Cin) per-tap weight matrices
      b_ref:   (Cout, 1)          bias (f32)
      o_ref:   (Cout, TM)         lane-dense flat-NCHW output tile
      acc_ref: (Cout, TM) f32     VMEM accumulator scratch
    """

    def kernel(x_ref, w_ref, b_ref, o_ref, acc_ref):
        # Tile base along the flattened (oh*Wp + ow) axis; TM % 128 == 0.
        base = pl.multiple_of(pl.program_id(1) * tm, 128)
        for t, off in enumerate(tap_offsets):          # static unroll, KH*KW taps
            # Dynamic start on the sublane dim (2nd-minor): well-supported path.
            patch = x_ref[pl.ds(base + off, tm), :]    # (TM, Cin)
            contrib = jax.lax.dot_general(             # (Cout,Cin) x (TM,Cin)^T
                w_ref[t], patch,
                dimension_numbers=(((1,), (1,)), ((), ())),
                preferred_element_type=jnp.float32)    # (Cout, TM) on the MXU
            if t == 0:
                acc_ref[...] = contrib
            else:
                acc_ref[...] += contrib
        out = jnp.maximum(acc_ref[...] + b_ref[...].astype(jnp.float32), 0.0)
        o_ref[...] = out.astype(o_ref.dtype)

    return kernel


def basic_conv2d(x_nchw, weight_oihw, bias, *, padding=0, compute_dtype=None):
    """Conv2d (stride 1, symmetric padding) + ReLU, PyTorch NCHW semantics."""
    N, Cin, H, W = x_nchw.shape
    Cout, Cin_w, KH, KW = weight_oihw.shape
    assert Cin == Cin_w, "channel mismatch"
    out_dtype = x_nchw.dtype
    cdt = jnp.dtype(compute_dtype) if compute_dtype is not None else jnp.dtype(out_dtype)

    Hp, Wp = H + 2 * padding, W + 2 * padding
    Ho, Wo = Hp - KH + 1, Wp - KW + 1
    assert Ho > 0 and Wo > 0

    # Flattened-width trick: output rows keep stride Wp so every tap is a
    # uniform row shift of the flattened padded image; columns ow >= Wo are
    # garbage and get sliced off at the end.
    Lout = Ho * Wp
    w_extra = (KH - 1) * Wp + (KW - 1)

    # ---- VMEM-aware tile pick + scoped limit (generation aware) -------------
    try:
        vmem_phys = int(pltpu.get_tpu_info().vmem_capacity_bytes)
    except Exception:
        vmem_phys = 64 * 1024 * 1024          # conservative fallback (v7x-sized)
    budget = int(vmem_phys * 0.4)
    in_isz = jnp.dtype(cdt).itemsize
    out_isz = jnp.dtype(out_dtype).itemsize
    lout128 = _round_up(Lout, 128)

    def vmem_est(tm):
        lin = _round_up(Lout, tm) + w_extra
        x_blk = 2 * _round_up(lin, 8) * _round_up(Cin, 128) * in_isz   # double-buffered
        w_blk = KH * KW * _round_up(Cout, 8) * _round_up(Cin, 128) * in_isz
        b_blk = _round_up(Cout, 8) * 128 * 4
        o_blk = 2 * _round_up(Cout, 8) * tm * out_isz
        acc = _round_up(Cout, 8) * tm * 4
        return x_blk + w_blk + b_blk + o_blk + acc

    TM = min(2048, lout128)                    # lane-dense tile (multiple of 128)
    while TM > 128 and vmem_est(TM) > budget:
        TM -= 128
    # v7x has 2 TensorCores: expose >= 2 parallel grid blocks when batch == 1.
    if N * _cdiv(Lout, TM) < 2 and lout128 >= 256:
        TM = min(TM, _round_up(lout128 // 2, 128))
        while TM > 128 and _cdiv(Lout, TM) < 2:
            TM -= 128
    MT = _cdiv(Lout, TM)
    Lout_pad = MT * TM
    Lin = Lout_pad + w_extra                   # rows the last tile's taps can touch

    vmem_limit = int(min(0.9 * vmem_phys, max(2 * vmem_est(TM), 32 * 1024 * 1024)))

    # ---- layout plumbing in XLA (no im2col, no 9x blowup) --------------------
    x_pad = jnp.pad(
        x_nchw, ((0, 0), (0, 0), (padding, padding), (padding, padding)))
    x_cl = x_pad.transpose(0, 2, 3, 1).reshape(N, Hp * Wp, Cin)      # channels-last, flat
    x_cl = jnp.pad(x_cl, ((0, 0), (0, Lin - Hp * Wp), (0, 0))).astype(cdt)

    w_all = weight_oihw.transpose(2, 3, 0, 1).reshape(KH * KW, Cout, Cin).astype(cdt)
    b_col = bias.reshape(Cout, 1).astype(jnp.float32)

    tap_offsets = tuple(kh * Wp + kw for kh in range(KH) for kw in range(KW))
    kernel = _make_conv_kernel(tap_offsets, TM)

    cost = pl.CostEstimate(
        flops=2 * N * Cout * Cin * KH * KW * Ho * Wo,
        transcendentals=0,
        bytes_accessed=int(x_cl.size) * in_isz + int(w_all.size) * in_isz
                       + int(b_col.size) * 4 + N * Cout * Lout_pad * out_isz)

    def run(single_buffer_consts):
        const_kw = {}
        if single_buffer_consts and hasattr(pl, "Buffered"):
            # Constant-index weight/bias blocks: no point double-buffering them.
            const_kw = dict(pipeline_mode=pl.Buffered(1))
        grid_spec = pltpu.PrefetchScalarGridSpec(
            num_scalar_prefetch=0,
            grid=(N, MT),
            in_specs=[
                # Whole padded image per n: block index depends only on n, so it
                # is DMA'd once per image and reused across all m tiles.
                pl.BlockSpec((None, Lin, Cin), lambda n, m: (n, 0, 0)),
                pl.BlockSpec((KH * KW, Cout, Cin), lambda n, m: (0, 0, 0), **const_kw),
                pl.BlockSpec((Cout, 1), lambda n, m: (0, 0), **const_kw),
            ],
            out_specs=pl.BlockSpec((None, Cout, TM), lambda n, m: (n, 0, m)),
            scratch_shapes=[pltpu.VMEM((Cout, TM), jnp.float32)],
        )
        return pl.pallas_call(
            kernel,
            out_shape=jax.ShapeDtypeStruct((N, Cout, Lout_pad), out_dtype),
            grid_spec=grid_spec,
            compiler_params=pltpu.CompilerParams(
                dimension_semantics=("parallel", "parallel"),
                vmem_limit_bytes=vmem_limit),
            cost_estimate=cost,
        )(x_cl, w_all, b_col)

    try:
        out_flat = run(True)
    except Exception:
        # Fallback for JAX versions that reject pl.Buffered(1); identical kernel.
        out_flat = run(False)

    # Drop the 128-pad tail and the width-trick wrap columns (cheap slice).
    out = out_flat[:, :, :Ho * Wp].reshape(N, Cout, Ho, Wp)[:, :, :, :Wo]
    return out


if __name__ == "__main__":
    # Small shapes consistent with the module: BasicConv2d(4, 8, 3, padding=1)
    N, Cin, H, W = 2, 4, 16, 16
    Cout, Ksz, pad = 8, 3, 1

    key = jax.random.PRNGKey(0)
    kx, kw, kb = jax.random.split(key, 3)

    x = jax.random.normal(kx, (N, Cin, H, W), dtype=jnp.float32)
    # Deterministic parameter init (kaiming-uniform-like bound, as nn.Conv2d).
    fan_in = Cin * Ksz * Ksz
    bound = 1.0 / (fan_in ** 0.5)
    weight = jax.random.uniform(
        kw, (Cout, Cin, Ksz, Ksz), minval=-bound, maxval=bound, dtype=jnp.float32)
    bias = jax.random.uniform(
        kb, (Cout,), minval=-bound, maxval=bound, dtype=jnp.float32)

    out = jax.block_until_ready(basic_conv2d(x, weight, bias, padding=pad))

    # Reference: same semantics as F.relu(self.conv(x)).
    ref = jax.lax.conv_general_dilated(
        x, weight, window_strides=(1, 1), padding=[(pad, pad), (pad, pad)],
        dimension_numbers=("NCHW", "OIHW", "NCHW"),
        precision=jax.lax.Precision.HIGHEST)
    ref = jnp.maximum(ref + bias.reshape(1, Cout, 1, 1), 0.0)

    assert out.shape == (N, Cout, H, W)
    assert jnp.allclose(out, ref, atol=1e-3, rtol=1e-3)

    print("KERNEL_OK")
</pallas_src>

<mosaic_0001>
module attributes {stable_mosaic.version = 11 : i64} {
  func.func @kernel(%arg0: i32, %arg1: i32, %arg2: memref<1x422x4xf32, #tpu.memory_space<vmem>>, %arg3: memref<9x8x4xf32, #tpu.memory_space<vmem>>, %arg4: memref<8x1xf32, #tpu.memory_space<vmem>>, %arg5: memref<1x8x384xf32, #tpu.memory_space<vmem>>, %arg6: memref<8x384xf32, #tpu.memory_space<vmem>>) attributes {dimension_semantics = [#tpu.dimension_semantics<parallel>, #tpu.dimension_semantics<parallel>], iteration_bounds = array<i64: 2, 1>, scalar_prefetch = 0 : i64, scratch_operands = 1 : i64, tpu.core_type = #tpu.core_type<tc>, window_params = [{transform_indices = @transform_0, window_bounds = array<i64: 1, 422, 4>}, {pipeline_mode = #tpu.pipeline_mode<synchronous>, transform_indices = @transform_1, window_bounds = array<i64: 9, 8, 4>}, {pipeline_mode = #tpu.pipeline_mode<synchronous>, transform_indices = @transform_2, window_bounds = array<i64: 8, 1>}, {transform_indices = @transform_3, window_bounds = array<i64: 1, 8, 384>}]} {
    %c384_i32 = arith.constant 384 : i32
    %0 = arith.muli %arg1, %c384_i32 : i32
    %1 = tpu.assume_multiple %0, 128 : i32
    %c0_i32 = arith.constant 0 : i32
    %2 = arith.addi %1, %c0_i32 : i32
    %c0 = arith.constant 0 : index
    %3 = arith.index_cast %2 : i32 to index
    %c0_0 = arith.constant 0 : index
    %4 = vector.load %arg2[%c0, %3, %c0_0] : memref<1x422x4xf32, #tpu.memory_space<vmem>>, vector<1x384x4xf32>
    %5 = vector.shape_cast %4 : vector<1x384x4xf32> to vector<384x4xf32>
    %c0_1 = arith.constant 0 : index
    %c0_2 = arith.constant 0 : index
    %c0_3 = arith.constant 0 : index
    %6 = vector.load %arg3[%c0_1, %c0_2, %c0_3] : memref<9x8x4xf32, #tpu.memory_space<vmem>>, vector<1x8x4xf32>
    %7 = vector.shape_cast %6 : vector<1x8x4xf32> to vector<8x4xf32>
    %cst = arith.constant dense<0.000000e+00> : vector<8x384xf32>
    %8 = tpu.matmul %7, %5, %cst {dimension_numbers = #tpu.dot_dimension_numbers<[1], [1], [0], [0], [0, 0, 1, 0], [], []>} : vector<8x4xf32>, vector<384x4xf32>, vector<8x384xf32> -> vector<8x384xf32>
    %c0_4 = arith.constant 0 : index
    %c0_5 = arith.constant 0 : index
    %9 = vector.load %arg6[%c0_4, %c0_5] : memref<8x384xf32, #tpu.memory_space<vmem>>, vector<8x384xf32>
    tpu.vector_store %arg6[%c0_4, %c0_5], %8 {strides = array<i32>} : memref<8x384xf32, #tpu.memory_space<vmem>>, vector<8x384xf32>,
    %c1_i32 = arith.constant 1 : i32
    %10 = arith.addi %1, %c1_i32 : i32
    %c0_6 = arith.constant 0 : index
    %11 = arith.index_cast %10 : i32 to index
    %c0_7 = arith.constant 0 : index
    %12 = vector.load %arg2[%c0_6, %11, %c0_7] : memref<1x422x4xf32, #tpu.memory_space<vmem>>, vector<1x384x4xf32>
    %13 = vector.shape_cast %12 : vector<1x384x4xf32> to vector<384x4xf32>
    %c1 = arith.constant 1 : index
    %c0_8 = arith.constant 0 : index
    %c0_9 = arith.constant 0 : index
    %14 = vector.load %arg3[%c1, %c0_8, %c0_9] : memref<9x8x4xf32, #tpu.memory_space<vmem>>, vector<1x8x4xf32>
    %15 = vector.shape_cast %14 : vector<1x8x4xf32> to vector<8x4xf32>
    %cst_10 = arith.constant dense<0.000000e+00> : vector<8x384xf32>
    %16 = tpu.matmul %15, %13, %cst_10 {dimension_numbers = #tpu.dot_dimension_numbers<[1], [1], [0], [0], [0, 0, 1, 0], [], []>} : vector<8x4xf32>, vector<384x4xf32>, vector<8x384xf32> -> vector<8x384xf32>
    %c0_11 = arith.constant 0 : index
    %c0_12 = arith.constant 0 : index
    %17 = vector.load %arg6[%c0_11, %c0_12] : memref<8x384xf32, #tpu.memory_space<vmem>>, vector<8x384xf32>
    %18 = arith.addf %17, %16 : vector<8x384xf32>
    %c0_13 = arith.constant 0 : index
    %c0_14 = arith.constant 0 : index
    %19 = vector.load %arg6[%c0_13, %c0_14] : memref<8x384xf32, #tpu.memory_space<vmem>>, vector<8x384xf32>
    tpu.vector_store %arg6[%c0_13, %c0_14], %18 {strides = array<i32>} : memref<8x384xf32, #tpu.memory_space<vmem>>, vector<8x384xf32>,
    %c2_i32 = arith.constant 2 : i32
    %20 = arith.addi %1, %c2_i32 : i32
    %c0_15 = arith.constant 0 : index
    %21 = arith.index_cast %20 : i32 to index
    %c0_16 = arith.constant 0 : index
    %22 = vector.load %arg2[%c0_15, %21, %c0_16] : memref<1x422x4xf32, #tpu.memory_space<vmem>>, vector<1x384x4xf32>
    %23 = vector.shape_cast %22 : vector<1x384x4xf32> to vector<384x4xf32>
    %c2 = arith.constant 2 : index
    %c0_17 = arith.constant 0 : index
    %c0_18 = arith.constant 0 : index
    %24 = vector.load %arg3[%c2, %c0_17, %c0_18] : memref<9x8x4xf32, #tpu.memory_space<vmem>>, vector<1x8x4xf32>
    %25 = vector.shape_cast %24 : vector<1x8x4xf32> to vector<8x4xf32>
    %cst_19 = arith.constant dense<0.000000e+00> : vector<8x384xf32>
    %26 = tpu.matmul %25, %23, %cst_19 {dimension_numbers = #tpu.dot_dimension_numbers<[1], [1], [0], [0], [0, 0, 1, 0], [], []>} : vector<8x4xf32>, vector<384x4xf32>, vector<8x384xf32> -> vector<8x384xf32>
    %c0_20 = arith.constant 0 : index
    %c0_21 = arith.constant 0 : index
    %27 = vector.load %arg6[%c0_20, %c0_21] : memref<8x384xf32, #tpu.memory_space<vmem>>, vector<8x384xf32>
    %28 = arith.addf %27, %26 : vector<8x384xf32>
    %c0_22 = arith.constant 0 : index
    %c0_23 = arith.constant 0 : index
    %29 = vector.load %arg6[%c0_22, %c0_23] : memref<8x384xf32, #tpu.memory_space<vmem>>, vector<8x384xf32>
    tpu.vector_store %arg6[%c0_22, %c0_23], %28 {strides = array<i32>} : memref<8x384xf32, #tpu.memory_space<vmem>>, vector<8x384xf32>,
    %c18_i32 = arith.constant 18 : i32
    %30 = arith.addi %1, %c18_i32 : i32
    %c0_24 = arith.constant 0 : index
    %31 = arith.index_cast %30 : i32 to index
    %c0_25 = arith.constant 0 : index
    %32 = vector.load %arg2[%c0_24, %31, %c0_25] : memref<1x422x4xf32, #tpu.memory_space<vmem>>, vector<1x384x4xf32>
    %33 = vector.shape_cast %32 : vector<1x384x4xf32> to vector<384x4xf32>
    %c3 = arith.constant 3 : index
    %c0_26 = arith.constant 0 : index
    %c0_27 = arith.constant 0 : index
    %34 = vector.load %arg3[%c3, %c0_26, %c0_27] : memref<9x8x4xf32, #tpu.memory_space<vmem>>, vector<1x8x4xf32>
    %35 = vector.shape_cast %34 : vector<1x8x4xf32> to vector<8x4xf32>
    %cst_28 = arith.constant dense<0.000000e+00> : vector<8x384xf32>
    %36 = tpu.matmul %35, %33, %cst_28 {dimension_numbers = #tpu.dot_dimension_numbers<[1], [1], [0], [0], [0, 0, 1, 0], [], []>} : vector<8x4xf32>, vector<384x4xf32>, vector<8x384xf32> -> vector<8x384xf32>
    %c0_29 = arith.constant 0 : index
    %c0_30 = arith.constant 0 : index
    %37 = vector.load %arg6[%c0_29, %c0_30] : memref<8x384xf32, #tpu.memory_space<vmem>>, vector<8x384xf32>
    %38 = arith.addf %37, %36 : vector<8x384xf32>
    %c0_31 = arith.constant 0 : index
    %c0_32 = arith.constant 0 : index
    %39 = vector.load %arg6[%c0_31, %c0_32] : memref<8x384xf32, #tpu.memory_space<vmem>>, vector<8x384xf32>
    tpu.vector_store %arg6[%c0_31, %c0_32], %38 {strides = array<i32>} : memref<8x384xf32, #tpu.memory_space<vmem>>, vector<8x384xf32>,
    %c19_i32 = arith.constant 19 : i32
    %40 = arith.addi %1, %c19_i32 : i32
    %c0_33 = arith.constant 0 : index
    %41 = arith.index_cast %40 : i32 to index
    %c0_34 = arith.constant 0 : index
    %42 = vector.load %arg2[%c0_33, %41, %c0_34] : memref<1x422x4xf32, #tpu.memory_space<vmem>>, vector<1x384x4xf32>
    %43 = vector.shape_cast %42 : vector<1x384x4xf32> to vector<384x4xf32>
    %c4 = arith.constant 4 : index
    %c0_35 = arith.constant 0 : index
    %c0_36 = arith.constant 0 : index
    %44 = vector.load %arg3[%c4, %c0_35, %c0_36] : memref<9x8x4xf32, #tpu.memory_space<vmem>>, vector<1x8x4xf32>
    %45 = vector.shape_cast %44 : vector<1x8x4xf32> to vector<8x4xf32>
    %cst_37 = arith.constant dense<0.000000e+00> : vector<8x384xf32>
    %46 = tpu.matmul %45, %43, %cst_37 {dimension_numbers = #tpu.dot_dimension_numbers<[1], [1], [0], [0], [0, 0, 1, 0], [], []>} : vector<8x4xf32>, vector<384x4xf32>, vector<8x384xf32> -> vector<8x384xf32>
    %c0_38 = arith.constant 0 : index
    %c0_39 = arith.constant 0 : index
    %47 = vector.load %arg6[%c0_38, %c0_39] : memref<8x384xf32, #tpu.memory_space<vmem>>, vector<8x384xf32>
    %48 = arith.addf %47, %46 : vector<8x384xf32>
    %c0_40 = arith.constant 0 : index
    %c0_41 = arith.constant 0 : index
    %49 = vector.load %arg6[%c0_40, %c0_41] : memref<8x384xf32, #tpu.memory_space<vmem>>, vector<8x384xf32>
    tpu.vector_store %arg6[%c0_40, %c0_41], %48 {strides = array<i32>} : memref<8x384xf32, #tpu.memory_space<vmem>>, vector<8x384xf32>,
    %c20_i32 = arith.constant 20 : i32
    %50 = arith.addi %1, %c20_i32 : i32
    %c0_42 = arith.constant 0 : index
    %51 = arith.index_cast %50 : i32 to index
    %c0_43 = arith.constant 0 : index
    %52 = vector.load %arg2[%c0_42, %51, %c0_43] : memref<1x422x4xf32, #tpu.memory_space<vmem>>, vector<1x384x4xf32>
    %53 = vector.shape_cast %52 : vector<1x384x4xf32> to vector<384x4xf32>
    %c5 = arith.constant 5 : index
    %c0_44 = arith.constant 0 : index
    %c0_45 = arith.constant 0 : index
    %54 = vector.load %arg3[%c5, %c0_44, %c0_45] : memref<9x8x4xf32, #tpu.memory_space<vmem>>, vector<1x8x4xf32>
    %55 = vector.shape_cast %54 : vector<1x8x4xf32> to vector<8x4xf32>
    %cst_46 = arith.constant dense<0.000000e+00> : vector<8x384xf32>
    %56 = tpu.matmul %55, %53, %cst_46 {dimension_numbers = #tpu.dot_dimension_numbers<[1], [1], [0], [0], [0, 0, 1, 0], [], []>} : vector<8x4xf32>, vector<384x4xf32>, vector<8x384xf32> -> vector<8x384xf32>
    %c0_47 = arith.constant 0 : index
    %c0_48 = arith.constant 0 : index
    %57 = vector.load %arg6[%c0_47, %c0_48] : memref<8x384xf32, #tpu.memory_space<vmem>>, vector<8x384xf32>
    %58 = arith.addf %57, %56 : vector<8x384xf32>
    %c0_49 = arith.constant 0 : index
    %c0_50 = arith.constant 0 : index
    %59 = vector.load %arg6[%c0_49, %c0_50] : memref<8x384xf32, #tpu.memory_space<vmem>>, vector<8x384xf32>
    tpu.vector_store %arg6[%c0_49, %c0_50], %58 {strides = array<i32>} : memref<8x384xf32, #tpu.memory_space<vmem>>, vector<8x384xf32>,
    %c36_i32 = arith.constant 36 : i32
    %60 = arith.addi %1, %c36_i32 : i32
    %c0_51 = arith.constant 0 : index
    %61 = arith.index_cast %60 : i32 to index
    %c0_52 = arith.constant 0 : index
    %62 = vector.load %arg2[%c0_51, %61, %c0_52] : memref<1x422x4xf32, #tpu.memory_space<vmem>>, vector<1x384x4xf32>
    %63 = vector.shape_cast %62 : vector<1x384x4xf32> to vector<384x4xf32>
    %c6 = arith.constant 6 : index
    %c0_53 = arith.constant 0 : index
    %c0_54 = arith.constant 0 : index
    %64 = vector.load %arg3[%c6, %c0_53, %c0_54] : memref<9x8x4xf32, #tpu.memory_space<vmem>>, vector<1x8x4xf32>
    %65 = vector.shape_cast %64 : vector<1x8x4xf32> to vector<8x4xf32>
    %cst_55 = arith.constant dense<0.000000e+00> : vector<8x384xf32>
    %66 = tpu.matmul %65, %63, %cst_55 {dimension_numbers = #tpu.dot_dimension_numbers<[1], [1], [0], [0], [0, 0, 1, 0], [], []>} : vector<8x4xf32>, vector<384x4xf32>, vector<8x384xf32> -> vector<8x384xf32>
    %c0_56 = arith.constant 0 : index
    %c0_57 = arith.constant 0 : index
    %67 = vector.load %arg6[%c0_56, %c0_57] : memref<8x384xf32, #tpu.memory_space<vmem>>, vector<8x384xf32>
    %68 = arith.addf %67, %66 : vector<8x384xf32>
    %c0_58 = arith.constant 0 : index
    %c0_59 = arith.constant 0 : index
    %69 = vector.load %arg6[%c0_58, %c0_59] : memref<8x384xf32, #tpu.memory_space<vmem>>, vector<8x384xf32>
    tpu.vector_store %arg6[%c0_58, %c0_59], %68 {strides = array<i32>} : memref<8x384xf32, #tpu.memory_space<vmem>>, vector<8x384xf32>,
    %c37_i32 = arith.constant 37 : i32
    %70 = arith.addi %1, %c37_i32 : i32
    %c0_60 = arith.constant 0 : index
    %71 = arith.index_cast %70 : i32 to index
    %c0_61 = arith.constant 0 : index
    %72 = vector.load %arg2[%c0_60, %71, %c0_61] : memref<1x422x4xf32, #tpu.memory_space<vmem>>, vector<1x384x4xf32>
    %73 = vector.shape_cast %72 : vector<1x384x4xf32> to vector<384x4xf32>
    %c7 = arith.constant 7 : index
    %c0_62 = arith.constant 0 : index
    %c0_63 = arith.constant 0 : index
    %74 = vector.load %arg3[%c7, %c0_62, %c0_63] : memref<9x8x4xf32, #tpu.memory_space<vmem>>, vector<1x8x4xf32>
    %75 = vector.shape_cast %74 : vector<1x8x4xf32> to vector<8x4xf32>
    %cst_64 = arith.constant dense<0.000000e+00> : vector<8x384xf32>
    %76 = tpu.matmul %75, %73, %cst_64 {dimension_numbers = #tpu.dot_dimension_numbers<[1], [1], [0], [0], [0, 0, 1, 0], [], []>} : vector<8x4xf32>, vector<384x4xf32>, vector<8x384xf32> -> vector<8x384xf32>
    %c0_65 = arith.constant 0 : index
    %c0_66 = arith.constant 0 : index
    %77 = vector.load %arg6[%c0_65, %c0_66] : memref<8x384xf32, #tpu.memory_space<vmem>>, vector<8x384xf32>
    %78 = arith.addf %77, %76 : vector<8x384xf32>
    %c0_67 = arith.constant 0 : index
    %c0_68 = arith.constant 0 : index
    %79 = vector.load %arg6[%c0_67, %c0_68] : memref<8x384xf32, #tpu.memory_space<vmem>>, vector<8x384xf32>
    tpu.vector_store %arg6[%c0_67, %c0_68], %78 {strides = array<i32>} : memref<8x384xf32, #tpu.memory_space<vmem>>, vector<8x384xf32>,
    %c38_i32 = arith.constant 38 : i32
    %80 = arith.addi %1, %c38_i32 : i32
    %c0_69 = arith.constant 0 : index
    %81 = arith.index_cast %80 : i32 to index
    %c0_70 = arith.constant 0 : index
    %82 = vector.load %arg2[%c0_69, %81, %c0_70] : memref<1x422x4xf32, #tpu.memory_space<vmem>>, vector<1x384x4xf32>
    %83 = vector.shape_cast %82 : vector<1x384x4xf32> to vector<384x4xf32>
    %c8 = arith.constant 8 : index
    %c0_71 = arith.constant 0 : index
    %c0_72 = arith.constant 0 : index
    %84 = vector.load %arg3[%c8, %c0_71, %c0_72] : memref<9x8x4xf32, #tpu.memory_space<vmem>>, vector<1x8x4xf32>
    %85 = vector.shape_cast %84 : vector<1x8x4xf32> to vector<8x4xf32>
    %cst_73 = arith.constant dense<0.000000e+00> : vector<8x384xf32>
    %86 = tpu.matmul %85, %83, %cst_73 {dimension_numbers = #tpu.dot_dimension_numbers<[1], [1], [0], [0], [0, 0, 1, 0], [], []>} : vector<8x4xf32>, vector<384x4xf32>, vector<8x384xf32> -> vector<8x384xf32>
    %c0_74 = arith.constant 0 : index
    %c0_75 = arith.constant 0 : index
    %87 = vector.load %arg6[%c0_74, %c0_75] : memref<8x384xf32, #tpu.memory_space<vmem>>, vector<8x384xf32>
    %88 = arith.addf %87, %86 : vector<8x384xf32>
    %c0_76 = arith.constant 0 : index
    %c0_77 = arith.constant 0 : index
    %89 = vector.load %arg6[%c0_76, %c0_77] : memref<8x384xf32, #tpu.memory_space<vmem>>, vector<8x384xf32>
    tpu.vector_store %arg6[%c0_76, %c0_77], %88 {strides = array<i32>} : memref<8x384xf32, #tpu.memory_space<vmem>>, vector<8x384xf32>,
    %c0_78 = arith.constant 0 : index
    %c0_79 = arith.constant 0 : index
    %90 = vector.load %arg6[%c0_78, %c0_79] : memref<8x384xf32, #tpu.memory_space<vmem>>, vector<8x384xf32>
    %c0_80 = arith.constant 0 : index
    %c0_81 = arith.constant 0 : index
    %91 = vector.load %arg4[%c0_80, %c0_81] : memref<8x1xf32, #tpu.memory_space<vmem>>, vector<8x1xf32>
    %92 = vector.broadcast %91 : vector<8x1xf32> to vector<8x384xf32>
    %93 = arith.addf %90, %92 : vector<8x384xf32>
    %cst_82 = arith.constant 0.000000e+00 : f32
    %94 = vector.broadcast %cst_82 : f32 to vector<8x384xf32>
    %95 = arith.maximumf %93, %94 : vector<8x384xf32>
    %c0_83 = arith.constant 0 : index
    %c0_84 = arith.constant 0 : index
    %c0_85 = arith.constant 0 : index
    %96 = vector.load %arg5[%c0_83, %c0_84, %c0_85] : memref<1x8x384xf32, #tpu.memory_space<vmem>>, vector<1x8x384xf32>
    %97 = vector.shape_cast %96 : vector<1x8x384xf32> to vector<8x384xf32>
    %98 = vector.shape_cast %95 : vector<8x384xf32> to vector<1x8x384xf32>
    tpu.vector_store %arg5[%c0_83, %c0_84, %c0_85], %98 {strides = array<i32>} : memref<1x8x384xf32, #tpu.memory_space<vmem>>, vector<1x8x384xf32>,
    return
  }
  func.func @transform_0(%arg0: i32, %arg1: i32) -> (i32, i32, i32) {
    %c0_i32 = arith.constant 0 : i32
    %c0_i32_0 = arith.constant 0 : i32
    %c0_i32_1 = arith.constant 0 : i32
    return %arg0, %c0_i32, %c0_i32_0 : i32, i32, i32
  }
  func.func @transform_1(%arg0: i32, %arg1: i32) -> (i32, i32, i32) {
    %c0_i32 = arith.constant 0 : i32
    %c0_i32_0 = arith.constant 0 : i32
    %c0_i32_1 = arith.constant 0 : i32
    %c0_i32_2 = arith.constant 0 : i32
    return %c0_i32, %c0_i32_0, %c0_i32_1 : i32, i32, i32
  }
  func.func @transform_2(%arg0: i32, %arg1: i32) -> (i32, i32) {
    %c0_i32 = arith.constant 0 : i32
    %c0_i32_0 = arith.constant 0 : i32
    %c0_i32_1 = arith.constant 0 : i32
    return %c0_i32, %c0_i32_0 : i32, i32
  }
  func.func @transform_3(%arg0: i32, %arg1: i32) -> (i32, i32, i32) {
    %c0_i32 = arith.constant 0 : i32
    %c0_i32_0 = arith.constant 0 : i32
    return %arg0, %c0_i32, %arg1 : i32, i32, i32
  }
}

module attributes {stable_mosaic.version = 11 : i64} {
  func.func @kernel(%arg0: i32, %arg1: i32, %arg2: memref<1x422x4xf32, #tpu.memory_space<vmem>>, %arg3: memref<9x8x4xf32, #tpu.memory_space<vmem>>, %arg4: memref<8x1xf32, #tpu.memory_space<vmem>>, %arg5: memref<1x8x384xf32, #tpu.memory_space<vmem>>, %arg6: memref<8x384xf32, #tpu.memory_space<vmem>>) attributes {dimension_semantics = [#tpu.dimension_semantics<parallel>, #tpu.dimension_semantics<parallel>], iteration_bounds = array<i64: 2, 1>, scalar_prefetch = 0 : i64, scratch_operands = 1 : i64, tpu.core_type = #tpu.core_type<tc>, window_params = [{transform_indices = @transform_0, window_bounds = array<i64: 1, 422, 4>}, {pipeline_mode = #tpu.pipeline_mode<synchronous>, transform_indices = @transform_1, window_bounds = array<i64: 9, 8, 4>}, {pipeline_mode = #tpu.pipeline_mode<synchronous>, transform_indices = @transform_2, window_bounds = array<i64: 8, 1>}, {transform_indices = @transform_3, window_bounds = array<i64: 1, 8, 384>}]} {
    %c384_i32 = arith.constant 384 : i32
    %0 = arith.muli %arg1, %c384_i32 : i32
    %1 = tpu.assume_multiple %0, 128 : i32
    %c0_i32 = arith.constant 0 : i32
    %2 = arith.addi %1, %c0_i32 : i32
    %c0 = arith.constant 0 : index
    %3 = arith.index_cast %2 : i32 to index
    %c0_0 = arith.constant 0 : index
    %4 = vector.load %arg2[%c0, %3, %c0_0] : memref<1x422x4xf32, #tpu.memory_space<vmem>>, vector<1x384x4xf32>
    %5 = vector.shape_cast %4 : vector<1x384x4xf32> to vector<384x4xf32>
    %c0_1 = arith.constant 0 : index
    %c0_2 = arith.constant 0 : index
    %c0_3 = arith.constant 0 : index
    %6 = vector.load %arg3[%c0_1, %c0_2, %c0_3] : memref<9x8x4xf32, #tpu.memory_space<vmem>>, vector<1x8x4xf32>
    %7 = vector.shape_cast %6 : vector<1x8x4xf32> to vector<8x4xf32>
    %cst = arith.constant dense<0.000000e+00> : vector<8x384xf32>
    %8 = tpu.matmul %7, %5, %cst {dimension_numbers = #tpu.dot_dimension_numbers<[1], [1], [0], [0], [0, 0, 1, 0], [], []>} : vector<8x4xf32>, vector<384x4xf32>, vector<8x384xf32> -> vector<8x384xf32>
    %c0_4 = arith.constant 0 : index
    %c0_5 = arith.constant 0 : index
    %9 = vector.load %arg6[%c0_4, %c0_5] : memref<8x384xf32, #tpu.memory_space<vmem>>, vector<8x384xf32>
    tpu.vector_store %arg6[%c0_4, %c0_5], %8 {strides = array<i32>} : memref<8x384xf32, #tpu.memory_space<vmem>>, vector<8x384xf32>,
    %c1_i32 = arith.constant 1 : i32
    %10 = arith.addi %1, %c1_i32 : i32
    %c0_6 = arith.constant 0 : index
    %11 = arith.index_cast %10 : i32 to index
    %c0_7 = arith.constant 0 : index
    %12 = vector.load %arg2[%c0_6, %11, %c0_7] : memref<1x422x4xf32, #tpu.memory_space<vmem>>, vector<1x384x4xf32>
    %13 = vector.shape_cast %12 : vector<1x384x4xf32> to vector<384x4xf32>
    %c1 = arith.constant 1 : index
    %c0_8 = arith.constant 0 : index
    %c0_9 = arith.constant 0 : index
    %14 = vector.load %arg3[%c1, %c0_8, %c0_9] : memref<9x8x4xf32, #tpu.memory_space<vmem>>, vector<1x8x4xf32>
    %15 = vector.shape_cast %14 : vector<1x8x4xf32> to vector<8x4xf32>
    %cst_10 = arith.constant dense<0.000000e+00> : vector<8x384xf32>
    %16 = tpu.matmul %15, %13, %cst_10 {dimension_numbers = #tpu.dot_dimension_numbers<[1], [1], [0], [0], [0, 0, 1, 0], [], []>} : vector<8x4xf32>, vector<384x4xf32>, vector<8x384xf32> -> vector<8x384xf32>
    %c0_11 = arith.constant 0 : index
    %c0_12 = arith.constant 0 : index
    %17 = vector.load %arg6[%c0_11, %c0_12] : memref<8x384xf32, #tpu.memory_space<vmem>>, vector<8x384xf32>
    %18 = arith.addf %17, %16 : vector<8x384xf32>
    %c0_13 = arith.constant 0 : index
    %c0_14 = arith.constant 0 : index
    %19 = vector.load %arg6[%c0_13, %c0_14] : memref<8x384xf32, #tpu.memory_space<vmem>>, vector<8x384xf32>
    tpu.vector_store %arg6[%c0_13, %c0_14], %18 {strides = array<i32>} : memref<8x384xf32, #tpu.memory_space<vmem>>, vector<8x384xf32>,
    %c2_i32 = arith.constant 2 : i32
    %20 = arith.addi %1, %c2_i32 : i32
    %c0_15 = arith.constant 0 : index
    %21 = arith.index_cast %20 : i32 to index
    %c0_16 = arith.constant 0 : index
    %22 = vector.load %arg2[%c0_15, %21, %c0_16] : memref<1x422x4xf32, #tpu.memory_space<vmem>>, vector<1x384x4xf32>
    %23 = vector.shape_cast %22 : vector<1x384x4xf32> to vector<384x4xf32>
    %c2 = arith.constant 2 : index
    %c0_17 = arith.constant 0 : index
    %c0_18 = arith.constant 0 : index
    %24 = vector.load %arg3[%c2, %c0_17, %c0_18] : memref<9x8x4xf32, #tpu.memory_space<vmem>>, vector<1x8x4xf32>
    %25 = vector.shape_cast %24 : vector<1x8x4xf32> to vector<8x4xf32>
    %cst_19 = arith.constant dense<0.000000e+00> : vector<8x384xf32>
    %26 = tpu.matmul %25, %23, %cst_19 {dimension_numbers = #tpu.dot_dimension_numbers<[1], [1], [0], [0], [0, 0, 1, 0], [], []>} : vector<8x4xf32>, vector<384x4xf32>, vector<8x384xf32> -> vector<8x384xf32>
    %c0_20 = arith.constant 0 : index
    %c0_21 = arith.constant 0 : index
    %27 = vector.load %arg6[%c0_20, %c0_21] : memref<8x384xf32, #tpu.memory_space<vmem>>, vector<8x384xf32>
    %28 = arith.addf %27, %26 : vector<8x384xf32>
    %c0_22 = arith.constant 0 : index
    %c0_23 = arith.constant 0 : index
    %29 = vector.load %arg6[%c0_22, %c0_23] : memref<8x384xf32, #tpu.memory_space<vmem>>, vector<8x384xf32>
    tpu.vector_store %arg6[%c0_22, %c0_23], %28 {strides = array<i32>} : memref<8x384xf32, #tpu.memory_space<vmem>>, vector<8x384xf32>,
    %c18_i32 = arith.constant 18 : i32
    %30 = arith.addi %1, %c18_i32 : i32
    %c0_24 = arith.constant 0 : index
    %31 = arith.index_cast %30 : i32 to index
    %c0_25 = arith.constant 0 : index
    %32 = vector.load %arg2[%c0_24, %31, %c0_25] : memref<1x422x4xf32, #tpu.memory_space<vmem>>, vector<1x384x4xf32>
    %33 = vector.shape_cast %32 : vector<1x384x4xf32> to vector<384x4xf32>
    %c3 = arith.constant 3 : index
    %c0_26 = arith.constant 0 : index
    %c0_27 = arith.constant 0 : index
    %34 = vector.load %arg3[%c3, %c0_26, %c0_27] : memref<9x8x4xf32, #tpu.memory_space<vmem>>, vector<1x8x4xf32>
    %35 = vector.shape_cast %34 : vector<1x8x4xf32> to vector<8x4xf32>
    %cst_28 = arith.constant dense<0.000000e+00> : vector<8x384xf32>
    %36 = tpu.matmul %35, %33, %cst_28 {dimension_numbers = #tpu.dot_dimension_numbers<[1], [1], [0], [0], [0, 0, 1, 0], [], []>} : vector<8x4xf32>, vector<384x4xf32>, vector<8x384xf32> -> vector<8x384xf32>
    %c0_29 = arith.constant 0 : index
    %c0_30 = arith.constant 0 : index
    %37 = vector.load %arg6[%c0_29, %c0_30] : memref<8x384xf32, #tpu.memory_space<vmem>>, vector<8x384xf32>
    %38 = arith.addf %37, %36 : vector<8x384xf32>
    %c0_31 = arith.constant 0 : index
    %c0_32 = arith.constant 0 : index
    %39 = vector.load %arg6[%c0_31, %c0_32] : memref<8x384xf32, #tpu.memory_space<vmem>>, vector<8x384xf32>
    tpu.vector_store %arg6[%c0_31, %c0_32], %38 {strides = array<i32>} : memref<8x384xf32, #tpu.memory_space<vmem>>, vector<8x384xf32>,
    %c19_i32 = arith.constant 19 : i32
    %40 = arith.addi %1, %c19_i32 : i32
    %c0_33 = arith.constant 0 : index
    %41 = arith.index_cast %40 : i32 to index
    %c0_34 = arith.constant 0 : index
    %42 = vector.load %arg2[%c0_33, %41, %c0_34] : memref<1x422x4xf32, #tpu.memory_space<vmem>>, vector<1x384x4xf32>
    %43 = vector.shape_cast %42 : vector<1x384x4xf32> to vector<384x4xf32>
    %c4 = arith.constant 4 : index
    %c0_35 = arith.constant 0 : index
    %c0_36 = arith.constant 0 : index
    %44 = vector.load %arg3[%c4, %c0_35, %c0_36] : memref<9x8x4xf32, #tpu.memory_space<vmem>>, vector<1x8x4xf32>
    %45 = vector.shape_cast %44 : vector<1x8x4xf32> to vector<8x4xf32>
    %cst_37 = arith.constant dense<0.000000e+00> : vector<8x384xf32>
    %46 = tpu.matmul %45, %43, %cst_37 {dimension_numbers = #tpu.dot_dimension_numbers<[1], [1], [0], [0], [0, 0, 1, 0], [], []>} : vector<8x4xf32>, vector<384x4xf32>, vector<8x384xf32> -> vector<8x384xf32>
    %c0_38 = arith.constant 0 : index
    %c0_39 = arith.constant 0 : index
    %47 = vector.load %arg6[%c0_38, %c0_39] : memref<8x384xf32, #tpu.memory_space<vmem>>, vector<8x384xf32>
    %48 = arith.addf %47, %46 : vector<8x384xf32>
    %c0_40 = arith.constant 0 : index
    %c0_41 = arith.constant 0 : index
    %49 = vector.load %arg6[%c0_40, %c0_41] : memref<8x384xf32, #tpu.memory_space<vmem>>, vector<8x384xf32>
    tpu.vector_store %arg6[%c0_40, %c0_41], %48 {strides = array<i32>} : memref<8x384xf32, #tpu.memory_space<vmem>>, vector<8x384xf32>,
    %c20_i32 = arith.constant 20 : i32
    %50 = arith.addi %1, %c20_i32 : i32
    %c0_42 = arith.constant 0 : index
    %51 = arith.index_cast %50 : i32 to index
    %c0_43 = arith.constant 0 : index
    %52 = vector.load %arg2[%c0_42, %51, %c0_43] : memref<1x422x4xf32, #tpu.memory_space<vmem>>, vector<1x384x4xf32>
    %53 = vector.shape_cast %52 : vector<1x384x4xf32> to vector<384x4xf32>
    %c5 = arith.constant 5 : index
    %c0_44 = arith.constant 0 : index
    %c0_45 = arith.constant 0 : index
    %54 = vector.load %arg3[%c5, %c0_44, %c0_45] : memref<9x8x4xf32, #tpu.memory_space<vmem>>, vector<1x8x4xf32>
    %55 = vector.shape_cast %54 : vector<1x8x4xf32> to vector<8x4xf32>
    %cst_46 = arith.constant dense<0.000000e+00> : vector<8x384xf32>
    %56 = tpu.matmul %55, %53, %cst_46 {dimension_numbers = #tpu.dot_dimension_numbers<[1], [1], [0], [0], [0, 0, 1, 0], [], []>} : vector<8x4xf32>, vector<384x4xf32>, vector<8x384xf32> -> vector<8x384xf32>
    %c0_47 = arith.constant 0 : index
    %c0_48 = arith.constant 0 : index
    %57 = vector.load %arg6[%c0_47, %c0_48] : memref<8x384xf32, #tpu.memory_space<vmem>>, vector<8x384xf32>
    %58 = arith.addf %57, %56 : vector<8x384xf32>
    %c0_49 = arith.constant 0 : index
    %c0_50 = arith.constant 0 : index
    %59 = vector.load %arg6[%c0_49, %c0_50] : memref<8x384xf32, #tpu.memory_space<vmem>>, vector<8x384xf32>
    tpu.vector_store %arg6[%c0_49, %c0_50], %58 {strides = array<i32>} : memref<8x384xf32, #tpu.memory_space<vmem>>, vector<8x384xf32>,
    %c36_i32 = arith.constant 36 : i32
    %60 = arith.addi %1, %c36_i32 : i32
    %c0_51 = arith.constant 0 : index
    %61 = arith.index_cast %60 : i32 to index
    %c0_52 = arith.constant 0 : index
    %62 = vector.load %arg2[%c0_51, %61, %c0_52] : memref<1x422x4xf32, #tpu.memory_space<vmem>>, vector<1x384x4xf32>
    %63 = vector.shape_cast %62 : vector<1x384x4xf32> to vector<384x4xf32>
    %c6 = arith.constant 6 : index
    %c0_53 = arith.constant 0 : index
    %c0_54 = arith.constant 0 : index
    %64 = vector.load %arg3[%c6, %c0_53, %c0_54] : memref<9x8x4xf32, #tpu.memory_space<vmem>>, vector<1x8x4xf32>
    %65 = vector.shape_cast %64 : vector<1x8x4xf32> to vector<8x4xf32>
    %cst_55 = arith.constant dense<0.000000e+00> : vector<8x384xf32>
    %66 = tpu.matmul %65, %63, %cst_55 {dimension_numbers = #tpu.dot_dimension_numbers<[1], [1], [0], [0], [0, 0, 1, 0], [], []>} : vector<8x4xf32>, vector<384x4xf32>, vector<8x384xf32> -> vector<8x384xf32>
    %c0_56 = arith.constant 0 : index
    %c0_57 = arith.constant 0 : index
    %67 = vector.load %arg6[%c0_56, %c0_57] : memref<8x384xf32, #tpu.memory_space<vmem>>, vector<8x384xf32>
    %68 = arith.addf %67, %66 : vector<8x384xf32>
    %c0_58 = arith.constant 0 : index
    %c0_59 = arith.constant 0 : index
    %69 = vector.load %arg6[%c0_58, %c0_59] : memref<8x384xf32, #tpu.memory_space<vmem>>, vector<8x384xf32>
    tpu.vector_store %arg6[%c0_58, %c0_59], %68 {strides = array<i32>} : memref<8x384xf32, #tpu.memory_space<vmem>>, vector<8x384xf32>,
    %c37_i32 = arith.constant 37 : i32
    %70 = arith.addi %1, %c37_i32 : i32
    %c0_60 = arith.constant 0 : index
    %71 = arith.index_cast %70 : i32 to index
    %c0_61 = arith.constant 0 : index
    %72 = vector.load %arg2[%c0_60, %71, %c0_61] : memref<1x422x4xf32, #tpu.memory_space<vmem>>, vector<1x384x4xf32>
    %73 = vector.shape_cast %72 : vector<1x384x4xf32> to vector<384x4xf32>
    %c7 = arith.constant 7 : index
    %c0_62 = arith.constant 0 : index
    %c0_63 = arith.constant 0 : index
    %74 = vector.load %arg3[%c7, %c0_62, %c0_63] : memref<9x8x4xf32, #tpu.memory_space<vmem>>, vector<1x8x4xf32>
    %75 = vector.shape_cast %74 : vector<1x8x4xf32> to vector<8x4xf32>
    %cst_64 = arith.constant dense<0.000000e+00> : vector<8x384xf32>
    %76 = tpu.matmul %75, %73, %cst_64 {dimension_numbers = #tpu.dot_dimension_numbers<[1], [1], [0], [0], [0, 0, 1, 0], [], []>} : vector<8x4xf32>, vector<384x4xf32>, vector<8x384xf32> -> vector<8x384xf32>
    %c0_65 = arith.constant 0 : index
    %c0_66 = arith.constant 0 : index
    %77 = vector.load %arg6[%c0_65, %c0_66] : memref<8x384xf32, #tpu.memory_space<vmem>>, vector<8x384xf32>
    %78 = arith.addf %77, %76 : vector<8x384xf32>
    %c0_67 = arith.constant 0 : index
    %c0_68 = arith.constant 0 : index
    %79 = vector.load %arg6[%c0_67, %c0_68] : memref<8x384xf32, #tpu.memory_space<vmem>>, vector<8x384xf32>
    tpu.vector_store %arg6[%c0_67, %c0_68], %78 {strides = array<i32>} : memref<8x384xf32, #tpu.memory_space<vmem>>, vector<8x384xf32>,
    %c38_i32 = arith.constant 38 : i32
    %80 = arith.addi %1, %c38_i32 : i32
    %c0_69 = arith.constant 0 : index
    %81 = arith.index_cast %80 : i32 to index
    %c0_70 = arith.constant 0 : index
    %82 = vector.load %arg2[%c0_69, %81, %c0_70] : memref<1x422x4xf32, #tpu.memory_space<vmem>>, vector<1x384x4xf32>
    %83 = vector.shape_cast %82 : vector<1x384x4xf32> to vector<384x4xf32>
    %c8 = arith.constant 8 : index
    %c0_71 = arith.constant 0 : index
    %c0_72 = arith.constant 0 : index
    %84 = vector.load %arg3[%c8, %c0_71, %c0_72] : memref<9x8x4xf32, #tpu.memory_space<vmem>>, vector<1x8x4xf32>
    %85 = vector.shape_cast %84 : vector<1x8x4xf32> to vector<8x4xf32>
    %cst_73 = arith.constant dense<0.000000e+00> : vector<8x384xf32>
    %86 = tpu.matmul %85, %83, %cst_73 {dimension_numbers = #tpu.dot_dimension_numbers<[1], [1], [0], [0], [0, 0, 1, 0], [], []>} : vector<8x4xf32>, vector<384x4xf32>, vector<8x384xf32> -> vector<8x384xf32>
    %c0_74 = arith.constant 0 : index
    %c0_75 = arith.constant 0 : index
    %87 = vector.load %arg6[%c0_74, %c0_75] : memref<8x384xf32, #tpu.memory_space<vmem>>, vector<8x384xf32>
    %88 = arith.addf %87, %86 : vector<8x384xf32>
    %c0_76 = arith.constant 0 : index
    %c0_77 = arith.constant 0 : index
    %89 = vector.load %arg6[%c0_76, %c0_77] : memref<8x384xf32, #tpu.memory_space<vmem>>, vector<8x384xf32>
    tpu.vector_store %arg6[%c0_76, %c0_77], %88 {strides = array<i32>} : memref<8x384xf32, #tpu.memory_space<vmem>>, vector<8x384xf32>,
    %c0_78 = arith.constant 0 : index
    %c0_79 = arith.constant 0 : index
    %90 = vector.load %arg6[%c0_78, %c0_79] : memref<8x384xf32, #tpu.memory_space<vmem>>, vector<8x384xf32>
    %c0_80 = arith.constant 0 : index
    %c0_81 = arith.constant 0 : index
    %91 = vector.load %arg4[%c0_80, %c0_81] : memref<8x1xf32, #tpu.memory_space<vmem>>, vector<8x1xf32>
    %92 = vector.broadcast %91 : vector<8x1xf32> to vector<8x384xf32>
    %93 = arith.addf %90, %92 : vector<8x384xf32>
    %cst_82 = arith.constant 0.000000e+00 : f32
    %94 = vector.broadcast %cst_82 : f32 to vector<8x384xf32>
    %95 = arith.maximumf %93, %94 : vector<8x384xf32>
    %c0_83 = arith.constant 0 : index
    %c0_84 = arith.constant 0 : index
    %c0_85 = arith.constant 0 : index
    %96 = vector.load %arg5[%c0_83, %c0_84, %c0_85] : memref<1x8x384xf32, #tpu.memory_space<vmem>>, vector<1x8x384xf32>
    %97 = vector.shape_cast %96 : vector<1x8x384xf32> to vector<8x384xf32>
    %98 = vector.shape_cast %95 : vector<8x384xf32> to vector<1x8x384xf32>
    tpu.vector_store %arg5[%c0_83, %c0_84, %c0_85], %98 {strides = array<i32>} : memref<1x8x384xf32, #tpu.memory_space<vmem>>, vector<1x8x384xf32>,
    return
  }
  func.func @transform_0(%arg0: i32, %arg1: i32) -> (i32, i32, i32) {
    %c0_i32 = arith.constant 0 : i32
    %c0_i32_0 = arith.constant 0 : i32
    %c0_i32_1 = arith.constant 0 : i32
    return %arg0, %c0_i32, %c0_i32_0 : i32, i32, i32
  }
  func.func @transform_1(%arg0: i32, %arg1: i32) -> (i32, i32, i32) {
    %c0_i32 = arith.constant 0 : i32
    %c0_i32_0 = arith.constant 0 : i32
    %c0_i32_1 = arith.constant 0 : i32
    %c0_i32_2 = arith.constant 0 : i32
    return %c0_i32, %c0_i32_0, %c0_i32_1 : i32, i32, i32
  }
  func.func @transform_2(%arg0: i32, %arg1: i32) -> (i32, i32) {
    %c0_i32 = arith.constant 0 : i32
    %c0_i32_0 = arith.constant 0 : i32
    %c0_i32_1 = arith.constant 0 : i32
    return %c0_i32, %c0_i32_0 : i32, i32
  }
  func.func @transform_3(%arg0: i32, %arg1: i32) -> (i32, i32, i32) {
    %c0_i32 = arith.constant 0 : i32
    %c0_i32_0 = arith.constant 0 : i32
    return %arg0, %c0_i32, %arg1 : i32, i32, i32
  }
}

</mosaic_0001>

<bundles_post_ra>
// kernel: tpu_custom_call.1
= control target key start
LH: loop header
LB: loop body
LE: loop exit
PB: predicated region body
PF: predicated region fallthrough
CT: control target
= control target key end

     0   :  { %8 = vsyncpa [#allocation4], 0  ;;  %s6731_s0 = inlined_call_operand.vmem [shape: f32[2,422,4], index: 0, kind: input, shape index: {}]   ;;  %s6732_s1 = inlined_call_operand.vmem [shape: f32[9,8,4], index: 1, kind: input, shape index: {}]   ;;  %s6733_s2 = inlined_call_operand.vmem [shape: f32[8,1], index: 2, kind: input, shape index: {}]   ;;  %s6734_s3 = inlined_call_operand.hbm [shape: f32[2,8,384], index: 3, kind: output, shape index: {}]  }
   0x1   :  { %10 = vsyncpa [#allocation4 + $0x1], 0  ;;  %s5239_s12 = smov 0   ;;  %s5241_s13 = smov 0  }
   0x2   :  { %s5243_s14 = smov 0   ;;  %s5245_s15 = smov 0  }
   0x3   :  { %s5247_s16 = smov 0   ;;  %s5249_s17 = smov 0  }
   0x4 LB: > { %s3450_s18 = sadd.s32 4294967295, %s5213_s17   ;;  %s3451_s19 = sadd.s32 4294967294, %s5213_s17   ;;  %s5213_s17 = sphi %s5249_s17, %s16_s17   ;;  %s5209_s16 = sphi %s5247_s16, %s6741_s16   ;;  %s5205_s15 = sphi %s5245_s15, %s6740_s15   ;;  %s5201_s14 = sphi %s5243_s14, %s6739_s14   ;;  %s5197_s13 = sphi %s5241_s13, %s6738_s13   ;;  %s5193_s12 = sphi %s5239_s12, %s6737_s12  }
   0x5   : > { %s28_s20 = sadd.s32 1, %s5209_s16  ;;  %s105_s21 = sadd.s32 1, %s5201_s14 }
   0x6   : > { %p30_p0 = scmp.ge.s32.totalorder %s28_s20, 2  ;;  %p115_p1 = scmp.ne.s32.totalorder %s5201_s14, %s5197_s13 }
   0x7   : > { %p116_p2 = scmp.eq.s32.totalorder %s3450_s18, 1  ;;  %p121_p3 = scmp.ne.s32.totalorder %s5197_s13, %s5193_s12 }
   0x8   : > { %s6743_s20 = smov (%p30_p0, %s28_s20), 0  ;;  %p122_p5 = scmp.eq.s32.totalorder %s3451_s19, 1 }
   0x9   : > { %p5279_p4 = por %p116_p2, %p115_p1  ;;  %s100_s23 = ssub.s32 %s5209_s16, %s6743_s20 }
   0xa   : > { %p3454_p6 = scmp.ge.s32.totalorder %s5213_s17, 1  ;;  %p103_p7 = scmp.eq.s32.totalorder %s100_s23, 0 }
   0xb   : > { %p5286_p8 = por %p122_p5, %p121_p3  ;;  %p154_p9 = scmp.lt.s32.totalorder %s5213_s17, 3 }
   0xc   : > { %s5292_s25 = scalar_select %p103_p7, %s5201_s14, %s105_s21  }
   0xd   : > { %p155_p10 = pnand %p3454_p6, %p154_p9 }
   0xe   : > { %p178_p11 = scmp.lt.s32.totalorder (!%p155_p10), %s5205_s15, 1  ;;  %s5077_s9 = smul.u32 (!%p155_p10), 384, %s5205_s15 }
   0xf   : > { %158 = sbr.rel (%p155_p10) target bundleno = 817 (0x331), region = 32 }
  0x10   : > { %s3352_s21 = scalar_lea.hbm (!%p155_p10), %s6734_s3, %s5077_s9 }
  0x14   : > { %vm235_vm0 = vcmask 31744   ;;  %v5298_v0 = vld [vmem:[%s6732_s1] sm:$0xff]  ;;  %v5215_v1 = vmov 0.0   ;;  %s179_s28 = scalar_select %p178_p11, %s5205_s15, 1  ;;  %vm5216_vm1 = vmmov 0   ;;  %v5436_v54 = vld [vmem:[%s6732_s1 + $0x8] sm:$0xff] }
  0x15   : > { %4760 = vmatprep.subr.mxu1 %v5215_v1  ;;  %4333 = vmatprep.mubr.msk.f32.mxu0 %vm235_vm0, %v5298_v0  ;;  %s5218_s15 = smov [#allocation3]  }
  0x16   : > { %4792 = vmatprep.mubr.msk.f32.mxu1 %vm5216_vm1, %v5215_v1  ;;  %s5076_s29 = smul.u32 424, %s179_s28  ;;  %s5141_s27 = sshll.u32 %s5218_s15, 4  ;;  %s5142_s27 = int_to_ptr.vmem [resolvable:$false] %s5141_s27 }
  0x17   : > { %s5143_s28 = scalar_lea.vmem %s5142_s27, 768 }
  0x18   : > { %s5309_s5 = scalar_lea.vmem %s6731_s0, %s5076_s29 }
  0x19   : > { %v217_v2 = vld [vmem:[%s5309_s5 + $0xf8] sm:$0xff]  ;;  %v216_v5 = vld [vmem:[%s5309_s5 + $0xf0] sm:$0xff]  ;;  %v215_v8 = vld [vmem:[%s5309_s5 + $0xe8] sm:$0xff] }
  0x1a   : > { %v233_v3 = vld [vmem:[%s5309_s5 + $0x178] sm:$0xff]  ;;  %4301 = vmatprep.subr.msk.mxu0 %vm235_vm0, %v217_v2  ;;  %v232_v6 = vld [vmem:[%s5309_s5 + $0x170] sm:$0xff]  ;;  %v231_v9 = vld [vmem:[%s5309_s5 + $0x168] sm:$0xff] }
  0x1b   : > { %v201_v4 = vld [vmem:[%s5309_s5 + $0x78] sm:$0xff]  ;;  %4761 = vmatpush3.xpose.msk.msra.mxu1 %vm235_vm0, %v233_v3  ;;  %v200_v7 = vld [vmem:[%s5309_s5 + $0x70] sm:$0xff]  ;;  %v199_v10 = vld [vmem:[%s5309_s5 + $0x68] sm:$0xff] }
  0x1c   : > { %4302 = vmatpush3.xpose.msk.msra.mxu0 %vm235_vm0, %v201_v4  ;;  %4762 = vmatprep.subr.mxu1 %v5215_v1  ;;  %v214_v11 = vld [vmem:[%s5309_s5 + $0xe0] sm:$0xff]  ;;  %v213_v14 = vld [vmem:[%s5309_s5 + $0xd8] sm:$0xff]  ;;  %v212_v17 = vld [vmem:[%s5309_s5 + $0xd0] sm:$0xff] }
  0x1d   : > { %4303 = vmatprep.subr.msk.mxu0 %vm235_vm0, %v216_v5  ;;  %v230_v12 = vld [vmem:[%s5309_s5 + $0x160] sm:$0xff]  ;;  %v229_v15 = vld [vmem:[%s5309_s5 + $0x158] sm:$0xff]  ;;  %v228_v18 = vld [vmem:[%s5309_s5 + $0x150] sm:$0xff] }
  0x1e   : > { %v198_v13 = vld [vmem:[%s5309_s5 + $0x60] sm:$0xff]  ;;  %v197_v16 = vld [vmem:[%s5309_s5 + $0x58] sm:$0xff]  ;;  %v196_v19 = vld [vmem:[%s5309_s5 + $0x50] sm:$0xff] }
  0x1f   : > { %4763 = vmatpush3.xpose.msk.msra.mxu1 %vm235_vm0, %v232_v6  ;;  %v211_v20 = vld [vmem:[%s5309_s5 + $0xc8] sm:$0xff]  ;;  %v210_v23 = vld [vmem:[%s5309_s5 + $0xc0] sm:$0xff]  ;;  %v209_v26 = vld [vmem:[%s5309_s5 + $0xb8] sm:$0xff] }
  0x20   : > { %4304 = vmatpush3.xpose.msk.msra.mxu0 %vm235_vm0, %v200_v7  ;;  %4764 = vmatprep.subr.mxu1 %v5215_v1  ;;  %v227_v21 = vld [vmem:[%s5309_s5 + $0x148] sm:$0xff]  ;;  %v226_v24 = vld [vmem:[%s5309_s5 + $0x140] sm:$0xff]  ;;  %v225_v27 = vld [vmem:[%s5309_s5 + $0x138] sm:$0xff] }
  0x21   : > { %4305 = vmatprep.subr.msk.mxu0 %vm235_vm0, %v215_v8  ;;  %v195_v22 = vld [vmem:[%s5309_s5 + $0x48] sm:$0xff]  ;;  %v194_v25 = vld [vmem:[%s5309_s5 + $0x40] sm:$0xff]  ;;  %v193_v28 = vld [vmem:[%s5309_s5 + $0x38] sm:$0xff] }
  0x22   : > { %v208_v29 = vld [vmem:[%s5309_s5 + $0xb0] sm:$0xff]  ;;  %v207_v32 = vld [vmem:[%s5309_s5 + $0xa8] sm:$0xff]  ;;  %v206_v35 = vld [vmem:[%s5309_s5 + $0xa0] sm:$0xff] }
  0x23   : > { %4765 = vmatpush3.xpose.msk.msra.mxu1 %vm235_vm0, %v231_v9  ;;  %v224_v30 = vld [vmem:[%s5309_s5 + $0x130] sm:$0xff]  ;;  %v223_v33 = vld [vmem:[%s5309_s5 + $0x128] sm:$0xff]  ;;  %v222_v36 = vld [vmem:[%s5309_s5 + $0x120] sm:$0xff] }
  0x24   : > { %4306 = vmatpush3.xpose.msk.msra.mxu0 %vm235_vm0, %v199_v10  ;;  %4766 = vmatprep.subr.mxu1 %v5215_v1  ;;  %v192_v31 = vld [vmem:[%s5309_s5 + $0x30] sm:$0xff]  ;;  %v191_v34 = vld [vmem:[%s5309_s5 + $0x28] sm:$0xff]  ;;  %v190_v37 = vld [vmem:[%s5309_s5 + $0x20] sm:$0xff] }
  0x25   : > { %4307 = vmatprep.subr.msk.mxu0 %vm235_vm0, %v214_v11  ;;  %v205_v38 = vld [vmem:[%s5309_s5 + $0x98] sm:$0xff]  ;;  %v204_v41 = vld [vmem:[%s5309_s5 + $0x90] sm:$0xff]  ;;  %v203_v44 = vld [vmem:[%s5309_s5 + $0x88] sm:$0xff] }
  0x26   : > { %v221_v39 = vld [vmem:[%s5309_s5 + $0x118] sm:$0xff]  ;;  %v220_v42 = vld [vmem:[%s5309_s5 + $0x110] sm:$0xff]  ;;  %v219_v45 = vld [vmem:[%s5309_s5 + $0x108] sm:$0xff] }
  0x27   : > { %4767 = vmatpush3.xpose.msk.msra.mxu1 %vm235_vm0, %v230_v12  ;;  %v189_v40 = vld [vmem:[%s5309_s5 + $0x18] sm:$0xff]  ;;  %v188_v43 = vld [vmem:[%s5309_s5 + $0x10] sm:$0xff]  ;;  %v187_v46 = vld [vmem:[%s5309_s5 + $0x8] sm:$0xff] }
  0x28   : > { %4308 = vmatpush3.xpose.msk.msra.mxu0 %vm235_vm0, %v198_v13  ;;  %4768 = vmatprep.subr.mxu1 %v5215_v1  ;;  %v202_v47 = vld [vmem:[%s5309_s5 + $0x80] sm:$0xff]  ;;  %v3536_v53 = vld [vmem:[%s5309_s5 + $0xf1] sm:$0xff]  ;;  %v3535_v57 = vld [vmem:[%s5309_s5 + $0xe9] sm:$0xff] }
  0x29   : > { %4309 = vmatprep.subr.msk.mxu0 %vm235_vm0, %v213_v14  ;;  %v218_v48 = vld [vmem:[%s5309_s5 + $0x100] sm:$0xff]  ;;  %v3552_v55 = vld [vmem:[%s5309_s5 + $0x171] sm:$0xff]  ;;  %v3551_v58 = vld [vmem:[%s5309_s5 + $0x169] sm:$0xff] }
  0x2a   : > { %v186_v49 = vld [vmem:[%s5309_s5] sm:$0xff]  ;;  %v3520_v56 = vld [vmem:[%s5309_s5 + $0x71] sm:$0xff]  ;;  %v3519_v59 = vld [vmem:[%s5309_s5 + $0x69] sm:$0xff] }
  0x2b   : > { %4769 = vmatpush3.xpose.msk.msra.mxu1 %vm235_vm0, %v229_v15  ;;  %v3537_v50 = vld [vmem:[%s5309_s5 + $0xf9] sm:$0xff]  ;;  %v3534_v60 = vld [vmem:[%s5309_s5 + $0xe1] sm:$0xff]  ;;  %v3532_v3 = vld [vmem:[%s5309_s5 + $0xd1] sm:$0xff] }
  0x2c   : > { %4310 = vmatpush3.xpose.msk.msra.mxu0 %vm235_vm0, %v197_v16  ;;  %4770 = vmatprep.subr.mxu1 %v5215_v1  ;;  %v3553_v51 = vld [vmem:[%s5309_s5 + $0x179] sm:$0xff]  ;;  %v3550_v61 = vld [vmem:[%s5309_s5 + $0x161] sm:$0xff]  ;;  %v3548_v4 = vld [vmem:[%s5309_s5 + $0x151] sm:$0xff] }
  0x2d   : > { %4311 = vmatprep.subr.msk.mxu0 %vm235_vm0, %v212_v17  ;;  %v3521_v52 = vld [vmem:[%s5309_s5 + $0x79] sm:$0xff]  ;;  %v3518_v62 = vld [vmem:[%s5309_s5 + $0x61] sm:$0xff]  ;;  %v3516_v5 = vld [vmem:[%s5309_s5 + $0x51] sm:$0xff] }
  0x2e   : > { %v3533_v63 = vld [vmem:[%s5309_s5 + $0xd9] sm:$0xff]  ;;  %v3531_v6 = vld [vmem:[%s5309_s5 + $0xc9] sm:$0xff]  ;;  %v3530_v9 = vld [vmem:[%s5309_s5 + $0xc1] sm:$0xff] }
  0x2f   : > { %4771 = vmatpush3.xpose.msk.msra.mxu1 %vm235_vm0, %v228_v18  ;;  %v3517_v2 = vld [vmem:[%s5309_s5 + $0x59] sm:$0xff]  ;;  %v3547_v7 = vld [vmem:[%s5309_s5 + $0x149] sm:$0xff]  ;;  %v3546_v10 = vld [vmem:[%s5309_s5 + $0x141] sm:$0xff] }
  0x30   : > { %4312 = vmatpush3.xpose.msk.msra.mxu0 %vm235_vm0, %v196_v19  ;;  %4772 = vmatprep.subr.mxu1 %v5215_v1  ;;  %v3515_v8 = vld [vmem:[%s5309_s5 + $0x49] sm:$0xff]  ;;  %v3514_v11 = vld [vmem:[%s5309_s5 + $0x41] sm:$0xff]  ;;  %v3529_v12 = vld [vmem:[%s5309_s5 + $0xb9] sm:$0xff] }
  0x31   : > { %4313 = vmatprep.subr.msk.mxu0 %vm235_vm0, %v211_v20  ;;  %v3545_v13 = vld [vmem:[%s5309_s5 + $0x139] sm:$0xff]  ;;  %v3528_v15 = vld [vmem:[%s5309_s5 + $0xb1] sm:$0xff]  ;;  %v3527_v18 = vld [vmem:[%s5309_s5 + $0xa9] sm:$0xff] }
  0x32   : > { %v3513_v14 = vld [vmem:[%s5309_s5 + $0x39] sm:$0xff]  ;;  %v3544_v16 = vld [vmem:[%s5309_s5 + $0x131] sm:$0xff]  ;;  %v3543_v19 = vld [vmem:[%s5309_s5 + $0x129] sm:$0xff] }
  0x33   : > { %4773 = vmatpush3.xpose.msk.msra.mxu1 %vm235_vm0, %v227_v21  ;;  %v3512_v17 = vld [vmem:[%s5309_s5 + $0x31] sm:$0xff]  ;;  %v3511_v20 = vld [vmem:[%s5309_s5 + $0x29] sm:$0xff]  ;;  %v3526_v21 = vld [vmem:[%s5309_s5 + $0xa1] sm:$0xff] }
  0x34   : > { %4314 = vmatpush3.xpose.msk.msra.mxu0 %vm235_vm0, %v195_v22  ;;  %4774 = vmatprep.subr.mxu1 %v5215_v1  ;;  %v3542_v22 = vld [vmem:[%s5309_s5 + $0x121] sm:$0xff] }
  0x35   : > { %4315 = vmatprep.subr.msk.mxu0 %vm235_vm0, %v210_v23  ;;  %v3510_v23 = vld [vmem:[%s5309_s5 + $0x21] sm:$0xff] }
  0x37   : > { %4775 = vmatpush3.xpose.msk.msra.mxu1 %vm235_vm0, %v226_v24  ;;  %v3525_v24 = vld [vmem:[%s5309_s5 + $0x99] sm:$0xff] }
  0x38   : > { %4316 = vmatpush3.xpose.msk.msra.mxu0 %vm235_vm0, %v194_v25  ;;  %4776 = vmatprep.subr.mxu1 %v5215_v1  ;;  %v3541_v25 = vld [vmem:[%s5309_s5 + $0x119] sm:$0xff] }
  0x39   : > { %4317 = vmatprep.subr.msk.mxu0 %vm235_vm0, %v209_v26  ;;  %v3509_v26 = vld [vmem:[%s5309_s5 + $0x19] sm:$0xff] }
  0x3b   : > { %4777 = vmatpush3.xpose.msk.msra.mxu1 %vm235_vm0, %v225_v27  ;;  %v3524_v27 = vld [vmem:[%s5309_s5 + $0x91] sm:$0xff] }
  0x3c   : > { %4318 = vmatpush3.xpose.msk.msra.mxu0 %vm235_vm0, %v193_v28  ;;  %4778 = vmatprep.subr.mxu1 %v5215_v1  ;;  %v3540_v28 = vld [vmem:[%s5309_s5 + $0x111] sm:$0xff] }
  0x3d   : > { %4319 = vmatprep.subr.msk.mxu0 %vm235_vm0, %v208_v29  ;;  %v3508_v29 = vld [vmem:[%s5309_s5 + $0x11] sm:$0xff] }
  0x3f   : > { %4779 = vmatpush3.xpose.msk.msra.mxu1 %vm235_vm0, %v224_v30  ;;  %v3523_v30 = vld [vmem:[%s5309_s5 + $0x89] sm:$0xff] }
  0x40   : > { %4320 = vmatpush3.xpose.msk.msra.mxu0 %vm235_vm0, %v192_v31  ;;  %4780 = vmatprep.subr.mxu1 %v5215_v1  ;;  %v3539_v31 = vld [vmem:[%s5309_s5 + $0x109] sm:$0xff] }
  0x41   : > { %4321 = vmatprep.subr.msk.mxu0 %vm235_vm0, %v207_v32  ;;  %v3507_v32 = vld [vmem:[%s5309_s5 + $0x9] sm:$0xff] }
  0x43   : > { %4781 = vmatpush3.xpose.msk.msra.mxu1 %vm235_vm0, %v223_v33  ;;  %v3522_v33 = vld [vmem:[%s5309_s5 + $0x81] sm:$0xff] }
  0x44   : > { %4322 = vmatpush3.xpose.msk.msra.mxu0 %vm235_vm0, %v191_v34  ;;  %4782 = vmatprep.subr.mxu1 %v5215_v1  ;;  %v3538_v34 = vld [vmem:[%s5309_s5 + $0x101] sm:$0xff] }
  0x45   : > { %4323 = vmatprep.subr.msk.mxu0 %vm235_vm0, %v206_v35  ;;  %v3506_v35 = vld [vmem:[%s5309_s5 + $0x1] sm:$0xff] }
  0x47   : > { %4783 = vmatpush3.xpose.msk.msra.mxu1 %vm235_vm0, %v222_v36  ;;  %v5546_v36 = vld [vmem:[%s5309_s5 + $0xfa] sm:$0xff] }
  0x48   : > { %4324 = vmatpush3.xpose.msk.msra.mxu0 %vm235_vm0, %v190_v37  ;;  %4784 = vmatprep.subr.mxu1 %v5215_v1  ;;  %v5552_v37 = vld [vmem:[%s5309_s5 + $0x17a] sm:$0xff] }
  0x49   : > { %4325 = vmatprep.subr.msk.mxu0 %vm235_vm0, %v205_v38  ;;  %v5557_v38 = vld [vmem:[%s5309_s5 + $0x7a] sm:$0xff] }
  0x4b   : > { %4785 = vmatpush3.xpose.msk.msra.mxu1 %vm235_vm0, %v221_v39  ;;  %v5562_v39 = vld [vmem:[%s5309_s5 + $0xf2] sm:$0xff] }
  0x4c   : > { %4326 = vmatpush3.xpose.msk.msra.mxu0 %vm235_vm0, %v189_v40  ;;  %4786 = vmatprep.subr.mxu1 %v5215_v1  ;;  %v5571_v40 = vld [vmem:[%s6732_s1 + $0x10] sm:$0xff] }
  0x4d   : > { %4327 = vmatprep.subr.msk.mxu0 %vm235_vm0, %v204_v41  ;;  %v5577_v41 = vld [vmem:[%s5309_s5 + $0x172] sm:$0xff] }
  0x4f   : > { %4787 = vmatpush3.xpose.msk.msra.mxu1 %vm235_vm0, %v220_v42  ;;  %v5582_v42 = vld [vmem:[%s5309_s5 + $0x72] sm:$0xff] }
  0x50   : > { %4328 = vmatpush3.xpose.msk.msra.mxu0 %vm235_vm0, %v188_v43  ;;  %4788 = vmatprep.subr.mxu1 %v5215_v1  ;;  %v5587_v43 = vld [vmem:[%s5309_s5 + $0xea] sm:$0xff] }
  0x51   : > { %4329 = vmatprep.subr.msk.mxu0 %vm235_vm0, %v203_v44  ;;  %v5597_v44 = vld [vmem:[%s5309_s5 + $0x16a] sm:$0xff] }
  0x53   : > { %4789 = vmatpush3.xpose.msk.msra.mxu1 %vm235_vm0, %v219_v45  ;;  %v5602_v45 = vld [vmem:[%s5309_s5 + $0x6a] sm:$0xff] }
  0x54   : > { %4330 = vmatpush3.xpose.msk.msra.mxu0 %vm235_vm0, %v187_v46  ;;  %4790 = vmatprep.subr.mxu1 %v5215_v1  ;;  %v5605_v46 = vld [vmem:[%s5309_s5 + $0xe2] sm:$0xff] }
  0x55   : > { %4331 = vmatprep.subr.msk.mxu0 %vm235_vm0, %v202_v47  ;;  %v5613_v47 = vld [vmem:[%s5309_s5 + $0x162] sm:$0xff] }
  0x57   : > { %4791 = vmatpush3.xpose.msk.msra.mxu1 %vm235_vm0, %v218_v48  ;;  %v5618_v48 = vld [vmem:[%s5309_s5 + $0x62] sm:$0xff] }
  0x58   : > { %4332 = vmatpush3.xpose.msk.msra.mxu0 %vm235_vm0, %v186_v49  ;;  %4795 = vmatprep.subr.mxu1 %v5215_v1  ;;  %v5621_v49 = vld [vmem:[%s5309_s5 + $0xda] sm:$0xff] }
  0x59   : > { %4352 = vmatprep.subr.msk.mxu0 %vm235_vm0, %v3537_v50  ;;  %v5629_v50 = vld [vmem:[%s5309_s5 + $0x15a] sm:$0xff] }
  0x5a   : > { %4793 = vmatmul.mubr.msk.f32.vlgmr.msra.gmra.mxu1 %vm235_vm0, %v5298_v0 }
  0x5b   : > { %4334 = vmatmul.mubr.msk.f32.vlgmr.msra.gmra.mxu0 %vm235_vm0, %v5298_v0  ;;  %4796 = vmatpush3.xpose.msk.msra.mxu1 %vm235_vm0, %v3553_v51  ;;  %v3549_v0 = vld [vmem:[%s5309_s5 + $0x159] sm:$0xff] }
  0x5c   : > { %4353 = vmatpush3.xpose.msk.msra.mxu0 %vm235_vm0, %v3521_v52  ;;  %4797 = vmatprep.subr.mxu1 %v5215_v1  ;;  %v5634_v51 = vld [vmem:[%s5309_s5 + $0x5a] sm:$0xff]  ;;  %v5637_v52 = vld [vmem:[%s5309_s5 + $0xd2] sm:$0xff] }
  0x5d   : > { %4354 = vmatprep.subr.msk.mxu0 %vm235_vm0, %v3536_v53  ;;  %4827 = vmatprep.mubr.msk.f32.mxu1 %vm5216_vm1, %v5215_v1  ;;  %v5645_v53 = vld [vmem:[%s5309_s5 + $0x152] sm:$0xff] }
  0x5e   : > { %4384 = vmatprep.mubr.msk.f32.mxu0 %vm235_vm0, %v5436_v54 }
  0x5f   : > { %4798 = vmatpush3.xpose.msk.msra.mxu1 %vm235_vm0, %v3552_v55  ;;  %v5653_v55 = vld [vmem:[%s5309_s5 + $0xca] sm:$0xff] }
  0x60   : > { %4355 = vmatpush3.xpose.msk.msra.mxu0 %vm235_vm0, %v3520_v56  ;;  %4799 = vmatprep.subr.mxu1 %v5215_v1  ;;  %v5661_v56 = vld [vmem:[%s5309_s5 + $0x14a] sm:$0xff] }
  0x61   : > { %4356 = vmatprep.subr.msk.mxu0 %vm235_vm0, %v3535_v57  ;;  %v5666_v57 = vld [vmem:[%s5309_s5 + $0x4a] sm:$0xff] }
  0x63   : > { %4800 = vmatpush3.xpose.msk.msra.mxu1 %vm235_vm0, %v3551_v58  ;;  %v5669_v58 = vld [vmem:[%s5309_s5 + $0xc2] sm:$0xff] }
  0x64   : > { %4357 = vmatpush3.xpose.msk.msra.mxu0 %vm235_vm0, %v3519_v59  ;;  %4801 = vmatprep.subr.mxu1 %v5215_v1  ;;  %v5677_v59 = vld [vmem:[%s5309_s5 + $0x142] sm:$0xff] }
  0x65   : > { %4358 = vmatprep.subr.msk.mxu0 %vm235_vm0, %v3534_v60  ;;  %v5682_v60 = vld [vmem:[%s5309_s5 + $0x42] sm:$0xff] }
  0x67   : > { %4802 = vmatpush3.xpose.msk.msra.mxu1 %vm235_vm0, %v3550_v61  ;;  %v5685_v61 = vld [vmem:[%s5309_s5 + $0xba] sm:$0xff] }
  0x68   : > { %4359 = vmatpush3.xpose.msk.msra.mxu0 %vm235_vm0, %v3518_v62  ;;  %4803 = vmatprep.subr.mxu1 %v5215_v1  ;;  %v5693_v62 = vld [vmem:[%s5309_s5 + $0x13a] sm:$0xff] }
  0x69   : > { %4360 = vmatprep.subr.msk.mxu0 %vm235_vm0, %v3533_v63  ;;  %v5698_v63 = vld [vmem:[%s5309_s5 + $0x3a] sm:$0xff] }
  0x6b   : > { %4804 = vmatpush3.xpose.msk.msra.mxu1 %vm235_vm0, %v3549_v0  ;;  %v5701_v0 = vld [vmem:[%s5309_s5 + $0xb2] sm:$0xff] }
  0x6c   : > { %4361 = vmatpush3.xpose.msk.msra.mxu0 %vm235_vm0, %v3517_v2  ;;  %4805 = vmatprep.subr.mxu1 %v5215_v1  ;;  %v5709_v2 = vld [vmem:[%s5309_s5 + $0x132] sm:$0xff] }
  0x6d   : > { %4362 = vmatprep.subr.msk.mxu0 %vm235_vm0, %v3532_v3  ;;  %v5714_v3 = vld [vmem:[%s5309_s5 + $0x32] sm:$0xff] }
  0x6f   : > { %4806 = vmatpush3.xpose.msk.msra.mxu1 %vm235_vm0, %v3548_v4  ;;  %v5717_v4 = vld [vmem:[%s5309_s5 + $0xaa] sm:$0xff] }
  0x70   : > { %4363 = vmatpush3.xpose.msk.msra.mxu0 %vm235_vm0, %v3516_v5  ;;  %4807 = vmatprep.subr.mxu1 %v5215_v1  ;;  %v5725_v5 = vld [vmem:[%s5309_s5 + $0x12a] sm:$0xff] }
  0x71   : > { %4364 = vmatprep.subr.msk.mxu0 %vm235_vm0, %v3531_v6  ;;  %v5730_v6 = vld [vmem:[%s5309_s5 + $0x2a] sm:$0xff] }
  0x73   : > { %4808 = vmatpush3.xpose.msk.msra.mxu1 %vm235_vm0, %v3547_v7  ;;  %v5733_v7 = vld [vmem:[%s5309_s5 + $0xa2] sm:$0xff] }
  0x74   : > { %4365 = vmatpush3.xpose.msk.msra.mxu0 %vm235_vm0, %v3515_v8  ;;  %4809 = vmatprep.subr.mxu1 %v5215_v1  ;;  %v5741_v8 = vld [vmem:[%s5309_s5 + $0x122] sm:$0xff] }
  0x75   : > { %4366 = vmatprep.subr.msk.mxu0 %vm235_vm0, %v3530_v9  ;;  %v5746_v9 = vld [vmem:[%s5309_s5 + $0x22] sm:$0xff] }
  0x77   : > { %4810 = vmatpush3.xpose.msk.msra.mxu1 %vm235_vm0, %v3546_v10  ;;  %v5749_v10 = vld [vmem:[%s5309_s5 + $0x9a] sm:$0xff] }
  0x78   : > { %4367 = vmatpush3.xpose.msk.msra.mxu0 %vm235_vm0, %v3514_v11  ;;  %4811 = vmatprep.subr.mxu1 %v5215_v1  ;;  %v5757_v11 = vld [vmem:[%s5309_s5 + $0x11a] sm:$0xff] }
  0x79   : > { %4368 = vmatprep.subr.msk.mxu0 %vm235_vm0, %v3529_v12  ;;  %v5762_v12 = vld [vmem:[%s5309_s5 + $0x1a] sm:$0xff] }
  0x7b   : > { %4812 = vmatpush3.xpose.msk.msra.mxu1 %vm235_vm0, %v3545_v13  ;;  %v5765_v13 = vld [vmem:[%s5309_s5 + $0x92] sm:$0xff] }
  0x7c   : > { %4369 = vmatpush3.xpose.msk.msra.mxu0 %vm235_vm0, %v3513_v14  ;;  %4813 = vmatprep.subr.mxu1 %v5215_v1  ;;  %v5773_v14 = vld [vmem:[%s5309_s5 + $0x112] sm:$0xff] }
  0x7d   : > { %4370 = vmatprep.subr.msk.mxu0 %vm235_vm0, %v3528_v15  ;;  %v5778_v15 = vld [vmem:[%s5309_s5 + $0x12] sm:$0xff] }
  0x7f   : > { %4814 = vmatpush3.xpose.msk.msra.mxu1 %vm235_vm0, %v3544_v16  ;;  %v3622_v16 = vld [vmem:[%s5309_s5 + $0x8a] sm:$0xff] }
  0x80   : > { %4371 = vmatpush3.xpose.msk.msra.mxu0 %vm235_vm0, %v3512_v17  ;;  %4815 = vmatprep.subr.mxu1 %v5215_v1  ;;  %v3638_v17 = vld [vmem:[%s5309_s5 + $0x10a] sm:$0xff] }
  0x81   : > { %4372 = vmatprep.subr.msk.mxu0 %vm235_vm0, %v3527_v18  ;;  %v3606_v18 = vld [vmem:[%s5309_s5 + $0xa] sm:$0xff] }
  0x83   : > { %4816 = vmatpush3.xpose.msk.msra.mxu1 %vm235_vm0, %v3543_v19  ;;  %v3621_v19 = vld [vmem:[%s5309_s5 + $0x82] sm:$0xff] }
  0x84   : > { %4373 = vmatpush3.xpose.msk.msra.mxu0 %vm235_vm0, %v3511_v20  ;;  %4817 = vmatprep.subr.mxu1 %v5215_v1  ;;  %v3637_v20 = vld [vmem:[%s5309_s5 + $0x102] sm:$0xff] }
  0x85   : > { %4374 = vmatprep.subr.msk.mxu0 %vm235_vm0, %v3526_v21  ;;  %v3605_v21 = vld [vmem:[%s5309_s5 + $0x2] sm:$0xff] }
  0x87   : > { %4818 = vmatpush3.xpose.msk.msra.mxu1 %vm235_vm0, %v3542_v22  ;;  %v3751_v22 = vld [vmem:[%s5309_s5 + $0x18a] sm:$0xff] }
  0x88   : > { %4375 = vmatpush3.xpose.msk.msra.mxu0 %vm235_vm0, %v3510_v23  ;;  %4819 = vmatprep.subr.mxu1 %v5215_v1  ;;  %v5809_v23 = vld [vmem:[%s6732_s1 + $0x18] sm:$0xff] }
  0x89   : > { %4376 = vmatprep.subr.msk.mxu0 %vm235_vm0, %v3525_v24  ;;  %v3750_v24 = vld [vmem:[%s5309_s5 + $0x182] sm:$0xff] }
  0x8b   : > { %4820 = vmatpush3.xpose.msk.msra.mxu1 %vm235_vm0, %v3541_v25  ;;  %v3834_v25 = vld [vmem:[%s5309_s5 + $0x10b] sm:$0xff] }
  0x8c   : > { %4377 = vmatpush3.xpose.msk.msra.mxu0 %vm235_vm0, %v3509_v26  ;;  %4821 = vmatprep.subr.mxu1 %v5215_v1  ;;  %v3850_v26 = vld [vmem:[%s5309_s5 + $0x18b] sm:$0xff] }
  0x8d   : > { %4378 = vmatprep.subr.msk.mxu0 %vm235_vm0, %v3524_v27  ;;  %v3818_v27 = vld [vmem:[%s5309_s5 + $0x8b] sm:$0xff] }
  0x8f   : > { %4822 = vmatpush3.xpose.msk.msra.mxu1 %vm235_vm0, %v3540_v28 }
  0x90   : > { %4379 = vmatpush3.xpose.msk.msra.mxu0 %vm235_vm0, %v3508_v29  ;;  %4823 = vmatprep.subr.mxu1 %v5215_v1  ;;  %v3833_v29 = vld [vmem:[%s5309_s5 + $0x103] sm:$0xff] }
  0x91   : > { %4380 = vmatprep.subr.msk.mxu0 %vm235_vm0, %v3523_v30  ;;  %v5935_v30 = vld [vmem:[%s6732_s1 + $0x20] sm:$0xff] }
  0x93   : > { %4824 = vmatpush3.xpose.msk.msra.mxu1 %vm235_vm0, %v3539_v31 }
  0x94   : > { %4381 = vmatpush3.xpose.msk.msra.mxu0 %vm235_vm0, %v3507_v32  ;;  %4825 = vmatprep.subr.mxu1 %v5215_v1  ;;  %v3849_v32 = vld [vmem:[%s5309_s5 + $0x183] sm:$0xff] }
  0x95   : > { %4382 = vmatprep.subr.msk.mxu0 %vm235_vm0, %v3522_v33  ;;  %v3817_v33 = vld [vmem:[%s5309_s5 + $0x83] sm:$0xff] }
  0x97   : > { %4826 = vmatpush3.xpose.msk.msra.mxu1 %vm235_vm0, %v3538_v34  ;;  %v3832_v34 = vld [vmem:[%s5309_s5 + $0xfb] sm:$0xff] }
  0x98   : > { %4383 = vmatpush3.xpose.msk.msra.mxu0 %vm235_vm0, %v3506_v35  ;;  %4830 = vmatprep.subr.mxu1 %v5215_v1  ;;  %v3848_v35 = vld [vmem:[%s5309_s5 + $0x17b] sm:$0xff] }
  0x99   : > { %4403 = vmatprep.subr.msk.mxu0 %vm235_vm0, %v5546_v36 }
  0x9a   : > { %4828 = vmatmul.mubr.msk.f32.vlgmr.msra.gmra.mxu1 %vm235_vm0, %v5436_v54 }
  0x9b   : > { %4385 = vmatmul.mubr.msk.f32.vlgmr.msra.gmra.mxu0 %vm235_vm0, %v5436_v54  ;;  %4831 = vmatpush3.xpose.msk.msra.mxu1 %vm235_vm0, %v5552_v37  ;;  %v5650_v54 = vld [vmem:[%s5309_s5 + $0x52] sm:$0xff] }
  0x9c   : > { %4404 = vmatpush3.xpose.msk.msra.mxu0 %vm235_vm0, %v5557_v38  ;;  %4832 = vmatprep.subr.mxu1 %v5215_v1 }
  0x9d   : > { %4405 = vmatprep.subr.msk.mxu0 %vm235_vm0, %v5562_v39  ;;  %4862 = vmatprep.mubr.msk.f32.mxu1 %vm5216_vm1, %v5215_v1 }
  0x9e   : > { %4435 = vmatprep.mubr.msk.f32.mxu0 %vm235_vm0, %v5571_v40 }
  0x9f   : > { %4833 = vmatpush3.xpose.msk.msra.mxu1 %vm235_vm0, %v5577_v41 }
  0xa0   : > { %4406 = vmatpush3.xpose.msk.msra.mxu0 %vm235_vm0, %v5582_v42  ;;  %4834 = vmatprep.subr.mxu1 %v5215_v1 }
  0xa1   : > { %4407 = vmatprep.subr.msk.mxu0 %vm235_vm0, %v5587_v43 }
  0xa3   : > { %4835 = vmatpush3.xpose.msk.msra.mxu1 %vm235_vm0, %v5597_v44 }
  0xa4   : > { %4408 = vmatpush3.xpose.msk.msra.mxu0 %vm235_vm0, %v5602_v45  ;;  %4836 = vmatprep.subr.mxu1 %v5215_v1 }
  0xa5   : > { %4409 = vmatprep.subr.msk.mxu0 %vm235_vm0, %v5605_v46 }
  0xa7   : > { %4837 = vmatpush3.xpose.msk.msra.mxu1 %vm235_vm0, %v5613_v47 }
  0xa8   : > { %4410 = vmatpush3.xpose.msk.msra.mxu0 %vm235_vm0, %v5618_v48  ;;  %4838 = vmatprep.subr.mxu1 %v5215_v1 }
  0xa9   : > { %4411 = vmatprep.subr.msk.mxu0 %vm235_vm0, %v5621_v49 }
  0xab   : > { %4839 = vmatpush3.xpose.msk.msra.mxu1 %vm235_vm0, %v5629_v50 }
  0xac   : > { %4412 = vmatpush3.xpose.msk.msra.mxu0 %vm235_vm0, %v5634_v51  ;;  %4840 = vmatprep.subr.mxu1 %v5215_v1 }
  0xad   : > { %4413 = vmatprep.subr.msk.mxu0 %vm235_vm0, %v5637_v52 }
  0xaf   : > { %4841 = vmatpush3.xpose.msk.msra.mxu1 %vm235_vm0, %v5645_v53 }
  0xb0   : > { %4414 = vmatpush3.xpose.msk.msra.mxu0 %vm235_vm0, %v5650_v54  ;;  %4842 = vmatprep.subr.mxu1 %v5215_v1 }
  0xb1   : > { %4415 = vmatprep.subr.msk.mxu0 %vm235_vm0, %v5653_v55 }
  0xb3   : > { %4843 = vmatpush3.xpose.msk.msra.mxu1 %vm235_vm0, %v5661_v56 }
  0xb4   : > { %4416 = vmatpush3.xpose.msk.msra.mxu0 %vm235_vm0, %v5666_v57  ;;  %4844 = vmatprep.subr.mxu1 %v5215_v1 }
  0xb5   : > { %4417 = vmatprep.subr.msk.mxu0 %vm235_vm0, %v5669_v58 }
  0xb7   : > { %4845 = vmatpush3.xpose.msk.msra.mxu1 %vm235_vm0, %v5677_v59 }
  0xb8   : > { %4418 = vmatpush3.xpose.msk.msra.mxu0 %vm235_vm0, %v5682_v60  ;;  %4846 = vmatprep.subr.mxu1 %v5215_v1 }
  0xb9   : > { %4419 = vmatprep.subr.msk.mxu0 %vm235_vm0, %v5685_v61 }
  0xbb   : > { %4847 = vmatpush3.xpose.msk.msra.mxu1 %vm235_vm0, %v5693_v62 }
  0xbc   : > { %4420 = vmatpush3.xpose.msk.msra.mxu0 %vm235_vm0, %v5698_v63  ;;  %4848 = vmatprep.subr.mxu1 %v5215_v1 }
  0xbd   : > { %4421 = vmatprep.subr.msk.mxu0 %vm235_vm0, %v5701_v0 }
  0xbf   : > { %4849 = vmatpush3.xpose.msk.msra.mxu1 %vm235_vm0, %v5709_v2 }
  0xc0   : > { %4422 = vmatpush3.xpose.msk.msra.mxu0 %vm235_vm0, %v5714_v3  ;;  %4850 = vmatprep.subr.mxu1 %v5215_v1 }
  0xc1   : > { %4423 = vmatprep.subr.msk.mxu0 %vm235_vm0, %v5717_v4 }
  0xc3   : > { %4851 = vmatpush3.xpose.msk.msra.mxu1 %vm235_vm0, %v5725_v5 }
  0xc4   : > { %4424 = vmatpush3.xpose.msk.msra.mxu0 %vm235_vm0, %v5730_v6  ;;  %4852 = vmatprep.subr.mxu1 %v5215_v1 }
  0xc5   : > { %4425 = vmatprep.subr.msk.mxu0 %vm235_vm0, %v5733_v7 }
  0xc7   : > { %4853 = vmatpush3.xpose.msk.msra.mxu1 %vm235_vm0, %v5741_v8 }
  0xc8   : > { %4426 = vmatpush3.xpose.msk.msra.mxu0 %vm235_vm0, %v5746_v9  ;;  %4854 = vmatprep.subr.mxu1 %v5215_v1 }
  0xc9   : > { %4427 = vmatprep.subr.msk.mxu0 %vm235_vm0, %v5749_v10 }
  0xcb   : > { %4855 = vmatpush3.xpose.msk.msra.mxu1 %vm235_vm0, %v5757_v11 }
  0xcc   : > { %4428 = vmatpush3.xpose.msk.msra.mxu0 %vm235_vm0, %v5762_v12  ;;  %4856 = vmatprep.subr.mxu1 %v5215_v1 }
  0xcd   : > { %4429 = vmatprep.subr.msk.mxu0 %vm235_vm0, %v5765_v13 }
  0xcf   : > { %4857 = vmatpush3.xpose.msk.msra.mxu1 %vm235_vm0, %v5773_v14 }
  0xd0   : > { %4430 = vmatpush3.xpose.msk.msra.mxu0 %vm235_vm0, %v5778_v15  ;;  %4858 = vmatprep.subr.mxu1 %v5215_v1 }
  0xd1   : > { %4431 = vmatprep.subr.msk.mxu0 %vm235_vm0, %v3622_v16 }
  0xd3   : > { %4859 = vmatpush3.xpose.msk.msra.mxu1 %vm235_vm0, %v3638_v17 }
  0xd4   : > { %4432 = vmatpush3.xpose.msk.msra.mxu0 %vm235_vm0, %v3606_v18  ;;  %4860 = vmatprep.subr.mxu1 %v5215_v1 }
  0xd5   : > { %4433 = vmatprep.subr.msk.mxu0 %vm235_vm0, %v3621_v19 }
  0xd7   : > { %4861 = vmatpush3.xpose.msk.msra.mxu1 %vm235_vm0, %v3637_v20 }
  0xd8   : > { %4434 = vmatpush3.xpose.msk.msra.mxu0 %vm235_vm0, %v3605_v21  ;;  %4865 = vmatprep.subr.mxu1 %v5215_v1  ;;  %v6079_v21 = vld [vmem:[%s5309_s5 + $0x184] sm:$0xff] }
  0xd9   : > { %4454 = vmatprep.subr.msk.mxu0 %vm235_vm0, %v3638_v17  ;;  %v6061_v17 = vld [vmem:[%s5309_s5 + $0x104] sm:$0xff] }
  0xda   : > { %4863 = vmatmul.mubr.msk.f32.vlgmr.msra.gmra.mxu1 %vm235_vm0, %v5571_v40 }
  0xdb   : > { %4436 = vmatmul.mubr.msk.f32.vlgmr.msra.gmra.mxu0 %vm235_vm0, %v5571_v40  ;;  %4866 = vmatpush3.xpose.msk.msra.mxu1 %vm235_vm0, %v3751_v22  ;;  %v3830_v40 = vld [vmem:[%s5309_s5 + $0xeb] sm:$0xff] }
  0xdc   : > { %4455 = vmatpush3.xpose.msk.msra.mxu0 %vm235_vm0, %v3622_v16  ;;  %4867 = vmatprep.subr.mxu1 %v5215_v1  ;;  %v6084_v22 = vld [vmem:[%s5309_s5 + $0x84] sm:$0xff] }
  0xdd   : > { %4456 = vmatprep.subr.msk.mxu0 %vm235_vm0, %v3637_v20  ;;  %4897 = vmatprep.mubr.msk.f32.mxu1 %vm5216_vm1, %v5215_v1 }
  0xde   : > { %4486 = vmatprep.mubr.msk.f32.mxu0 %vm235_vm0, %v5809_v23 }
  0xdf   : > { %4868 = vmatpush3.xpose.msk.msra.mxu1 %vm235_vm0, %v3750_v24  ;;  %v6099_v24 = vld [vmem:[%s5309_s5 + $0x17c] sm:$0xff] }
  0xe0   : > { %4457 = vmatpush3.xpose.msk.msra.mxu0 %vm235_vm0, %v3621_v19  ;;  %4869 = vmatprep.subr.mxu1 %v5215_v1  ;;  %v6073_v19 = vld [vmem:[%s6732_s1 + $0x28] sm:$0xff] }
  0xe1   : > { %4458 = vmatprep.subr.msk.mxu0 %vm235_vm0, %v5546_v36  ;;  %v3816_v36 = vld [vmem:[%s5309_s5 + $0x7b] sm:$0xff] }
  0xe3   : > { %4870 = vmatpush3.xpose.msk.msra.mxu1 %vm235_vm0, %v5552_v37  ;;  %v3831_v37 = vld [vmem:[%s5309_s5 + $0xf3] sm:$0xff] }
  0xe4   : > { %4459 = vmatpush3.xpose.msk.msra.mxu0 %vm235_vm0, %v5557_v38  ;;  %4871 = vmatprep.subr.mxu1 %v5215_v1  ;;  %v3847_v38 = vld [vmem:[%s5309_s5 + $0x173] sm:$0xff] }
  0xe5   : > { %4460 = vmatprep.subr.msk.mxu0 %vm235_vm0, %v5562_v39  ;;  %v3815_v39 = vld [vmem:[%s5309_s5 + $0x73] sm:$0xff] }
  0xe7   : > { %4872 = vmatpush3.xpose.msk.msra.mxu1 %vm235_vm0, %v5577_v41  ;;  %v3846_v41 = vld [vmem:[%s5309_s5 + $0x16b] sm:$0xff] }
  0xe8   : > { %4461 = vmatpush3.xpose.msk.msra.mxu0 %vm235_vm0, %v5582_v42  ;;  %4873 = vmatprep.subr.mxu1 %v5215_v1  ;;  %v3814_v42 = vld [vmem:[%s5309_s5 + $0x6b] sm:$0xff] }
  0xe9   : > { %4462 = vmatprep.subr.msk.mxu0 %vm235_vm0, %v5587_v43  ;;  %v3829_v43 = vld [vmem:[%s5309_s5 + $0xe3] sm:$0xff] }
  0xeb   : > { %4874 = vmatpush3.xpose.msk.msra.mxu1 %vm235_vm0, %v5597_v44  ;;  %v3845_v44 = vld [vmem:[%s5309_s5 + $0x163] sm:$0xff] }
  0xec   : > { %4463 = vmatpush3.xpose.msk.msra.mxu0 %vm235_vm0, %v5602_v45  ;;  %4875 = vmatprep.subr.mxu1 %v5215_v1  ;;  %v3813_v45 = vld [vmem:[%s5309_s5 + $0x63] sm:$0xff] }
  0xed   : > { %4464 = vmatprep.subr.msk.mxu0 %vm235_vm0, %v5605_v46  ;;  %v3828_v46 = vld [vmem:[%s5309_s5 + $0xdb] sm:$0xff] }
  0xef   : > { %4876 = vmatpush3.xpose.msk.msra.mxu1 %vm235_vm0, %v5613_v47  ;;  %v3844_v47 = vld [vmem:[%s5309_s5 + $0x15b] sm:$0xff] }
  0xf0   : > { %4465 = vmatpush3.xpose.msk.msra.mxu0 %vm235_vm0, %v5618_v48  ;;  %4877 = vmatprep.subr.mxu1 %v5215_v1  ;;  %v3812_v48 = vld [vmem:[%s5309_s5 + $0x5b] sm:$0xff] }
  0xf1   : > { %4466 = vmatprep.subr.msk.mxu0 %vm235_vm0, %v5621_v49  ;;  %v3827_v49 = vld [vmem:[%s5309_s5 + $0xd3] sm:$0xff] }
  0xf3   : > { %4878 = vmatpush3.xpose.msk.msra.mxu1 %vm235_vm0, %v5629_v50  ;;  %v3843_v50 = vld [vmem:[%s5309_s5 + $0x153] sm:$0xff] }
  0xf4   : > { %4467 = vmatpush3.xpose.msk.msra.mxu0 %vm235_vm0, %v5634_v51  ;;  %4879 = vmatprep.subr.mxu1 %v5215_v1  ;;  %v3811_v51 = vld [vmem:[%s5309_s5 + $0x53] sm:$0xff] }
  0xf5   : > { %4468 = vmatprep.subr.msk.mxu0 %vm235_vm0, %v5637_v52  ;;  %v3826_v52 = vld [vmem:[%s5309_s5 + $0xcb] sm:$0xff] }
  0xf7   : > { %4880 = vmatpush3.xpose.msk.msra.mxu1 %vm235_vm0, %v5645_v53  ;;  %v3842_v53 = vld [vmem:[%s5309_s5 + $0x14b] sm:$0xff] }
  0xf8   : > { %4469 = vmatpush3.xpose.msk.msra.mxu0 %vm235_vm0, %v5650_v54  ;;  %4881 = vmatprep.subr.mxu1 %v5215_v1  ;;  %v3810_v54 = vld [vmem:[%s5309_s5 + $0x4b] sm:$0xff] }
  0xf9   : > { %4470 = vmatprep.subr.msk.mxu0 %vm235_vm0, %v5653_v55  ;;  %v3825_v55 = vld [vmem:[%s5309_s5 + $0xc3] sm:$0xff] }
  0xfb   : > { %4882 = vmatpush3.xpose.msk.msra.mxu1 %vm235_vm0, %v5661_v56  ;;  %v3841_v56 = vld [vmem:[%s5309_s5 + $0x143] sm:$0xff] }
  0xfc   : > { %4471 = vmatpush3.xpose.msk.msra.mxu0 %vm235_vm0, %v5666_v57  ;;  %4883 = vmatprep.subr.mxu1 %v5215_v1  ;;  %v3809_v57 = vld [vmem:[%s5309_s5 + $0x43] sm:$0xff] }
  0xfd   : > { %4472 = vmatprep.subr.msk.mxu0 %vm235_vm0, %v5669_v58  ;;  %v3824_v58 = vld [vmem:[%s5309_s5 + $0xbb] sm:$0xff] }
  0xff   : > { %4884 = vmatpush3.xpose.msk.msra.mxu1 %vm235_vm0, %v5677_v59  ;;  %v3840_v59 = vld [vmem:[%s5309_s5 + $0x13b] sm:$0xff] }
 0x100   : > { %4473 = vmatpush3.xpose.msk.msra.mxu0 %vm235_vm0, %v5682_v60  ;;  %4885 = vmatprep.subr.mxu1 %v5215_v1  ;;  %v3808_v60 = vld [vmem:[%s5309_s5 + $0x3b] sm:$0xff] }
 0x101   : > { %4474 = vmatprep.subr.msk.mxu0 %vm235_vm0, %v5685_v61  ;;  %v3823_v61 = vld [vmem:[%s5309_s5 + $0xb3] sm:$0xff] }
 0x103   : > { %4886 = vmatpush3.xpose.msk.msra.mxu1 %vm235_vm0, %v5693_v62  ;;  %v3839_v62 = vld [vmem:[%s5309_s5 + $0x133] sm:$0xff] }
 0x104   : > { %4475 = vmatpush3.xpose.msk.msra.mxu0 %vm235_vm0, %v5698_v63  ;;  %4887 = vmatprep.subr.mxu1 %v5215_v1  ;;  %v3807_v63 = vld [vmem:[%s5309_s5 + $0x33] sm:$0xff] }
 0x105   : > { %4476 = vmatprep.subr.msk.mxu0 %vm235_vm0, %v5701_v0  ;;  %v3822_v0 = vld [vmem:[%s5309_s5 + $0xab] sm:$0xff] }
 0x107   : > { %4888 = vmatpush3.xpose.msk.msra.mxu1 %vm235_vm0, %v5709_v2  ;;  %v3838_v2 = vld [vmem:[%s5309_s5 + $0x12b] sm:$0xff] }
 0x108   : > { %4477 = vmatpush3.xpose.msk.msra.mxu0 %vm235_vm0, %v5714_v3  ;;  %4889 = vmatprep.subr.mxu1 %v5215_v1  ;;  %v3806_v3 = vld [vmem:[%s5309_s5 + $0x2b] sm:$0xff] }
 0x109   : > { %4478 = vmatprep.subr.msk.mxu0 %vm235_vm0, %v5717_v4  ;;  %v3821_v4 = vld [vmem:[%s5309_s5 + $0xa3] sm:$0xff] }
 0x10b   : > { %4890 = vmatpush3.xpose.msk.msra.mxu1 %vm235_vm0, %v5725_v5  ;;  %v3837_v5 = vld [vmem:[%s5309_s5 + $0x123] sm:$0xff] }
 0x10c   : > { %4479 = vmatpush3.xpose.msk.msra.mxu0 %vm235_vm0, %v5730_v6  ;;  %4891 = vmatprep.subr.mxu1 %v5215_v1  ;;  %v3805_v6 = vld [vmem:[%s5309_s5 + $0x23] sm:$0xff] }
 0x10d   : > { %4480 = vmatprep.subr.msk.mxu0 %vm235_vm0, %v5733_v7  ;;  %v3820_v7 = vld [vmem:[%s5309_s5 + $0x9b] sm:$0xff] }
 0x10f   : > { %4892 = vmatpush3.xpose.msk.msra.mxu1 %vm235_vm0, %v5741_v8  ;;  %v3836_v8 = vld [vmem:[%s5309_s5 + $0x11b] sm:$0xff] }
 0x110   : > { %4481 = vmatpush3.xpose.msk.msra.mxu0 %vm235_vm0, %v5746_v9  ;;  %4893 = vmatprep.subr.mxu1 %v5215_v1  ;;  %v3804_v9 = vld [vmem:[%s5309_s5 + $0x1b] sm:$0xff] }
 0x111   : > { %4482 = vmatprep.subr.msk.mxu0 %vm235_vm0, %v5749_v10  ;;  %v3819_v10 = vld [vmem:[%s5309_s5 + $0x93] sm:$0xff] }
 0x113   : > { %4894 = vmatpush3.xpose.msk.msra.mxu1 %vm235_vm0, %v5757_v11  ;;  %v3835_v11 = vld [vmem:[%s5309_s5 + $0x113] sm:$0xff] }
 0x114   : > { %4483 = vmatpush3.xpose.msk.msra.mxu0 %vm235_vm0, %v5762_v12  ;;  %4895 = vmatprep.subr.mxu1 %v5215_v1  ;;  %v3803_v12 = vld [vmem:[%s5309_s5 + $0x13] sm:$0xff] }
 0x115   : > { %4484 = vmatprep.subr.msk.mxu0 %vm235_vm0, %v5765_v13  ;;  %v6045_v13 = vld [vmem:[%s5309_s5 + $0x10c] sm:$0xff] }
 0x117   : > { %4896 = vmatpush3.xpose.msk.msra.mxu1 %vm235_vm0, %v5773_v14  ;;  %v6051_v14 = vld [vmem:[%s5309_s5 + $0x18c] sm:$0xff] }
 0x118   : > { %4485 = vmatpush3.xpose.msk.msra.mxu0 %vm235_vm0, %v5778_v15  ;;  %4900 = vmatprep.subr.mxu1 %v5215_v1  ;;  %v6056_v15 = vld [vmem:[%s5309_s5 + $0x8c] sm:$0xff] }
 0x119   : > { %4505 = vmatprep.subr.msk.mxu0 %vm235_vm0, %v3834_v25  ;;  %v6104_v25 = vld [vmem:[%s5309_s5 + $0x7c] sm:$0xff] }
 0x11a   : > { %4898 = vmatmul.mubr.msk.f32.vlgmr.msra.gmra.mxu1 %vm235_vm0, %v5809_v23  ;;  %v5926_v28 = vpop.f32.mrf.mxu1 }
 0x11b   : > { %4487 = vmatmul.mubr.msk.f32.vlgmr.msra.gmra.mxu0 %vm235_vm0, %v5809_v23  ;;  %4901 = vmatpush3.xpose.msk.msra.mxu1 %vm235_vm0, %v3850_v26  ;;  %v6089_v23 = vld [vmem:[%s5309_s5 + $0xfc] sm:$0xff]  ;;  %v6107_v26 = vld [vmem:[%s5309_s5 + $0xf4] sm:$0xff] }
 0x11c   : > { %4506 = vmatpush3.xpose.msk.msra.mxu0 %vm235_vm0, %v3818_v27  ;;  %v4794_v31 = vpop.f32.mrf.mxu1  ;;  %4902 = vmatprep.subr.mxu1 %v5215_v1  ;;  %v6115_v27 = vld [vmem:[%s5309_s5 + $0x174] sm:$0xff] }
 0x11d   : > { %4507 = vmatprep.subr.msk.mxu0 %vm235_vm0, %v3833_v29  ;;  %4932 = vmatprep.mubr.msk.f32.mxu1 %vm5216_vm1, %v5215_v1  ;;  %v6123_v29 = vld [vmem:[%s5309_s5 + $0xec] sm:$0xff] }
 0x11e   : > { %4537 = vmatprep.mubr.msk.f32.mxu0 %vm235_vm0, %v5935_v30  ;;  %v6136_v31 = vld [vmem:[%s5309_s5 + $0x6c] sm:$0xff] }
 0x11f   : > { %4903 = vmatpush3.xpose.msk.msra.mxu1 %vm235_vm0, %v3849_v32  ;;  %v6139_v32 = vld [vmem:[%s5309_s5 + $0xe4] sm:$0xff] }
 0x120   : > { %4508 = vmatpush3.xpose.msk.msra.mxu0 %vm235_vm0, %v3817_v33  ;;  %4904 = vmatprep.subr.mxu1 %v5215_v1  ;;  %v6147_v33 = vld [vmem:[%s5309_s5 + $0x164] sm:$0xff] }
 0x121   : > { %4509 = vmatprep.subr.msk.mxu0 %vm235_vm0, %v3832_v34  ;;  %v6152_v34 = vld [vmem:[%s5309_s5 + $0x64] sm:$0xff] }
 0x123   : > { %4905 = vmatpush3.xpose.msk.msra.mxu1 %vm235_vm0, %v3848_v35  ;;  %v6155_v35 = vld [vmem:[%s5309_s5 + $0xdc] sm:$0xff] }
 0x124   : > { %4510 = vmatpush3.xpose.msk.msra.mxu0 %vm235_vm0, %v3816_v36  ;;  %4906 = vmatprep.subr.mxu1 %v5215_v1  ;;  %v6163_v36 = vld [vmem:[%s5309_s5 + $0x15c] sm:$0xff] }
 0x125   : > { %4511 = vmatprep.subr.msk.mxu0 %vm235_vm0, %v3831_v37  ;;  %v6168_v37 = vld [vmem:[%s5309_s5 + $0x5c] sm:$0xff] }
 0x127   : > { %4907 = vmatpush3.xpose.msk.msra.mxu1 %vm235_vm0, %v3847_v38  ;;  %v6171_v38 = vld [vmem:[%s5309_s5 + $0xd4] sm:$0xff] }
 0x128   : > { %4512 = vmatpush3.xpose.msk.msra.mxu0 %vm235_vm0, %v3815_v39  ;;  %4908 = vmatprep.subr.mxu1 %v5215_v1  ;;  %v6179_v39 = vld [vmem:[%s5309_s5 + $0x154] sm:$0xff] }
 0x129   : > { %4513 = vmatprep.subr.msk.mxu0 %vm235_vm0, %v3830_v40  ;;  %v6184_v40 = vld [vmem:[%s5309_s5 + $0x54] sm:$0xff] }
 0x12b   : > { %4909 = vmatpush3.xpose.msk.msra.mxu1 %vm235_vm0, %v3846_v41  ;;  %v6187_v41 = vld [vmem:[%s5309_s5 + $0xcc] sm:$0xff] }
 0x12c   : > { %4514 = vmatpush3.xpose.msk.msra.mxu0 %vm235_vm0, %v3814_v42  ;;  %4910 = vmatprep.subr.mxu1 %v5215_v1  ;;  %v6195_v42 = vld [vmem:[%s5309_s5 + $0x14c] sm:$0xff] }
 0x12d   : > { %4515 = vmatprep.subr.msk.mxu0 %vm235_vm0, %v3829_v43  ;;  %v6200_v43 = vld [vmem:[%s5309_s5 + $0x4c] sm:$0xff] }
 0x12f   : > { %4911 = vmatpush3.xpose.msk.msra.mxu1 %vm235_vm0, %v3845_v44  ;;  %v6203_v44 = vld [vmem:[%s5309_s5 + $0xc4] sm:$0xff] }
 0x130   : > { %4516 = vmatpush3.xpose.msk.msra.mxu0 %vm235_vm0, %v3813_v45  ;;  %4912 = vmatprep.subr.mxu1 %v5215_v1  ;;  %v6211_v45 = vld [vmem:[%s5309_s5 + $0x144] sm:$0xff] }
 0x131   : > { %4517 = vmatprep.subr.msk.mxu0 %vm235_vm0, %v3828_v46  ;;  %v6216_v46 = vld [vmem:[%s5309_s5 + $0x44] sm:$0xff] }
 0x133   : > { %4913 = vmatpush3.xpose.msk.msra.mxu1 %vm235_vm0, %v3844_v47  ;;  %v6219_v47 = vld [vmem:[%s5309_s5 + $0xbc] sm:$0xff] }
 0x134   : > { %4518 = vmatpush3.xpose.msk.msra.mxu0 %vm235_vm0, %v3812_v48  ;;  %4914 = vmatprep.subr.mxu1 %v5215_v1  ;;  %v6227_v48 = vld [vmem:[%s5309_s5 + $0x13c] sm:$0xff] }
 0x135   : > { %4519 = vmatprep.subr.msk.mxu0 %vm235_vm0, %v3827_v49  ;;  %v6232_v49 = vld [vmem:[%s5309_s5 + $0x3c] sm:$0xff] }
 0x137   : > { %4915 = vmatpush3.xpose.msk.msra.mxu1 %vm235_vm0, %v3843_v50  ;;  %v6235_v50 = vld [vmem:[%s5309_s5 + $0xb4] sm:$0xff] }
 0x138   : > { %4520 = vmatpush3.xpose.msk.msra.mxu0 %vm235_vm0, %v3811_v51  ;;  %4916 = vmatprep.subr.mxu1 %v5215_v1  ;;  %v6243_v51 = vld [vmem:[%s5309_s5 + $0x134] sm:$0xff] }
 0x139   : > { %4521 = vmatprep.subr.msk.mxu0 %vm235_vm0, %v3826_v52  ;;  %v6248_v52 = vld [vmem:[%s5309_s5 + $0x34] sm:$0xff] }
 0x13b   : > { %4917 = vmatpush3.xpose.msk.msra.mxu1 %vm235_vm0, %v3842_v53  ;;  %v6251_v53 = vld [vmem:[%s5309_s5 + $0xac] sm:$0xff] }
 0x13c   : > { %4522 = vmatpush3.xpose.msk.msra.mxu0 %vm235_vm0, %v3810_v54  ;;  %4918 = vmatprep.subr.mxu1 %v5215_v1  ;;  %v6259_v54 = vld [vmem:[%s5309_s5 + $0x12c] sm:$0xff] }
 0x13d   : > { %4523 = vmatprep.subr.msk.mxu0 %vm235_vm0, %v3825_v55  ;;  %v6264_v55 = vld [vmem:[%s5309_s5 + $0x2c] sm:$0xff] }
 0x13f   : > { %4919 = vmatpush3.xpose.msk.msra.mxu1 %vm235_vm0, %v3841_v56  ;;  %v6267_v56 = vld [vmem:[%s5309_s5 + $0xa4] sm:$0xff] }
 0x140   : > { %4524 = vmatpush3.xpose.msk.msra.mxu0 %vm235_vm0, %v3809_v57  ;;  %4920 = vmatprep.subr.mxu1 %v5215_v1  ;;  %v6275_v57 = vld [vmem:[%s5309_s5 + $0x124] sm:$0xff] }
 0x141   : > { %4525 = vmatprep.subr.msk.mxu0 %vm235_vm0, %v3824_v58  ;;  %v6280_v58 = vld [vmem:[%s5309_s5 + $0x24] sm:$0xff] }
 0x143   : > { %4921 = vmatpush3.xpose.msk.msra.mxu1 %vm235_vm0, %v3840_v59  ;;  %v3919_v59 = vld [vmem:[%s5309_s5 + $0x9c] sm:$0xff] }
 0x144   : > { %4526 = vmatpush3.xpose.msk.msra.mxu0 %vm235_vm0, %v3808_v60  ;;  %4922 = vmatprep.subr.mxu1 %v5215_v1  ;;  %v3935_v60 = vld [vmem:[%s5309_s5 + $0x11c] sm:$0xff] }
 0x145   : > { %4527 = vmatprep.subr.msk.mxu0 %vm235_vm0, %v3823_v61  ;;  %v3903_v61 = vld [vmem:[%s5309_s5 + $0x1c] sm:$0xff] }
 0x147   : > { %4923 = vmatpush3.xpose.msk.msra.mxu1 %vm235_vm0, %v3839_v62  ;;  %v3918_v62 = vld [vmem:[%s5309_s5 + $0x94] sm:$0xff] }
 0x148   : > { %4528 = vmatpush3.xpose.msk.msra.mxu0 %vm235_vm0, %v3807_v63  ;;  %4924 = vmatprep.subr.mxu1 %v5215_v1  ;;  %v3934_v63 = vld [vmem:[%s5309_s5 + $0x114] sm:$0xff] }
 0x149   : > { %4529 = vmatprep.subr.msk.mxu0 %vm235_vm0, %v3822_v0  ;;  %v3902_v0 = vld [vmem:[%s5309_s5 + $0x14] sm:$0xff] }
 0x14b   : > { %4925 = vmatpush3.xpose.msk.msra.mxu1 %vm235_vm0, %v3838_v2  ;;  %v4048_v2 = vld [vmem:[%s5309_s5 + $0x19c] sm:$0xff] }
 0x14c   : > { %4530 = vmatpush3.xpose.msk.msra.mxu0 %vm235_vm0, %v3806_v3  ;;  %4926 = vmatprep.subr.mxu1 %v5215_v1 }
 0x14d   : > { %4531 = vmatprep.subr.msk.mxu0 %vm235_vm0, %v3821_v4 }
 0x14f   : > { %4927 = vmatpush3.xpose.msk.msra.mxu1 %vm235_vm0, %v3837_v5  ;;  %v6314_v5 = vld [vmem:[%s6732_s1 + $0x30] sm:$0xff] }
 0x150   : > { %4532 = vmatpush3.xpose.msk.msra.mxu0 %vm235_vm0, %v3805_v6  ;;  %4928 = vmatprep.subr.mxu1 %v5215_v1 }
 0x151   : > { %4533 = vmatprep.subr.msk.mxu0 %vm235_vm0, %v3820_v7  ;;  %v4047_v7 = vld [vmem:[%s5309_s5 + $0x194] sm:$0xff] }
 0x153   : > { %4929 = vmatpush3.xpose.msk.msra.mxu1 %vm235_vm0, %v3836_v8  ;;  %v4131_v8 = vld [vmem:[%s5309_s5 + $0x11d] sm:$0xff] }
 0x154   : > { %4534 = vmatpush3.xpose.msk.msra.mxu0 %vm235_vm0, %v3804_v9  ;;  %4930 = vmatprep.subr.mxu1 %v5215_v1  ;;  %v4147_v9 = vld [vmem:[%s5309_s5 + $0x19d] sm:$0xff] }
 0x155   : > { %4535 = vmatprep.subr.msk.mxu0 %vm235_vm0, %v3819_v10  ;;  %v4115_v10 = vld [vmem:[%s5309_s5 + $0x9d] sm:$0xff] }
 0x157   : > { %4931 = vmatpush3.xpose.msk.msra.mxu1 %vm235_vm0, %v3835_v11 }
 0x158   : > { %4536 = vmatpush3.xpose.msk.msra.mxu0 %vm235_vm0, %v3803_v12  ;;  %4935 = vmatprep.subr.mxu1 %v5215_v1  ;;  %v4130_v12 = vld [vmem:[%s5309_s5 + $0x115] sm:$0xff] }
 0x159   : > { %4556 = vmatprep.subr.msk.mxu0 %vm235_vm0, %v6045_v13 }
 0x15a   : > { %v863_v16 = vpop.f32.mrf.mxu1  ;;  %4933 = vmatmul.mubr.msk.f32.vlgmr.msra.gmra.mxu1 %vm235_vm0, %v5935_v30 }
 0x15b   : > { %v6064_v18 = vadd.f32 %v863_v16, %v5926_v28  ;;  %4538 = vmatmul.mubr.msk.f32.vlgmr.msra.gmra.mxu0 %vm235_vm0, %v5935_v30  ;;  %4936 = vmatpush3.xpose.msk.msra.mxu1 %vm235_vm0, %v6051_v14  ;;  %v6120_v28 = vld [vmem:[%s5309_s5 + $0x74] sm:$0xff]  ;;  %v6131_v30 = vld [vmem:[%s5309_s5 + $0x16c] sm:$0xff] }
 0x15c   : > { %4557 = vmatpush3.xpose.msk.msra.mxu0 %vm235_vm0, %v6056_v15  ;;  %v4829_v20 = vpop.f32.mrf.mxu1  ;;  %4937 = vmatprep.subr.mxu1 %v5215_v1  ;;  %v4146_v16 = vld [vmem:[%s5309_s5 + $0x195] sm:$0xff] }
 0x15d   : > { %4558 = vmatprep.subr.msk.mxu0 %vm235_vm0, %v6061_v17  ;;  %4967 = vmatprep.mubr.msk.f32.mxu1 %vm5216_vm1, %v5215_v1  ;;  %v4113_v20 = vld [vmem:[%s5309_s5 + $0x8d] sm:$0xff] }
 0x15e   : > { %4588 = vmatprep.mubr.msk.f32.mxu0 %vm235_vm0, %v6073_v19 }
 0x15f   : > { %4938 = vmatpush3.xpose.msk.msra.mxu1 %vm235_vm0, %v6079_v21 }
 0x160   : > { %4559 = vmatpush3.xpose.msk.msra.mxu0 %vm235_vm0, %v6084_v22  ;;  %4939 = vmatprep.subr.mxu1 %v5215_v1 }
 0x161   : > { %4560 = vmatprep.subr.msk.mxu0 %vm235_vm0, %v6089_v23 }
 0x163   : > { %4940 = vmatpush3.xpose.msk.msra.mxu1 %vm235_vm0, %v6099_v24 }
 0x164   : > { %4561 = vmatpush3.xpose.msk.msra.mxu0 %vm235_vm0, %v6104_v25  ;;  %4941 = vmatprep.subr.mxu1 %v5215_v1 }
 0x165   : > { %4562 = vmatprep.subr.msk.mxu0 %vm235_vm0, %v6107_v26 }
 0x167   : > { %4942 = vmatpush3.xpose.msk.msra.mxu1 %vm235_vm0, %v6115_v27 }
 0x168   : > { %4563 = vmatpush3.xpose.msk.msra.mxu0 %vm235_vm0, %v6120_v28  ;;  %4943 = vmatprep.subr.mxu1 %v5215_v1 }
 0x169   : > { %4564 = vmatprep.subr.msk.mxu0 %vm235_vm0, %v6123_v29 }
 0x16b   : > { %4944 = vmatpush3.xpose.msk.msra.mxu1 %vm235_vm0, %v6131_v30 }
 0x16c   : > { %4565 = vmatpush3.xpose.msk.msra.mxu0 %vm235_vm0, %v6136_v31  ;;  %4945 = vmatprep.subr.mxu1 %v5215_v1 }
 0x16d   : > { %4566 = vmatprep.subr.msk.mxu0 %vm235_vm0, %v6139_v32 }
 0x16f   : > { %4946 = vmatpush3.xpose.msk.msra.mxu1 %vm235_vm0, %v6147_v33 }
 0x170   : > { %4567 = vmatpush3.xpose.msk.msra.mxu0 %vm235_vm0, %v6152_v34  ;;  %4947 = vmatprep.subr.mxu1 %v5215_v1 }
 0x171   : > { %4568 = vmatprep.subr.msk.mxu0 %vm235_vm0, %v6155_v35 }
 0x173   : > { %4948 = vmatpush3.xpose.msk.msra.mxu1 %vm235_vm0, %v6163_v36 }
 0x174   : > { %4569 = vmatpush3.xpose.msk.msra.mxu0 %vm235_vm0, %v6168_v37  ;;  %4949 = vmatprep.subr.mxu1 %v5215_v1 }
 0x175   : > { %4570 = vmatprep.subr.msk.mxu0 %vm235_vm0, %v6171_v38 }
 0x177   : > { %4950 = vmatpush3.xpose.msk.msra.mxu1 %vm235_vm0, %v6179_v39 }
 0x178   : > { %4571 = vmatpush3.xpose.msk.msra.mxu0 %vm235_vm0, %v6184_v40  ;;  %4951 = vmatprep.subr.mxu1 %v5215_v1 }
 0x179   : > { %4572 = vmatprep.subr.msk.mxu0 %vm235_vm0, %v6187_v41 }
 0x17b   : > { %4952 = vmatpush3.xpose.msk.msra.mxu1 %vm235_vm0, %v6195_v42 }
 0x17c   : > { %4573 = vmatpush3.xpose.msk.msra.mxu0 %vm235_vm0, %v6200_v43  ;;  %4953 = vmatprep.subr.mxu1 %v5215_v1 }
 0x17d   : > { %4574 = vmatprep.subr.msk.mxu0 %vm235_vm0, %v6203_v44 }
 0x17f   : > { %4954 = vmatpush3.xpose.msk.msra.mxu1 %vm235_vm0, %v6211_v45 }
 0x180   : > { %4575 = vmatpush3.xpose.msk.msra.mxu0 %vm235_vm0, %v6216_v46  ;;  %4955 = vmatprep.subr.mxu1 %v5215_v1 }
 0x181   : > { %4576 = vmatprep.subr.msk.mxu0 %vm235_vm0, %v6219_v47 }
 0x183   : > { %4956 = vmatpush3.xpose.msk.msra.mxu1 %vm235_vm0, %v6227_v48 }
 0x184   : > { %4577 = vmatpush3.xpose.msk.msra.mxu0 %vm235_vm0, %v6232_v49  ;;  %4957 = vmatprep.subr.mxu1 %v5215_v1 }
 0x185   : > { %4578 = vmatprep.subr.msk.mxu0 %vm235_vm0, %v6235_v50 }
 0x187   : > { %4958 = vmatpush3.xpose.msk.msra.mxu1 %vm235_vm0, %v6243_v51 }
 0x188   : > { %4579 = vmatpush3.xpose.msk.msra.mxu0 %vm235_vm0, %v6248_v52  ;;  %4959 = vmatprep.subr.mxu1 %v5215_v1 }
 0x189   : > { %4580 = vmatprep.subr.msk.mxu0 %vm235_vm0, %v6251_v53 }
 0x18b   : > { %4960 = vmatpush3.xpose.msk.msra.mxu1 %vm235_vm0, %v6259_v54 }
 0x18c   : > { %4581 = vmatpush3.xpose.msk.msra.mxu0 %vm235_vm0, %v6264_v55  ;;  %4961 = vmatprep.subr.mxu1 %v5215_v1 }
 0x18d   : > { %4582 = vmatprep.subr.msk.mxu0 %vm235_vm0, %v6267_v56 }
 0x18f   : > { %4962 = vmatpush3.xpose.msk.msra.mxu1 %vm235_vm0, %v6275_v57 }
 0x190   : > { %4583 = vmatpush3.xpose.msk.msra.mxu0 %vm235_vm0, %v6280_v58  ;;  %4963 = vmatprep.subr.mxu1 %v5215_v1 }
 0x191   : > { %4584 = vmatprep.subr.msk.mxu0 %vm235_vm0, %v3919_v59 }
 0x193   : > { %4964 = vmatpush3.xpose.msk.msra.mxu1 %vm235_vm0, %v3935_v60 }
 0x194   : > { %4585 = vmatpush3.xpose.msk.msra.mxu0 %vm235_vm0, %v3903_v61  ;;  %4965 = vmatprep.subr.mxu1 %v5215_v1  ;;  %v4246_v61 = vld [vmem:[%s5309_s5 + $0x19e] sm:$0xff] }
 0x195   : > { %4586 = vmatprep.subr.msk.mxu0 %vm235_vm0, %v3918_v62 }
 0x197   : > { %4966 = vmatpush3.xpose.msk.msra.mxu1 %vm235_vm0, %v3934_v63 }
 0x198   : > { %4587 = vmatpush3.xpose.msk.msra.mxu0 %vm235_vm0, %v3902_v0  ;;  %4970 = vmatprep.subr.mxu1 %v5215_v1  ;;  %v4229_v0 = vld [vmem:[%s5309_s5 + $0x116] sm:$0xff] }
 0x199   : > { %4607 = vmatprep.subr.msk.mxu0 %vm235_vm0, %v3935_v60  ;;  %v4230_v60 = vld [vmem:[%s5309_s5 + $0x11e] sm:$0xff] }
 0x19a   : > { %v1212_v3 = vpop.f32.mrf.mxu1  ;;  %4968 = vmatmul.mubr.msk.f32.vlgmr.msra.gmra.mxu1 %vm235_vm0, %v6073_v19 }
 0x19b   : > { %v6306_v4 = vadd.f32 %v1212_v3, %v6064_v18  ;;  %4589 = vmatmul.mubr.msk.f32.vlgmr.msra.gmra.mxu0 %vm235_vm0, %v6073_v19  ;;  %4971 = vmatpush3.xpose.msk.msra.mxu1 %vm235_vm0, %v4048_v2  ;;  %v4129_v18 = vld [vmem:[%s5309_s5 + $0x10d] sm:$0xff]  ;;  %v6569_v3 = vld [vmem:[%s6732_s1 + $0x40] sm:$0xff] }
 0x19c   : > { %4608 = vmatpush3.xpose.msk.msra.mxu0 %vm235_vm0, %v3919_v59  ;;  %v4864_v6 = vpop.f32.mrf.mxu1  ;;  %4972 = vmatprep.subr.mxu1 %v5215_v1  ;;  %v4145_v19 = vld [vmem:[%s5309_s5 + $0x18d] sm:$0xff]  ;;  %v4100_v59 = vld [vmem:[%s5309_s5 + $0x25] sm:$0xff] }
 0x19d   : > { %4609 = vmatprep.subr.msk.mxu0 %vm235_vm0, %v3934_v63  ;;  %5002 = vmatprep.mubr.msk.f32.mxu1 %vm5216_vm1, %v5215_v1  ;;  %v4213_v6 = vld [vmem:[%s5309_s5 + $0x96] sm:$0xff] }
 0x19e   : > { %4639 = vmatprep.mubr.msk.f32.mxu0 %vm235_vm0, %v6314_v5 }
 0x19f   : > { %4973 = vmatpush3.xpose.msk.msra.mxu1 %vm235_vm0, %v4047_v7  ;;  %v4228_v7 = vld [vmem:[%s5309_s5 + $0x10e] sm:$0xff] }
 0x1a0   : > { %4610 = vmatpush3.xpose.msk.msra.mxu0 %vm235_vm0, %v3918_v62  ;;  %4974 = vmatprep.subr.mxu1 %v5215_v1  ;;  %v4214_v62 = vld [vmem:[%s5309_s5 + $0x9e] sm:$0xff] }
 0x1a1   : > { %4611 = vmatprep.subr.msk.mxu0 %vm235_vm0, %v6045_v13 }
 0x1a3   : > { %4975 = vmatpush3.xpose.msk.msra.mxu1 %vm235_vm0, %v6051_v14  ;;  %v6441_v14 = vld [vmem:[%s6732_s1 + $0x38] sm:$0xff] }
 0x1a4   : > { %4612 = vmatpush3.xpose.msk.msra.mxu0 %vm235_vm0, %v6056_v15  ;;  %4976 = vmatprep.subr.mxu1 %v5215_v1 }
 0x1a5   : > { %4613 = vmatprep.subr.msk.mxu0 %vm235_vm0, %v6061_v17  ;;  %v4114_v17 = vld [vmem:[%s5309_s5 + $0x95] sm:$0xff] }
 0x1a7   : > { %4977 = vmatpush3.xpose.msk.msra.mxu1 %vm235_vm0, %v6079_v21  ;;  %v4128_v21 = vld [vmem:[%s5309_s5 + $0x105] sm:$0xff] }
 0x1a8   : > { %4614 = vmatpush3.xpose.msk.msra.mxu0 %vm235_vm0, %v6084_v22  ;;  %4978 = vmatprep.subr.mxu1 %v5215_v1  ;;  %v4144_v22 = vld [vmem:[%s5309_s5 + $0x185] sm:$0xff] }
 0x1a9   : > { %4615 = vmatprep.subr.msk.mxu0 %vm235_vm0, %v6089_v23  ;;  %v4112_v23 = vld [vmem:[%s5309_s5 + $0x85] sm:$0xff] }
 0x1ab   : > { %4979 = vmatpush3.xpose.msk.msra.mxu1 %vm235_vm0, %v6099_v24  ;;  %v4127_v24 = vld [vmem:[%s5309_s5 + $0xfd] sm:$0xff] }
 0x1ac   : > { %4616 = vmatpush3.xpose.msk.msra.mxu0 %vm235_vm0, %v6104_v25  ;;  %4980 = vmatprep.subr.mxu1 %v5215_v1  ;;  %v4143_v25 = vld [vmem:[%s5309_s5 + $0x17d] sm:$0xff] }
 0x1ad   : > { %4617 = vmatprep.subr.msk.mxu0 %vm235_vm0, %v6107_v26  ;;  %v4111_v26 = vld [vmem:[%s5309_s5 + $0x7d] sm:$0xff] }
 0x1af   : > { %4981 = vmatpush3.xpose.msk.msra.mxu1 %vm235_vm0, %v6115_v27  ;;  %v4126_v27 = vld [vmem:[%s5309_s5 + $0xf5] sm:$0xff] }
 0x1b0   : > { %4618 = vmatpush3.xpose.msk.msra.mxu0 %vm235_vm0, %v6120_v28  ;;  %4982 = vmatprep.subr.mxu1 %v5215_v1  ;;  %v4142_v28 = vld [vmem:[%s5309_s5 + $0x175] sm:$0xff] }
 0x1b1   : > { %4619 = vmatprep.subr.msk.mxu0 %vm235_vm0, %v6123_v29  ;;  %v4110_v29 = vld [vmem:[%s5309_s5 + $0x75] sm:$0xff] }
 0x1b3   : > { %4983 = vmatpush3.xpose.msk.msra.mxu1 %vm235_vm0, %v6131_v30  ;;  %v4125_v30 = vld [vmem:[%s5309_s5 + $0xed] sm:$0xff] }
 0x1b4   : > { %4620 = vmatpush3.xpose.msk.msra.mxu0 %vm235_vm0, %v6136_v31  ;;  %4984 = vmatprep.subr.mxu1 %v5215_v1  ;;  %v4141_v31 = vld [vmem:[%s5309_s5 + $0x16d] sm:$0xff] }
 0x1b5   : > { %4621 = vmatprep.subr.msk.mxu0 %vm235_vm0, %v6139_v32  ;;  %v4109_v32 = vld [vmem:[%s5309_s5 + $0x6d] sm:$0xff] }
 0x1b7   : > { %4985 = vmatpush3.xpose.msk.msra.mxu1 %vm235_vm0, %v6147_v33  ;;  %v4124_v33 = vld [vmem:[%s5309_s5 + $0xe5] sm:$0xff] }
 0x1b8   : > { %4622 = vmatpush3.xpose.msk.msra.mxu0 %vm235_vm0, %v6152_v34  ;;  %4986 = vmatprep.subr.mxu1 %v5215_v1  ;;  %v4140_v34 = vld [vmem:[%s5309_s5 + $0x165] sm:$0xff] }
 0x1b9   : > { %4623 = vmatprep.subr.msk.mxu0 %vm235_vm0, %v6155_v35  ;;  %v4108_v35 = vld [vmem:[%s5309_s5 + $0x65] sm:$0xff] }
 0x1bb   : > { %4987 = vmatpush3.xpose.msk.msra.mxu1 %vm235_vm0, %v6163_v36  ;;  %v4123_v36 = vld [vmem:[%s5309_s5 + $0xdd] sm:$0xff] }
 0x1bc   : > { %4624 = vmatpush3.xpose.msk.msra.mxu0 %vm235_vm0, %v6168_v37  ;;  %4988 = vmatprep.subr.mxu1 %v5215_v1  ;;  %v4139_v37 = vld [vmem:[%s5309_s5 + $0x15d] sm:$0xff] }
 0x1bd   : > { %4625 = vmatprep.subr.msk.mxu0 %vm235_vm0, %v6171_v38  ;;  %v4107_v38 = vld [vmem:[%s5309_s5 + $0x5d] sm:$0xff] }
 0x1bf   : > { %4989 = vmatpush3.xpose.msk.msra.mxu1 %vm235_vm0, %v6179_v39  ;;  %v4122_v39 = vld [vmem:[%s5309_s5 + $0xd5] sm:$0xff] }
 0x1c0   : > { %4626 = vmatpush3.xpose.msk.msra.mxu0 %vm235_vm0, %v6184_v40  ;;  %4990 = vmatprep.subr.mxu1 %v5215_v1  ;;  %v4138_v40 = vld [vmem:[%s5309_s5 + $0x155] sm:$0xff] }
 0x1c1   : > { %4627 = vmatprep.subr.msk.mxu0 %vm235_vm0, %v6187_v41  ;;  %v4106_v41 = vld [vmem:[%s5309_s5 + $0x55] sm:$0xff] }
 0x1c3   : > { %4991 = vmatpush3.xpose.msk.msra.mxu1 %vm235_vm0, %v6195_v42  ;;  %v4121_v42 = vld [vmem:[%s5309_s5 + $0xcd] sm:$0xff] }
 0x1c4   : > { %4628 = vmatpush3.xpose.msk.msra.mxu0 %vm235_vm0, %v6200_v43  ;;  %4992 = vmatprep.subr.mxu1 %v5215_v1  ;;  %v4137_v43 = vld [vmem:[%s5309_s5 + $0x14d] sm:$0xff] }
 0x1c5   : > { %4629 = vmatprep.subr.msk.mxu0 %vm235_vm0, %v6203_v44  ;;  %v4105_v44 = vld [vmem:[%s5309_s5 + $0x4d] sm:$0xff] }
 0x1c7   : > { %4993 = vmatpush3.xpose.msk.msra.mxu1 %vm235_vm0, %v6211_v45  ;;  %v4120_v45 = vld [vmem:[%s5309_s5 + $0xc5] sm:$0xff] }
 0x1c8   : > { %4630 = vmatpush3.xpose.msk.msra.mxu0 %vm235_vm0, %v6216_v46  ;;  %4994 = vmatprep.subr.mxu1 %v5215_v1  ;;  %v4136_v46 = vld [vmem:[%s5309_s5 + $0x145] sm:$0xff] }
 0x1c9   : > { %4631 = vmatprep.subr.msk.mxu0 %vm235_vm0, %v6219_v47  ;;  %v4104_v47 = vld [vmem:[%s5309_s5 + $0x45] sm:$0xff] }
 0x1cb   : > { %4995 = vmatpush3.xpose.msk.msra.mxu1 %vm235_vm0, %v6227_v48  ;;  %v4119_v48 = vld [vmem:[%s5309_s5 + $0xbd] sm:$0xff] }
 0x1cc   : > { %4632 = vmatpush3.xpose.msk.msra.mxu0 %vm235_vm0, %v6232_v49  ;;  %4996 = vmatprep.subr.mxu1 %v5215_v1  ;;  %v4135_v49 = vld [vmem:[%s5309_s5 + $0x13d] sm:$0xff] }
 0x1cd   : > { %4633 = vmatprep.subr.msk.mxu0 %vm235_vm0, %v6235_v50  ;;  %v4103_v50 = vld [vmem:[%s5309_s5 + $0x3d] sm:$0xff] }
 0x1cf   : > { %4997 = vmatpush3.xpose.msk.msra.mxu1 %vm235_vm0, %v6243_v51  ;;  %v4118_v51 = vld [vmem:[%s5309_s5 + $0xb5] sm:$0xff] }
 0x1d0   : > { %4634 = vmatpush3.xpose.msk.msra.mxu0 %vm235_vm0, %v6248_v52  ;;  %4998 = vmatprep.subr.mxu1 %v5215_v1  ;;  %v4134_v52 = vld [vmem:[%s5309_s5 + $0x135] sm:$0xff] }
 0x1d1   : > { %4635 = vmatprep.subr.msk.mxu0 %vm235_vm0, %v6251_v53  ;;  %v4102_v53 = vld [vmem:[%s5309_s5 + $0x35] sm:$0xff] }
 0x1d3   : > { %4999 = vmatpush3.xpose.msk.msra.mxu1 %vm235_vm0, %v6259_v54  ;;  %v4117_v54 = vld [vmem:[%s5309_s5 + $0xad] sm:$0xff] }
 0x1d4   : > { %4636 = vmatpush3.xpose.msk.msra.mxu0 %vm235_vm0, %v6264_v55  ;;  %5000 = vmatprep.subr.mxu1 %v5215_v1  ;;  %v4133_v55 = vld [vmem:[%s5309_s5 + $0x12d] sm:$0xff] }
 0x1d5   : > { %4637 = vmatprep.subr.msk.mxu0 %vm235_vm0, %v6267_v56  ;;  %v4101_v56 = vld [vmem:[%s5309_s5 + $0x2d] sm:$0xff] }
 0x1d7   : > { %5001 = vmatpush3.xpose.msk.msra.mxu1 %vm235_vm0, %v6275_v57  ;;  %v4116_v57 = vld [vmem:[%s5309_s5 + $0xa5] sm:$0xff] }
 0x1d8   : > { %4638 = vmatpush3.xpose.msk.msra.mxu0 %vm235_vm0, %v6280_v58  ;;  %5005 = vmatprep.subr.mxu1 %v5215_v1  ;;  %v4132_v58 = vld [vmem:[%s5309_s5 + $0x125] sm:$0xff] }
 0x1d9   : > { %4658 = vmatprep.subr.msk.mxu0 %vm235_vm0, %v4131_v8  ;;  %v3322_v8 = vld [vmem:[%s6733_s2] sm:$0xff] }
 0x1da   : > { %v1561_v11 = vpop.f32.mrf.mxu1  ;;  %5003 = vmatmul.mubr.msk.f32.vlgmr.msra.gmra.mxu1 %vm235_vm0, %v6314_v5 }
 0x1db   : > { %v6433_v13 = vadd.f32 %v1561_v11, %v6306_v4  ;;  %4640 = vmatmul.mubr.msk.f32.vlgmr.msra.gmra.mxu0 %vm235_vm0, %v6314_v5  ;;  %5006 = vmatpush3.xpose.msk.msra.mxu1 %vm235_vm0, %v4147_v9  ;;  %v4245_v5 = vld [vmem:[%s5309_s5 + $0x196] sm:$0xff]  ;;  %v5217_v9 = vmov 0   ;;  %v4212_v11 = vld [vmem:[%s5309_s5 + $0x8e] sm:$0xff] }
 0x1dc   : > { %4659 = vmatpush3.xpose.msk.msra.mxu0 %vm235_vm0, %v4115_v10  ;;  %v4899_v15 = vpop.f32.mrf.mxu1  ;;  %5007 = vmatprep.subr.mxu1 %v5215_v1  ;;  %v4244_v10 = vld [vmem:[%s5309_s5 + $0x18e] sm:$0xff] }
 0x1dd   : > { %4660 = vmatprep.subr.msk.mxu0 %vm235_vm0, %v4130_v12  ;;  %5037 = vmatprep.mubr.msk.f32.mxu1 %vm5216_vm1, %v5215_v1  ;;  %v4227_v12 = vld [vmem:[%s5309_s5 + $0x106] sm:$0xff]  ;;  %v4226_v15 = vld [vmem:[%s5309_s5 + $0xfe] sm:$0xff] }
 0x1de   : > { %4690 = vmatprep.mubr.msk.f32.mxu0 %vm235_vm0, %v6441_v14  ;;  %5136 = vset.pattern.permute.xlu0 %v5217_v9 }
 0x1df   : > { %5008 = vmatpush3.xpose.msk.msra.mxu1 %vm235_vm0, %v4146_v16  ;;  %3325 = vperm.xlu0 %5136, %v3322_v8   ;;  %v4242_v16 = vld [vmem:[%s5309_s5 + $0x17e] sm:$0xff] }
 0x1e0   : > { %4661 = vmatpush3.xpose.msk.msra.mxu0 %vm235_vm0, %v4114_v17  ;;  %5009 = vmatprep.subr.mxu1 %v5215_v1  ;;  %v4210_v17 = vld [vmem:[%s5309_s5 + $0x7e] sm:$0xff] }
 0x1e1   : > { %4662 = vmatprep.subr.msk.mxu0 %vm235_vm0, %v4129_v18  ;;  %v4225_v18 = vld [vmem:[%s5309_s5 + $0xf6] sm:$0xff] }
 0x1e3   : > { %5010 = vmatpush3.xpose.msk.msra.mxu1 %vm235_vm0, %v4145_v19  ;;  %v4241_v19 = vld [vmem:[%s5309_s5 + $0x176] sm:$0xff] }
 0x1e4   : > { %4663 = vmatpush3.xpose.msk.msra.mxu0 %vm235_vm0, %v4113_v20  ;;  %5011 = vmatprep.subr.mxu1 %v5215_v1  ;;  %v4209_v20 = vld [vmem:[%s5309_s5 + $0x76] sm:$0xff] }
 0x1e5   : > { %4664 = vmatprep.subr.msk.mxu0 %vm235_vm0, %v4128_v21  ;;  %v4224_v21 = vld [vmem:[%s5309_s5 + $0xee] sm:$0xff] }
 0x1e7   : > { %5012 = vmatpush3.xpose.msk.msra.mxu1 %vm235_vm0, %v4144_v22  ;;  %v4240_v22 = vld [vmem:[%s5309_s5 + $0x16e] sm:$0xff] }
 0x1e8   : > { %4665 = vmatpush3.xpose.msk.msra.mxu0 %vm235_vm0, %v4112_v23  ;;  %5013 = vmatprep.subr.mxu1 %v5215_v1  ;;  %v4208_v23 = vld [vmem:[%s5309_s5 + $0x6e] sm:$0xff] }
 0x1e9   : > { %4666 = vmatprep.subr.msk.mxu0 %vm235_vm0, %v4127_v24  ;;  %v4223_v24 = vld [vmem:[%s5309_s5 + $0xe6] sm:$0xff] }
 0x1eb   : > { %5014 = vmatpush3.xpose.msk.msra.mxu1 %vm235_vm0, %v4143_v25  ;;  %v4239_v25 = vld [vmem:[%s5309_s5 + $0x166] sm:$0xff] }
 0x1ec   : > { %4667 = vmatpush3.xpose.msk.msra.mxu0 %vm235_vm0, %v4111_v26  ;;  %5015 = vmatprep.subr.mxu1 %v5215_v1  ;;  %v4207_v26 = vld [vmem:[%s5309_s5 + $0x66] sm:$0xff] }
 0x1ed   : > { %4668 = vmatprep.subr.msk.mxu0 %vm235_vm0, %v4126_v27  ;;  %v4222_v27 = vld [vmem:[%s5309_s5 + $0xde] sm:$0xff] }
 0x1ef   : > { %5016 = vmatpush3.xpose.msk.msra.mxu1 %vm235_vm0, %v4142_v28  ;;  %v4238_v28 = vld [vmem:[%s5309_s5 + $0x15e] sm:$0xff] }
 0x1f0   : > { %4669 = vmatpush3.xpose.msk.msra.mxu0 %vm235_vm0, %v4110_v29  ;;  %5017 = vmatprep.subr.mxu1 %v5215_v1  ;;  %v4206_v29 = vld [vmem:[%s5309_s5 + $0x5e] sm:$0xff] }
 0x1f1   : > { %4670 = vmatprep.subr.msk.mxu0 %vm235_vm0, %v4125_v30  ;;  %v4221_v30 = vld [vmem:[%s5309_s5 + $0xd6] sm:$0xff] }
 0x1f3   : > { %5018 = vmatpush3.xpose.msk.msra.mxu1 %vm235_vm0, %v4141_v31  ;;  %v4237_v31 = vld [vmem:[%s5309_s5 + $0x156] sm:$0xff] }
 0x1f4   : > { %4671 = vmatpush3.xpose.msk.msra.mxu0 %vm235_vm0, %v4109_v32  ;;  %5019 = vmatprep.subr.mxu1 %v5215_v1  ;;  %v4205_v32 = vld [vmem:[%s5309_s5 + $0x56] sm:$0xff] }
 0x1f5   : > { %4672 = vmatprep.subr.msk.mxu0 %vm235_vm0, %v4124_v33  ;;  %v4220_v33 = vld [vmem:[%s5309_s5 + $0xce] sm:$0xff] }
 0x1f7   : > { %5020 = vmatpush3.xpose.msk.msra.mxu1 %vm235_vm0, %v4140_v34  ;;  %v4236_v34 = vld [vmem:[%s5309_s5 + $0x14e] sm:$0xff] }
 0x1f8   : > { %4673 = vmatpush3.xpose.msk.msra.mxu0 %vm235_vm0, %v4108_v35  ;;  %5021 = vmatprep.subr.mxu1 %v5215_v1  ;;  %v4204_v35 = vld [vmem:[%s5309_s5 + $0x4e] sm:$0xff] }
 0x1f9   : > { %4674 = vmatprep.subr.msk.mxu0 %vm235_vm0, %v4123_v36  ;;  %v4219_v36 = vld [vmem:[%s5309_s5 + $0xc6] sm:$0xff] }
 0x1fb   : > { %5022 = vmatpush3.xpose.msk.msra.mxu1 %vm235_vm0, %v4139_v37  ;;  %v4235_v37 = vld [vmem:[%s5309_s5 + $0x146] sm:$0xff] }
 0x1fc   : > { %4675 = vmatpush3.xpose.msk.msra.mxu0 %vm235_vm0, %v4107_v38  ;;  %5023 = vmatprep.subr.mxu1 %v5215_v1  ;;  %v4203_v38 = vld [vmem:[%s5309_s5 + $0x46] sm:$0xff] }
 0x1fd   : > { %4676 = vmatprep.subr.msk.mxu0 %vm235_vm0, %v4122_v39  ;;  %v4218_v39 = vld [vmem:[%s5309_s5 + $0xbe] sm:$0xff] }
 0x1ff   : > { %5024 = vmatpush3.xpose.msk.msra.mxu1 %vm235_vm0, %v4138_v40  ;;  %v4234_v40 = vld [vmem:[%s5309_s5 + $0x13e] sm:$0xff] }
 0x200   : > { %4677 = vmatpush3.xpose.msk.msra.mxu0 %vm235_vm0, %v4106_v41  ;;  %5025 = vmatprep.subr.mxu1 %v5215_v1  ;;  %v4202_v41 = vld [vmem:[%s5309_s5 + $0x3e] sm:$0xff] }
 0x201   : > { %4678 = vmatprep.subr.msk.mxu0 %vm235_vm0, %v4121_v42  ;;  %v4217_v42 = vld [vmem:[%s5309_s5 + $0xb6] sm:$0xff] }
 0x203   : > { %5026 = vmatpush3.xpose.msk.msra.mxu1 %vm235_vm0, %v4137_v43  ;;  %v4233_v43 = vld [vmem:[%s5309_s5 + $0x136] sm:$0xff] }
 0x204   : > { %4679 = vmatpush3.xpose.msk.msra.mxu0 %vm235_vm0, %v4105_v44  ;;  %5027 = vmatprep.subr.mxu1 %v5215_v1  ;;  %v4201_v44 = vld [vmem:[%s5309_s5 + $0x36] sm:$0xff] }
 0x205   : > { %4680 = vmatprep.subr.msk.mxu0 %vm235_vm0, %v4120_v45  ;;  %v4216_v45 = vld [vmem:[%s5309_s5 + $0xae] sm:$0xff] }
 0x207   : > { %5028 = vmatpush3.xpose.msk.msra.mxu1 %vm235_vm0, %v4136_v46  ;;  %v4232_v46 = vld [vmem:[%s5309_s5 + $0x12e] sm:$0xff] }
 0x208   : > { %4681 = vmatpush3.xpose.msk.msra.mxu0 %vm235_vm0, %v4104_v47  ;;  %5029 = vmatprep.subr.mxu1 %v5215_v1  ;;  %v4200_v47 = vld [vmem:[%s5309_s5 + $0x2e] sm:$0xff] }
 0x209   : > { %4682 = vmatprep.subr.msk.mxu0 %vm235_vm0, %v4119_v48  ;;  %v4215_v48 = vld [vmem:[%s5309_s5 + $0xa6] sm:$0xff] }
 0x20b   : > { %5030 = vmatpush3.xpose.msk.msra.mxu1 %vm235_vm0, %v4135_v49  ;;  %v4231_v49 = vld [vmem:[%s5309_s5 + $0x126] sm:$0xff] }
 0x20c   : > { %4683 = vmatpush3.xpose.msk.msra.mxu0 %vm235_vm0, %v4103_v50  ;;  %5031 = vmatprep.subr.mxu1 %v5215_v1  ;;  %v4199_v50 = vld [vmem:[%s5309_s5 + $0x26] sm:$0xff] }
 0x20d   : > { %4684 = vmatprep.subr.msk.mxu0 %vm235_vm0, %v4118_v51 }
 0x20f   : > { %5032 = vmatpush3.xpose.msk.msra.mxu1 %vm235_vm0, %v4134_v52 }
 0x210   : > { %4685 = vmatpush3.xpose.msk.msra.mxu0 %vm235_vm0, %v4102_v53  ;;  %5033 = vmatprep.subr.mxu1 %v5215_v1 }
 0x211   : > { %4686 = vmatprep.subr.msk.mxu0 %vm235_vm0, %v4117_v54 }
 0x213   : > { %5034 = vmatpush3.xpose.msk.msra.mxu1 %vm235_vm0, %v4133_v55 }
 0x214   : > { %4687 = vmatpush3.xpose.msk.msra.mxu0 %vm235_vm0, %v4101_v56  ;;  %5035 = vmatprep.subr.mxu1 %v5215_v1 }
 0x215   : > { %4688 = vmatprep.subr.msk.mxu0 %vm235_vm0, %v4116_v57 }
 0x217   : > { %5036 = vmatpush3.xpose.msk.msra.mxu1 %vm235_vm0, %v4132_v58  ;;  %v449_v58 = vpop.f32.mrf.mxu0 }
 0x218   : > { %4689 = vmatpush3.xpose.msk.msra.mxu0 %vm235_vm0, %v4100_v59  ;;  %5040 = vmatprep.subr.mxu1 %v5215_v1 }
 0x219   : > { %4709 = vmatprep.subr.msk.mxu0 %vm235_vm0, %v4230_v60  ;;  %v451_v59 = vpop.f32.mrf.mxu0 }
 0x21a   : > { %v1910_v63 = vpop.f32.mrf.mxu1  ;;  %5038 = vmatmul.mubr.msk.f32.vlgmr.msra.gmra.mxu1 %vm235_vm0, %v6441_v14 }
 0x21b   : > { %v6561_v2 = vadd.f32 %v1910_v63, %v6433_v13  ;;  %4691 = vmatmul.mubr.msk.f32.vlgmr.msra.gmra.mxu0 %vm235_vm0, %v6441_v14  ;;  %5041 = vmatpush3.xpose.msk.msra.mxu1 %vm235_vm0, %v4246_v61  ;;  %v4243_v13 = vld [vmem:[%s5309_s5 + $0x186] sm:$0xff]  ;;  %v792_v60 = vpop.f32.mrf.mxu0 }
 0x21c   : > { %4710 = vmatpush3.xpose.msk.msra.mxu0 %vm235_vm0, %v4214_v62  ;;  %v4934_v4 = vpop.f32.mrf.mxu1  ;;  %5042 = vmatprep.subr.mxu1 %v5215_v1  ;;  %v4211_v14 = vld [vmem:[%s5309_s5 + $0x86] sm:$0xff]  ;;  %s175_s5 = sand.u32 1, %s5197_s13  }
 0x21d   : > { %4711 = vmatprep.subr.msk.mxu0 %vm235_vm0, %v4229_v0  ;;  %5072 = vmatprep.mubr.msk.f32.mxu1 %vm5216_vm1, %v5215_v1  ;;  %v794_v61 = vpop.f32.mrf.mxu0  ;;  %s5075_s8 = smul.u32 24, %s175_s5  ;;  %s3338_s23 = scalar_lea.sflag [#allocation4], %s175_s5 }
 0x21e   : > { %4741 = vmatprep.mubr.msk.f32.mxu0 %vm235_vm0, %v6569_v3  ;;  %v871_v9 = vadd.f32 %v794_v61, %v451_v59 }
 0x21f   : > { %5043 = vmatpush3.xpose.msk.msra.mxu1 %vm235_vm0, %v4245_v5  ;;  %v1141_v62 = vpop.f32.mrf.mxu0  ;;  %s177_s10 = scalar_lea.vmem [#allocation3], %s5075_s8 }
 0x220   : > { %4712 = vmatpush3.xpose.msk.msra.mxu0 %vm235_vm0, %v4213_v6  ;;  %5044 = vmatprep.subr.mxu1 %v5215_v1  ;;  %s3354_s11 = sshll.u32 %s177_s10, 4  ;;  %s3355_s11 = int_to_ptr.vmem [resolvable:$true] %s3354_s11 }
 0x221   : > { %4713 = vmatprep.subr.msk.mxu0 %vm235_vm0, %v4228_v7  ;;  %v1143_v63 = vpop.f32.mrf.mxu0  ;;  %s5137_s26 = scalar_lea.vmem %s3355_s11, 384  ;;  %p5144_p1 = scmp.lt.s32.totalorder %s3355_s11, %s5142_s27 }
 0x222   : > { %p5138_p12 = scmp.ne.s32.totalorder %s3355_s11, %s5137_s26  ;;  %p5145_p2 = scmp.lt.s32.totalorder %s5143_s28, %s5137_s26 }
 0x223   : > { %5045 = vmatpush3.xpose.msk.msra.mxu1 %vm235_vm0, %v4244_v10  ;;  %v1490_v0 = vpop.f32.mrf.mxu0 }
 0x224   : > { %4714 = vmatpush3.xpose.msk.msra.mxu0 %vm235_vm0, %v4212_v11  ;;  %5046 = vmatprep.subr.mxu1 %v5215_v1  ;;  %v1220_v11 = vadd.f32 %v1143_v63, %v871_v9  ;;  %p5139_p13 = pnand %p5138_p12, %p5279_p4  ;;  %p5146_p3 = por %p5145_p2, %p5144_p1 }
 0x225   : > { %4715 = vmatprep.subr.msk.mxu0 %vm235_vm0, %v4227_v12  ;;  %v1492_v4 = vpop.f32.mrf.mxu0 }
 0x226   : > { %p5140_p0 = pneg %p5139_p13 }
 0x227   : > { %5047 = vmatpush3.xpose.msk.msra.mxu1 %vm235_vm0, %v4243_v13  ;;  %v1839_v5 = vpop.f32.mrf.mxu0 }
 0x228   : > { %4716 = vmatpush3.xpose.msk.msra.mxu0 %vm235_vm0, %v4211_v14  ;;  %5048 = vmatprep.subr.mxu1 %v5215_v1  ;;  %v1569_v14 = vadd.f32 %v1492_v4, %v1220_v11  ;;  %p5147_p5 = pnand %p5146_p3, %p5140_p0 }
 0x229   : > { %4717 = vmatprep.subr.msk.mxu0 %vm235_vm0, %v4226_v15 }
 0x22b   : > { %5049 = vmatpush3.xpose.msk.msra.mxu1 %vm235_vm0, %v4242_v16 }
 0x22c   : > { %4718 = vmatpush3.xpose.msk.msra.mxu0 %vm235_vm0, %v4210_v17  ;;  %5050 = vmatprep.subr.mxu1 %v5215_v1 }
 0x22d   : > { %4719 = vmatprep.subr.msk.mxu0 %vm235_vm0, %v4225_v18 }
 0x22f   : > { %5051 = vmatpush3.xpose.msk.msra.mxu1 %vm235_vm0, %v4241_v19 }
 0x230   : > { %4720 = vmatpush3.xpose.msk.msra.mxu0 %vm235_vm0, %v4209_v20  ;;  %5052 = vmatprep.subr.mxu1 %v5215_v1 }
 0x231   : > { %4721 = vmatprep.subr.msk.mxu0 %vm235_vm0, %v4224_v21 }
 0x233   : > { %5053 = vmatpush3.xpose.msk.msra.mxu1 %vm235_vm0, %v4240_v22 }
 0x234   : > { %4722 = vmatpush3.xpose.msk.msra.mxu0 %vm235_vm0, %v4208_v23  ;;  %5054 = vmatprep.subr.mxu1 %v5215_v1 }
 0x235   : > { %4723 = vmatprep.subr.msk.mxu0 %vm235_vm0, %v4223_v24 }
 0x237   : > { %5055 = vmatpush3.xpose.msk.msra.mxu1 %vm235_vm0, %v4239_v25 }
 0x238   : > { %4724 = vmatpush3.xpose.msk.msra.mxu0 %vm235_vm0, %v4207_v26  ;;  %5056 = vmatprep.subr.mxu1 %v5215_v1 }
 0x239   : > { %4725 = vmatprep.subr.msk.mxu0 %vm235_vm0, %v4222_v27 }
 0x23b   : > { %5057 = vmatpush3.xpose.msk.msra.mxu1 %vm235_vm0, %v4238_v28 }
 0x23c   : > { %4726 = vmatpush3.xpose.msk.msra.mxu0 %vm235_vm0, %v4206_v29  ;;  %5058 = vmatprep.subr.mxu1 %v5215_v1 }
 0x23d   : > { %4727 = vmatprep.subr.msk.mxu0 %vm235_vm0, %v4221_v30 }
 0x23f   : > { %5059 = vmatpush3.xpose.msk.msra.mxu1 %vm235_vm0, %v4237_v31 }
 0x240   : > { %4728 = vmatpush3.xpose.msk.msra.mxu0 %vm235_vm0, %v4205_v32  ;;  %5060 = vmatprep.subr.mxu1 %v5215_v1 }
 0x241   : > { %4729 = vmatprep.subr.msk.mxu0 %vm235_vm0, %v4220_v33 }
 0x243   : > { %5061 = vmatpush3.xpose.msk.msra.mxu1 %vm235_vm0, %v4236_v34 }
 0x244   : > { %4730 = vmatpush3.xpose.msk.msra.mxu0 %vm235_vm0, %v4204_v35  ;;  %5062 = vmatprep.subr.mxu1 %v5215_v1 }
 0x245   : > { %4731 = vmatprep.subr.msk.mxu0 %vm235_vm0, %v4219_v36 }
 0x247   : > { %5063 = vmatpush3.xpose.msk.msra.mxu1 %vm235_vm0, %v4235_v37 }
 0x248   : > { %4732 = vmatpush3.xpose.msk.msra.mxu0 %vm235_vm0, %v4203_v38  ;;  %5064 = vmatprep.subr.mxu1 %v5215_v1 }
 0x249   : > { %4733 = vmatprep.subr.msk.mxu0 %vm235_vm0, %v4218_v39 }
 0x24b   : > { %5065 = vmatpush3.xpose.msk.msra.mxu1 %vm235_vm0, %v4234_v40 }
 0x24c   : > { %4734 = vmatpush3.xpose.msk.msra.mxu0 %vm235_vm0, %v4202_v41  ;;  %5066 = vmatprep.subr.mxu1 %v5215_v1 }
 0x24d   : > { %4735 = vmatprep.subr.msk.mxu0 %vm235_vm0, %v4217_v42 }
 0x24f   : > { %5067 = vmatpush3.xpose.msk.msra.mxu1 %vm235_vm0, %v4233_v43 }
 0x250   : > { %4736 = vmatpush3.xpose.msk.msra.mxu0 %vm235_vm0, %v4201_v44  ;;  %5068 = vmatprep.subr.mxu1 %v5215_v1 }
 0x251   : > { %4737 = vmatprep.subr.msk.mxu0 %vm235_vm0, %v4216_v45 }
 0x253   : > { %5069 = vmatpush3.xpose.msk.msra.mxu1 %vm235_vm0, %v4232_v46 }
 0x254   : > { %4738 = vmatpush3.xpose.msk.msra.mxu0 %vm235_vm0, %v4200_v47  ;;  %5070 = vmatprep.subr.mxu1 %v5215_v1 }
 0x255   : > { %4739 = vmatprep.subr.msk.mxu0 %vm235_vm0, %v4215_v48 }
 0x257   : > { %5071 = vmatpush3.xpose.msk.msra.mxu1 %vm235_vm0, %v4231_v49 }
 0x258   : > { %4740 = vmatpush3.xpose.msk.msra.mxu0 %vm235_vm0, %v4199_v50 }
 0x25a   : > { %v2259_v51 = vpop.f32.mrf.mxu1  ;;  %5073 = vmatmul.mubr.msk.f32.vlgmr.msra.gmra.mxu1 %vm235_vm0, %v6569_v3  ;;  %v3326_v26 = vpop.permute.xlu0 %3325 }
 0x25b   : > { %v2268_v52 = vadd.f32 %v2259_v51, %v6561_v2  ;;  %4742 = vmatmul.mubr.msk.f32.vlgmr.msra.gmra.mxu0 %vm235_vm0, %v6569_v3  ;;  %v1841_v2 = vpop.f32.mrf.mxu0  ;;  %v870_v3 = vadd.f32 %v792_v60, %v449_v58 }
 0x25c   : > { %v4969_v53 = vpop.f32.mrf.mxu1  ;;  %v1918_v17 = vadd.f32 %v1841_v2, %v1569_v14 }
 0x25d   : > { %v2188_v6 = vpop.f32.mrf.mxu0  ;;  %v1219_v10 = vadd.f32 %v1141_v62, %v870_v3 }
 0x25f   : > { %v2190_v7 = vpop.f32.mrf.mxu0  ;;  %v1568_v12 = vadd.f32 %v1490_v0, %v1219_v10 }
 0x260   : > { %v2267_v19 = vadd.f32 %v2190_v7, %v1918_v17 }
 0x261   : > { %v1917_v15 = vadd.f32 %v1839_v5, %v1568_v12 }
 0x263   : > { %v2266_v18 = vadd.f32 %v2188_v6, %v1917_v15 }
 0x29a   : > { %v2608_v54 = vpop.f32.mrf.mxu1 }
 0x29b   : > { %v2617_v1 = vadd.f32 %v2608_v54, %v2268_v52  ;;  %v2537_v8 = vpop.f32.mrf.mxu0 }
 0x29c   : > { %v5004_v55 = vpop.f32.mrf.mxu1  ;;  %v2615_v20 = vadd.f32 %v2537_v8, %v2266_v18 }
 0x29d   : > { %v2539_v13 = vpop.f32.mrf.mxu0 }
 0x29e   : > { %v2616_v23 = vadd.f32 %v2539_v13, %v2267_v19 }
 0x2da   : > { %v2957_v56 = vpop.f32.mrf.mxu1 }
 0x2db   : > { %v2886_v16 = vpop.f32.mrf.mxu0  ;;  %v2966_v21 = vadd.f32 %v2957_v56, %v2617_v1 }
 0x2dc   : > { %v5039_v57 = vpop.f32.mrf.mxu1  ;;  %v2964_v24 = vadd.f32 %v2886_v16, %v2615_v20 }
 0x2dd   : > { %v2888_v22 = vpop.f32.mrf.mxu0 }
 0x2de   : > { %v2965_v29 = vadd.f32 %v2888_v22, %v2616_v23 }
 0x31a   : > { %v3306_v25 = vpop.f32.mrf.mxu1 }
 0x31b   : > { %v3315_v27 = vadd.f32 %v3306_v25, %v2966_v21  ;;  %v3235_v28 = vpop.f32.mrf.mxu0 }
 0x31c   : > { %v3313_v30 = vadd.f32 %v3235_v28, %v2964_v24  ;;  %v5074_v31 = vpop.f32.mrf.mxu1 }
 0x31d   : > { %v3330_v32 = vadd.f32 %v3326_v26, %v3315_v27  ;;  %v3237_v33 = vpop.f32.mrf.mxu0 }
 0x31e   : > { %v3328_v34 = vadd.f32 %v3326_v26, %v3313_v30  ;;  %v3314_v35 = vadd.f32 %v3237_v33, %v2965_v29 }
 0x31f   : > { %v3333_v36 = vmax.f32 %v3330_v32, 0.0 }
 0x320   : > { %v3331_v37 = vmax.f32 %v3328_v34, 0.0  ;;  %v3329_v38 = vadd.f32 %v3326_v26, %v3314_v35 }
 0x321   : > { %3336 = vst [vmem:[%s177_s10 + $0x10] sm:$0xff] %v3333_v36 }
 0x322   : > { %3334 = vst [vmem:[%s177_s10] sm:$0xff] %v3331_v37  ;;  %v3332_v39 = vmax.f32 %v3329_v38, 0.0 }
 0x324   : > { %3335 = vst [vmem:[%s177_s10 + $0x8] sm:$0xff] %v3332_v39 }
 0x325   : > { %5150 = shalt.err (!%p5147_p5)
}
 0x326   : > { %s5151_s29 = scalar_lea.hbm %s3352_s21, 384  ;;  %s5155_s6 = scalar_lea.hbm %s6734_s3, 768 }
 0x327   : > { %p5152_p6 = scmp.ne.s32.totalorder %s3352_s21, %s5151_s29  ;;  %p5156_p10 = scmp.lt.s32.totalorder %s3352_s21, %s6734_s3 }
 0x328   : > { %p5157_p11 = scmp.lt.s32.totalorder %s5155_s6, %s5151_s29 }
 0x329   : > { %p5153_p7 = pnand %p5152_p6, %p5279_p4 }
 0x32a   : > { %p5158_p12 = por %p5157_p11, %p5156_p10 }
 0x32b   : > { %p5154_p9 = pneg %p5153_p7 }
 0x32d   : > { %p5159_p13 = pnand %p5158_p12, %p5154_p9 }
 0x32f   : > { %5162 = shalt.err (!%p5159_p13)
}
 0x330   : > { %5078 = dma.vmem_to_hbm [thread:$0]  (%p5279_p4), %s3355_s11, 384, %s3352_s21, %s3338_s23  }
 0x331 PF: > { %p5084_p0 = scmp.ge.s32.totalorder %s5213_s17, 2  ;;  %s3366_s8 = sand.u32 1, %s5193_s12  }
 0x332   : > { %s3367_s9 = scalar_lea.sflag [#allocation4], %s3366_s8 }
 0x333   : > { %p5081_p1 = pnand %p5084_p0, %p5286_p8 }
 0x335   : > { %p5082_p2 = pneg %p5081_p1 }
 0x337   : > { %5188 = dma.done.wait (%p5082_p2), %s3367_s9, 384  }
 0x338   : > { %5190 = vsyncadd (%p5082_p2), %s3367_s9, 4294966912  ;;  %s16_s17 = sadd.s32 1, %s5213_s17   ;;  %s6737_s12 = smov %s5197_s13 }
 0x339   : > { %p13_p3 = scmp.ge.s32.totalorder %s16_s17, 4   ;;  %s6738_s13 = smov %s5201_s14 }
 0x33a   : > { %s6739_s14 = smov %s5292_s25  ;;  %s6740_s15 = smov %s5209_s16 }
 0x33b   : > { %s6741_s16 = smov %s6743_s20  ;;  %15 = sbr.rel (!%p13_p3) target bundleno = 4 (0x4), region = 84 }
 0x340   :  { %3372 = vsyncpa [#allocation4], 1 }
 0x341   :  { %3374 = vsyncpa [#allocation4 + $0x1], 1 }

// kernel: tpu_custom_call.1
= control target key start
LH: loop header
LB: loop body
LE: loop exit
PB: predicated region body
PF: predicated region fallthrough
CT: control target
= control target key end

     0   :  { %8 = vsyncpa [#allocation4], 0  ;;  %s6731_s0 = inlined_call_operand.vmem [shape: f32[2,422,4], index: 0, kind: input, shape index: {}]   ;;  %s6732_s1 = inlined_call_operand.vmem [shape: f32[9,8,4], index: 1, kind: input, shape index: {}]   ;;  %s6733_s2 = inlined_call_operand.vmem [shape: f32[8,1], index: 2, kind: input, shape index: {}]   ;;  %s6734_s3 = inlined_call_operand.hbm [shape: f32[2,8,384], index: 3, kind: output, shape index: {}]  }
   0x1   :  { %10 = vsyncpa [#allocation4 + $0x1], 0  ;;  %s5239_s12 = smov 0   ;;  %s5241_s13 = smov 0  }
   0x2   :  { %s5243_s14 = smov 0   ;;  %s5245_s15 = smov 0  }
   0x3   :  { %s5247_s16 = smov 0   ;;  %s5249_s17 = smov 0  }
   0x4 LB: > { %s3450_s18 = sadd.s32 4294967295, %s5213_s17   ;;  %s3451_s19 = sadd.s32 4294967294, %s5213_s17   ;;  %s5213_s17 = sphi %s5249_s17, %s16_s17   ;;  %s5209_s16 = sphi %s5247_s16, %s6741_s16   ;;  %s5205_s15 = sphi %s5245_s15, %s6740_s15   ;;  %s5201_s14 = sphi %s5243_s14, %s6739_s14   ;;  %s5197_s13 = sphi %s5241_s13, %s6738_s13   ;;  %s5193_s12 = sphi %s5239_s12, %s6737_s12  }
   0x5   : > { %s28_s20 = sadd.s32 1, %s5209_s16  ;;  %s105_s21 = sadd.s32 1, %s5201_s14 }
   0x6   : > { %p30_p0 = scmp.ge.s32.totalorder %s28_s20, 2  ;;  %p115_p1 = scmp.ne.s32.totalorder %s5201_s14, %s5197_s13 }
   0x7   : > { %p116_p2 = scmp.eq.s32.totalorder %s3450_s18, 1  ;;  %p121_p3 = scmp.ne.s32.totalorder %s5197_s13, %s5193_s12 }
   0x8   : > { %s6743_s20 = smov (%p30_p0, %s28_s20), 0  ;;  %p122_p5 = scmp.eq.s32.totalorder %s3451_s19, 1 }
   0x9   : > { %p5279_p4 = por %p116_p2, %p115_p1  ;;  %s100_s23 = ssub.s32 %s5209_s16, %s6743_s20 }
   0xa   : > { %p3454_p6 = scmp.ge.s32.totalorder %s5213_s17, 1  ;;  %p103_p7 = scmp.eq.s32.totalorder %s100_s23, 0 }
   0xb   : > { %p5286_p8 = por %p122_p5, %p121_p3  ;;  %p154_p9 = scmp.lt.s32.totalorder %s5213_s17, 3 }
   0xc   : > { %s5292_s25 = scalar_select %p103_p7, %s5201_s14, %s105_s21  }
   0xd   : > { %p155_p10 = pnand %p3454_p6, %p154_p9 }
   0xe   : > { %p178_p11 = scmp.lt.s32.totalorder (!%p155_p10), %s5205_s15, 1  ;;  %s5077_s9 = smul.u32 (!%p155_p10), 384, %s5205_s15 }
   0xf   : > { %158 = sbr.rel (%p155_p10) target bundleno = 817 (0x331), region = 32 }
  0x10   : > { %s3352_s21 = scalar_lea.hbm (!%p155_p10), %s6734_s3, %s5077_s9 }
  0x14   : > { %vm235_vm0 = vcmask 31744   ;;  %v5298_v0 = vld [vmem:[%s6732_s1] sm:$0xff]  ;;  %v5215_v1 = vmov 0.0   ;;  %s179_s28 = scalar_select %p178_p11, %s5205_s15, 1  ;;  %vm5216_vm1 = vmmov 0   ;;  %v5436_v54 = vld [vmem:[%s6732_s1 + $0x8] sm:$0xff] }
  0x15   : > { %4760 = vmatprep.subr.mxu1 %v5215_v1  ;;  %4333 = vmatprep.mubr.msk.f32.mxu0 %vm235_vm0, %v5298_v0  ;;  %s5218_s15 = smov [#allocation3]  }
  0x16   : > { %4792 = vmatprep.mubr.msk.f32.mxu1 %vm5216_vm1, %v5215_v1  ;;  %s5076_s29 = smul.u32 424, %s179_s28  ;;  %s5141_s27 = sshll.u32 %s5218_s15, 4  ;;  %s5142_s27 = int_to_ptr.vmem [resolvable:$false] %s5141_s27 }
  0x17   : > { %s5143_s28 = scalar_lea.vmem %s5142_s27, 768 }
  0x18   : > { %s5309_s5 = scalar_lea.vmem %s6731_s0, %s5076_s29 }
  0x19   : > { %v217_v2 = vld [vmem:[%s5309_s5 + $0xf8] sm:$0xff]  ;;  %v216_v5 = vld [vmem:[%s5309_s5 + $0xf0] sm:$0xff]  ;;  %v215_v8 = vld [vmem:[%s5309_s5 + $0xe8] sm:$0xff] }
  0x1a   : > { %v233_v3 = vld [vmem:[%s5309_s5 + $0x178] sm:$0xff]  ;;  %4301 = vmatprep.subr.msk.mxu0 %vm235_vm0, %v217_v2  ;;  %v232_v6 = vld [vmem:[%s5309_s5 + $0x170] sm:$0xff]  ;;  %v231_v9 = vld [vmem:[%s5309_s5 + $0x168] sm:$0xff] }
  0x1b   : > { %v201_v4 = vld [vmem:[%s5309_s5 + $0x78] sm:$0xff]  ;;  %4761 = vmatpush3.xpose.msk.msra.mxu1 %vm235_vm0, %v233_v3  ;;  %v200_v7 = vld [vmem:[%s5309_s5 + $0x70] sm:$0xff]  ;;  %v199_v10 = vld [vmem:[%s5309_s5 + $0x68] sm:$0xff] }
  0x1c   : > { %4302 = vmatpush3.xpose.msk.msra.mxu0 %vm235_vm0, %v201_v4  ;;  %4762 = vmatprep.subr.mxu1 %v5215_v1  ;;  %v214_v11 = vld [vmem:[%s5309_s5 + $0xe0] sm:$0xff]  ;;  %v213_v14 = vld [vmem:[%s5309_s5 + $0xd8] sm:$0xff]  ;;  %v212_v17 = vld [vmem:[%s5309_s5 + $0xd0] sm:$0xff] }
  0x1d   : > { %4303 = vmatprep.subr.msk.mxu0 %vm235_vm0, %v216_v5  ;;  %v230_v12 = vld [vmem:[%s5309_s5 + $0x160] sm:$0xff]  ;;  %v229_v15 = vld [vmem:[%s5309_s5 + $0x158] sm:$0xff]  ;;  %v228_v18 = vld [vmem:[%s5309_s5 + $0x150] sm:$0xff] }
  0x1e   : > { %v198_v13 = vld [vmem:[%s5309_s5 + $0x60] sm:$0xff]  ;;  %v197_v16 = vld [vmem:[%s5309_s5 + $0x58] sm:$0xff]  ;;  %v196_v19 = vld [vmem:[%s5309_s5 + $0x50] sm:$0xff] }
  0x1f   : > { %4763 = vmatpush3.xpose.msk.msra.mxu1 %vm235_vm0, %v232_v6  ;;  %v211_v20 = vld [vmem:[%s5309_s5 + $0xc8] sm:$0xff]  ;;  %v210_v23 = vld [vmem:[%s5309_s5 + $0xc0] sm:$0xff]  ;;  %v209_v26 = vld [vmem:[%s5309_s5 + $0xb8] sm:$0xff] }
  0x20   : > { %4304 = vmatpush3.xpose.msk.msra.mxu0 %vm235_vm0, %v200_v7  ;;  %4764 = vmatprep.subr.mxu1 %v5215_v1  ;;  %v227_v21 = vld [vmem:[%s5309_s5 + $0x148] sm:$0xff]  ;;  %v226_v24 = vld [vmem:[%s5309_s5 + $0x140] sm:$0xff]  ;;  %v225_v27 = vld [vmem:[%s5309_s5 + $0x138] sm:$0xff] }
  0x21   : > { %4305 = vmatprep.subr.msk.mxu0 %vm235_vm0, %v215_v8  ;;  %v195_v22 = vld [vmem:[%s5309_s5 + $0x48] sm:$0xff]  ;;  %v194_v25 = vld [vmem:[%s5309_s5 + $0x40] sm:$0xff]  ;;  %v193_v28 = vld [vmem:[%s5309_s5 + $0x38] sm:$0xff] }
  0x22   : > { %v208_v29 = vld [vmem:[%s5309_s5 + $0xb0] sm:$0xff]  ;;  %v207_v32 = vld [vmem:[%s5309_s5 + $0xa8] sm:$0xff]  ;;  %v206_v35 = vld [vmem:[%s5309_s5 + $0xa0] sm:$0xff] }
  0x23   : > { %4765 = vmatpush3.xpose.msk.msra.mxu1 %vm235_vm0, %v231_v9  ;;  %v224_v30 = vld [vmem:[%s5309_s5 + $0x130] sm:$0xff]  ;;  %v223_v33 = vld [vmem:[%s5309_s5 + $0x128] sm:$0xff]  ;;  %v222_v36 = vld [vmem:[%s5309_s5 + $0x120] sm:$0xff] }
  0x24   : > { %4306 = vmatpush3.xpose.msk.msra.mxu0 %vm235_vm0, %v199_v10  ;;  %4766 = vmatprep.subr.mxu1 %v5215_v1  ;;  %v192_v31 = vld [vmem:[%s5309_s5 + $0x30] sm:$0xff]  ;;  %v191_v34 = vld [vmem:[%s5309_s5 + $0x28] sm:$0xff]  ;;  %v190_v37 = vld [vmem:[%s5309_s5 + $0x20] sm:$0xff] }
  0x25   : > { %4307 = vmatprep.subr.msk.mxu0 %vm235_vm0, %v214_v11  ;;  %v205_v38 = vld [vmem:[%s5309_s5 + $0x98] sm:$0xff]  ;;  %v204_v41 = vld [vmem:[%s5309_s5 + $0x90] sm:$0xff]  ;;  %v203_v44 = vld [vmem:[%s5309_s5 + $0x88] sm:$0xff] }
  0x26   : > { %v221_v39 = vld [vmem:[%s5309_s5 + $0x118] sm:$0xff]  ;;  %v220_v42 = vld [vmem:[%s5309_s5 + $0x110] sm:$0xff]  ;;  %v219_v45 = vld [vmem:[%s5309_s5 + $0x108] sm:$0xff] }
  0x27   : > { %4767 = vmatpush3.xpose.msk.msra.mxu1 %vm235_vm0, %v230_v12  ;;  %v189_v40 = vld [vmem:[%s5309_s5 + $0x18] sm:$0xff]  ;;  %v188_v43 = vld [vmem:[%s5309_s5 + $0x10] sm:$0xff]  ;;  %v187_v46 = vld [vmem:[%s5309_s5 + $0x8] sm:$0xff] }
  0x28   : > { %4308 = vmatpush3.xpose.msk.msra.mxu0 %vm235_vm0, %v198_v13  ;;  %4768 = vmatprep.subr.mxu1 %v5215_v1  ;;  %v202_v47 = vld [vmem:[%s5309_s5 + $0x80] sm:$0xff]  ;;  %v3536_v53 = vld [vmem:[%s5309_s5 + $0xf1] sm:$0xff]  ;;  %v3535_v57 = vld [vmem:[%s5309_s5 + $0xe9] sm:$0xff] }
  0x29   : > { %4309 = vmatprep.subr.msk.mxu0 %vm235_vm0, %v213_v14  ;;  %v218_v48 = vld [vmem:[%s5309_s5 + $0x100] sm:$0xff]  ;;  %v3552_v55 = vld [vmem:[%s5309_s5 + $0x171] sm:$0xff]  ;;  %v3551_v58 = vld [vmem:[%s5309_s5 + $0x169] sm:$0xff] }
  0x2a   : > { %v186_v49 = vld [vmem:[%s5309_s5] sm:$0xff]  ;;  %v3520_v56 = vld [vmem:[%s5309_s5 + $0x71] sm:$0xff]  ;;  %v3519_v59 = vld [vmem:[%s5309_s5 + $0x69] sm:$0xff] }
  0x2b   : > { %4769 = vmatpush3.xpose.msk.msra.mxu1 %vm235_vm0, %v229_v15  ;;  %v3537_v50 = vld [vmem:[%s5309_s5 + $0xf9] sm:$0xff]  ;;  %v3534_v60 = vld [vmem:[%s5309_s5 + $0xe1] sm:$0xff]  ;;  %v3532_v3 = vld [vmem:[%s5309_s5 + $0xd1] sm:$0xff] }
  0x2c   : > { %4310 = vmatpush3.xpose.msk.msra.mxu0 %vm235_vm0, %v197_v16  ;;  %4770 = vmatprep.subr.mxu1 %v5215_v1  ;;  %v3553_v51 = vld [vmem:[%s5309_s5 + $0x179] sm:$0xff]  ;;  %v3550_v61 = vld [vmem:[%s5309_s5 + $0x161] sm:$0xff]  ;;  %v3548_v4 = vld [vmem:[%s5309_s5 + $0x151] sm:$0xff] }
  0x2d   : > { %4311 = vmatprep.subr.msk.mxu0 %vm235_vm0, %v212_v17  ;;  %v3521_v52 = vld [vmem:[%s5309_s5 + $0x79] sm:$0xff]  ;;  %v3518_v62 = vld [vmem:[%s5309_s5 + $0x61] sm:$0xff]  ;;  %v3516_v5 = vld [vmem:[%s5309_s5 + $0x51] sm:$0xff] }
  0x2e   : > { %v3533_v63 = vld [vmem:[%s5309_s5 + $0xd9] sm:$0xff]  ;;  %v3531_v6 = vld [vmem:[%s5309_s5 + $0xc9] sm:$0xff]  ;;  %v3530_v9 = vld [vmem:[%s5309_s5 + $0xc1] sm:$0xff] }
  0x2f   : > { %4771 = vmatpush3.xpose.msk.msra.mxu1 %vm235_vm0, %v228_v18  ;;  %v3517_v2 = vld [vmem:[%s5309_s5 + $0x59] sm:$0xff]  ;;  %v3547_v7 = vld [vmem:[%s5309_s5 + $0x149] sm:$0xff]  ;;  %v3546_v10 = vld [vmem:[%s5309_s5 + $0x141] sm:$0xff] }
  0x30   : > { %4312 = vmatpush3.xpose.msk.msra.mxu0 %vm235_vm0, %v196_v19  ;;  %4772 = vmatprep.subr.mxu1 %v5215_v1  ;;  %v3515_v8 = vld [vmem:[%s5309_s5 + $0x49] sm:$0xff]  ;;  %v3514_v11 = vld [vmem:[%s5309_s5 + $0x41] sm:$0xff]  ;;  %v3529_v12 = vld [vmem:[%s5309_s5 + $0xb9] sm:$0xff] }
  0x31   : > { %4313 = vmatprep.subr.msk.mxu0 %vm235_vm0, %v211_v20  ;;  %v3545_v13 = vld [vmem:[%s5309_s5 + $0x139] sm:$0xff]  ;;  %v3528_v15 = vld [vmem:[%s5309_s5 + $0xb1] sm:$0xff]  ;;  %v3527_v18 = vld [vmem:[%s5309_s5 + $0xa9] sm:$0xff] }
  0x32   : > { %v3513_v14 = vld [vmem:[%s5309_s5 + $0x39] sm:$0xff]  ;;  %v3544_v16 = vld [vmem:[%s5309_s5 + $0x131] sm:$0xff]  ;;  %v3543_v19 = vld [vmem:[%s5309_s5 + $0x129] sm:$0xff] }
  0x33   : > { %4773 = vmatpush3.xpose.msk.msra.mxu1 %vm235_vm0, %v227_v21  ;;  %v3512_v17 = vld [vmem:[%s5309_s5 + $0x31] sm:$0xff]  ;;  %v3511_v20 = vld [vmem:[%s5309_s5 + $0x29] sm:$0xff]  ;;  %v3526_v21 = vld [vmem:[%s5309_s5 + $0xa1] sm:$0xff] }
  0x34   : > { %4314 = vmatpush3.xpose.msk.msra.mxu0 %vm235_vm0, %v195_v22  ;;  %4774 = vmatprep.subr.mxu1 %v5215_v1  ;;  %v3542_v22 = vld [vmem:[%s5309_s5 + $0x121] sm:$0xff] }
  0x35   : > { %4315 = vmatprep.subr.msk.mxu0 %vm235_vm0, %v210_v23  ;;  %v3510_v23 = vld [vmem:[%s5309_s5 + $0x21] sm:$0xff] }
  0x37   : > { %4775 = vmatpush3.xpose.msk.msra.mxu1 %vm235_vm0, %v226_v24  ;;  %v3525_v24 = vld [vmem:[%s5309_s5 + $0x99] sm:$0xff] }
  0x38   : > { %4316 = vmatpush3.xpose.msk.msra.mxu0 %vm235_vm0, %v194_v25  ;;  %4776 = vmatprep.subr.mxu1 %v5215_v1  ;;  %v3541_v25 = vld [vmem:[%s5309_s5 + $0x119] sm:$0xff] }
  0x39   : > { %4317 = vmatprep.subr.msk.mxu0 %vm235_vm0, %v209_v26  ;;  %v3509_v26 = vld [vmem:[%s5309_s5 + $0x19] sm:$0xff] }
  0x3b   : > { %4777 = vmatpush3.xpose.msk.msra.mxu1 %vm235_vm0, %v225_v27  ;;  %v3524_v27 = vld [vmem:[%s5309_s5 + $0x91] sm:$0xff] }
  0x3c   : > { %4318 = vmatpush3.xpose.msk.msra.mxu0 %vm235_vm0, %v193_v28  ;;  %4778 = vmatprep.subr.mxu1 %v5215_v1  ;;  %v3540_v28 = vld [vmem:[%s5309_s5 + $0x111] sm:$0xff] }
  0x3d   : > { %4319 = vmatprep.subr.msk.mxu0 %vm235_vm0, %v208_v29  ;;  %v3508_v29 = vld [vmem:[%s5309_s5 + $0x11] sm:$0xff] }
  0x3f   : > { %4779 = vmatpush3.xpose.msk.msra.mxu1 %vm235_vm0, %v224_v30  ;;  %v3523_v30 = vld [vmem:[%s5309_s5 + $0x89] sm:$0xff] }
  0x40   : > { %4320 = vmatpush3.xpose.msk.msra.mxu0 %vm235_vm0, %v192_v31  ;;  %4780 = vmatprep.subr.mxu1 %v5215_v1  ;;  %v3539_v31 = vld [vmem:[%s5309_s5 + $0x109] sm:$0xff] }
  0x41   : > { %4321 = vmatprep.subr.msk.mxu0 %vm235_vm0, %v207_v32  ;;  %v3507_v32 = vld [vmem:[%s5309_s5 + $0x9] sm:$0xff] }
  0x43   : > { %4781 = vmatpush3.xpose.msk.msra.mxu1 %vm235_vm0, %v223_v33  ;;  %v3522_v33 = vld [vmem:[%s5309_s5 + $0x81] sm:$0xff] }
  0x44   : > { %4322 = vmatpush3.xpose.msk.msra.mxu0 %vm235_vm0, %v191_v34  ;;  %4782 = vmatprep.subr.mxu1 %v5215_v1  ;;  %v3538_v34 = vld [vmem:[%s5309_s5 + $0x101] sm:$0xff] }
  0x45   : > { %4323 = vmatprep.subr.msk.mxu0 %vm235_vm0, %v206_v35  ;;  %v3506_v35 = vld [vmem:[%s5309_s5 + $0x1] sm:$0xff] }
  0x47   : > { %4783 = vmatpush3.xpose.msk.msra.mxu1 %vm235_vm0, %v222_v36  ;;  %v5546_v36 = vld [vmem:[%s5309_s5 + $0xfa] sm:$0xff] }
  0x48   : > { %4324 = vmatpush3.xpose.msk.msra.mxu0 %vm235_vm0, %v190_v37  ;;  %4784 = vmatprep.subr.mxu1 %v5215_v1  ;;  %v5552_v37 = vld [vmem:[%s5309_s5 + $0x17a] sm:$0xff] }
  0x49   : > { %4325 = vmatprep.subr.msk.mxu0 %vm235_vm0, %v205_v38  ;;  %v5557_v38 = vld [vmem:[%s5309_s5 + $0x7a] sm:$0xff] }
  0x4b   : > { %4785 = vmatpush3.xpose.msk.msra.mxu1 %vm235_vm0, %v221_v39  ;;  %v5562_v39 = vld [vmem:[%s5309_s5 + $0xf2] sm:$0xff] }
  0x4c   : > { %4326 = vmatpush3.xpose.msk.msra.mxu0 %vm235_vm0, %v189_v40  ;;  %4786 = vmatprep.subr.mxu1 %v5215_v1  ;;  %v5571_v40 = vld [vmem:[%s6732_s1 + $0x10] sm:$0xff] }
  0x4d   : > { %4327 = vmatprep.subr.msk.mxu0 %vm235_vm0, %v204_v41  ;;  %v5577_v41 = vld [vmem:[%s5309_s5 + $0x172] sm:$0xff] }
  0x4f   : > { %4787 = vmatpush3.xpose.msk.msra.mxu1 %vm235_vm0, %v220_v42  ;;  %v5582_v42 = vld [vmem:[%s5309_s5 + $0x72] sm:$0xff] }
  0x50   : > { %4328 = vmatpush3.xpose.msk.msra.mxu0 %vm235_vm0, %v188_v43  ;;  %4788 = vmatprep.subr.mxu1 %v5215_v1  ;;  %v5587_v43 = vld [vmem:[%s5309_s5 + $0xea] sm:$0xff] }
  0x51   : > { %4329 = vmatprep.subr.msk.mxu0 %vm235_vm0, %v203_v44  ;;  %v5597_v44 = vld [vmem:[%s5309_s5 + $0x16a] sm:$0xff] }
  0x53   : > { %4789 = vmatpush3.xpose.msk.msra.mxu1 %vm235_vm0, %v219_v45  ;;  %v5602_v45 = vld [vmem:[%s5309_s5 + $0x6a] sm:$0xff] }
  0x54   : > { %4330 = vmatpush3.xpose.msk.msra.mxu0 %vm235_vm0, %v187_v46  ;;  %4790 = vmatprep.subr.mxu1 %v5215_v1  ;;  %v5605_v46 = vld [vmem:[%s5309_s5 + $0xe2] sm:$0xff] }
  0x55   : > { %4331 = vmatprep.subr.msk.mxu0 %vm235_vm0, %v202_v47  ;;  %v5613_v47 = vld [vmem:[%s5309_s5 + $0x162] sm:$0xff] }
  0x57   : > { %4791 = vmatpush3.xpose.msk.msra.mxu1 %vm235_vm0, %v218_v48  ;;  %v5618_v48 = vld [vmem:[%s5309_s5 + $0x62] sm:$0xff] }
  0x58   : > { %4332 = vmatpush3.xpose.msk.msra.mxu0 %vm235_vm0, %v186_v49  ;;  %4795 = vmatprep.subr.mxu1 %v5215_v1  ;;  %v5621_v49 = vld [vmem:[%s5309_s5 + $0xda] sm:$0xff] }
  0x59   : > { %4352 = vmatprep.subr.msk.mxu0 %vm235_vm0, %v3537_v50  ;;  %v5629_v50 = vld [vmem:[%s5309_s5 + $0x15a] sm:$0xff] }
  0x5a   : > { %4793 = vmatmul.mubr.msk.f32.vlgmr.msra.gmra.mxu1 %vm235_vm0, %v5298_v0 }
  0x5b   : > { %4334 = vmatmul.mubr.msk.f32.vlgmr.msra.gmra.mxu0 %vm235_vm0, %v5298_v0  ;;  %4796 = vmatpush3.xpose.msk.msra.mxu1 %vm235_vm0, %v3553_v51  ;;  %v3549_v0 = vld [vmem:[%s5309_s5 + $0x159] sm:$0xff] }
  0x5c   : > { %4353 = vmatpush3.xpose.msk.msra.mxu0 %vm235_vm0, %v3521_v52  ;;  %4797 = vmatprep.subr.mxu1 %v5215_v1  ;;  %v5634_v51 = vld [vmem:[%s5309_s5 + $0x5a] sm:$0xff]  ;;  %v5637_v52 = vld [vmem:[%s5309_s5 + $0xd2] sm:$0xff] }
  0x5d   : > { %4354 = vmatprep.subr.msk.mxu0 %vm235_vm0, %v3536_v53  ;;  %4827 = vmatprep.mubr.msk.f32.mxu1 %vm5216_vm1, %v5215_v1  ;;  %v5645_v53 = vld [vmem:[%s5309_s5 + $0x152] sm:$0xff] }
  0x5e   : > { %4384 = vmatprep.mubr.msk.f32.mxu0 %vm235_vm0, %v5436_v54 }
  0x5f   : > { %4798 = vmatpush3.xpose.msk.msra.mxu1 %vm235_vm0, %v3552_v55  ;;  %v5653_v55 = vld [vmem:[%s5309_s5 + $0xca] sm:$0xff] }
  0x60   : > { %4355 = vmatpush3.xpose.msk.msra.mxu0 %vm235_vm0, %v3520_v56  ;;  %4799 = vmatprep.subr.mxu1 %v5215_v1  ;;  %v5661_v56 = vld [vmem:[%s5309_s5 + $0x14a] sm:$0xff] }
  0x61   : > { %4356 = vmatprep.subr.msk.mxu0 %vm235_vm0, %v3535_v57  ;;  %v5666_v57 = vld [vmem:[%s5309_s5 + $0x4a] sm:$0xff] }
  0x63   : > { %4800 = vmatpush3.xpose.msk.msra.mxu1 %vm235_vm0, %v3551_v58  ;;  %v5669_v58 = vld [vmem:[%s5309_s5 + $0xc2] sm:$0xff] }
  0x64   : > { %4357 = vmatpush3.xpose.msk.msra.mxu0 %vm235_vm0, %v3519_v59  ;;  %4801 = vmatprep.subr.mxu1 %v5215_v1  ;;  %v5677_v59 = vld [vmem:[%s5309_s5 + $0x142] sm:$0xff] }
  0x65   : > { %4358 = vmatprep.subr.msk.mxu0 %vm235_vm0, %v3534_v60  ;;  %v5682_v60 = vld [vmem:[%s5309_s5 + $0x42] sm:$0xff] }
  0x67   : > { %4802 = vmatpush3.xpose.msk.msra.mxu1 %vm235_vm0, %v3550_v61  ;;  %v5685_v61 = vld [vmem:[%s5309_s5 + $0xba] sm:$0xff] }
  0x68   : > { %4359 = vmatpush3.xpose.msk.msra.mxu0 %vm235_vm0, %v3518_v62  ;;  %4803 = vmatprep.subr.mxu1 %v5215_v1  ;;  %v5693_v62 = vld [vmem:[%s5309_s5 + $0x13a] sm:$0xff] }
  0x69   : > { %4360 = vmatprep.subr.msk.mxu0 %vm235_vm0, %v3533_v63  ;;  %v5698_v63 = vld [vmem:[%s5309_s5 + $0x3a] sm:$0xff] }
  0x6b   : > { %4804 = vmatpush3.xpose.msk.msra.mxu1 %vm235_vm0, %v3549_v0  ;;  %v5701_v0 = vld [vmem:[%s5309_s5 + $0xb2] sm:$0xff] }
  0x6c   : > { %4361 = vmatpush3.xpose.msk.msra.mxu0 %vm235_vm0, %v3517_v2  ;;  %4805 = vmatprep.subr.mxu1 %v5215_v1  ;;  %v5709_v2 = vld [vmem:[%s5309_s5 + $0x132] sm:$0xff] }
  0x6d   : > { %4362 = vmatprep.subr.msk.mxu0 %vm235_vm0, %v3532_v3  ;;  %v5714_v3 = vld [vmem:[%s5309_s5 + $0x32] sm:$0xff] }
  0x6f   : > { %4806 = vmatpush3.xpose.msk.msra.mxu1 %vm235_vm0, %v3548_v4  ;;  %v5717_v4 = vld [vmem:[%s5309_s5 + $0xaa] sm:$0xff] }
  0x70   : > { %4363 = vmatpush3.xpose.msk.msra.mxu0 %vm235_vm0, %v3516_v5  ;;  %4807 = vmatprep.subr.mxu1 %v5215_v1  ;;  %v5725_v5 = vld [vmem:[%s5309_s5 + $0x12a] sm:$0xff] }
  0x71   : > { %4364 = vmatprep.subr.msk.mxu0 %vm235_vm0, %v3531_v6  ;;  %v5730_v6 = vld [vmem:[%s5309_s5 + $0x2a] sm:$0xff] }
  0x73   : > { %4808 = vmatpush3.xpose.msk.msra.mxu1 %vm235_vm0, %v3547_v7  ;;  %v5733_v7 = vld [vmem:[%s5309_s5 + $0xa2] sm:$0xff] }
  0x74   : > { %4365 = vmatpush3.xpose.msk.msra.mxu0 %vm235_vm0, %v3515_v8  ;;  %4809 = vmatprep.subr.mxu1 %v5215_v1  ;;  %v5741_v8 = vld [vmem:[%s5309_s5 + $0x122] sm:$0xff] }
  0x75   : > { %4366 = vmatprep.subr.msk.mxu0 %vm235_vm0, %v3530_v9  ;;  %v5746_v9 = vld [vmem:[%s5309_s5 + $0x22] sm:$0xff] }
  0x77   : > { %4810 = vmatpush3.xpose.msk.msra.mxu1 %vm235_vm0, %v3546_v10  ;;  %v5749_v10 = vld [vmem:[%s5309_s5 + $0x9a] sm:$0xff] }
  0x78   : > { %4367 = vmatpush3.xpose.msk.msra.mxu0 %vm235_vm0, %v3514_v11  ;;  %4811 = vmatprep.subr.mxu1 %v5215_v1  ;;  %v5757_v11 = vld [vmem:[%s5309_s5 + $0x11a] sm:$0xff] }
  0x79   : > { %4368 = vmatprep.subr.msk.mxu0 %vm235_vm0, %v3529_v12  ;;  %v5762_v12 = vld [vmem:[%s5309_s5 + $0x1a] sm:$0xff] }
  0x7b   : > { %4812 = vmatpush3.xpose.msk.msra.mxu1 %vm235_vm0, %v3545_v13  ;;  %v5765_v13 = vld [vmem:[%s5309_s5 + $0x92] sm:$0xff] }
  0x7c   : > { %4369 = vmatpush3.xpose.msk.msra.mxu0 %vm235_vm0, %v3513_v14  ;;  %4813 = vmatprep.subr.mxu1 %v5215_v1  ;;  %v5773_v14 = vld [vmem:[%s5309_s5 + $0x112] sm:$0xff] }
  0x7d   : > { %4370 = vmatprep.subr.msk.mxu0 %vm235_vm0, %v3528_v15  ;;  %v5778_v15 = vld [vmem:[%s5309_s5 + $0x12] sm:$0xff] }
  0x7f   : > { %4814 = vmatpush3.xpose.msk.msra.mxu1 %vm235_vm0, %v3544_v16  ;;  %v3622_v16 = vld [vmem:[%s5309_s5 + $0x8a] sm:$0xff] }
  0x80   : > { %4371 = vmatpush3.xpose.msk.msra.mxu0 %vm235_vm0, %v3512_v17  ;;  %4815 = vmatprep.subr.mxu1 %v5215_v1  ;;  %v3638_v17 = vld [vmem:[%s5309_s5 + $0x10a] sm:$0xff] }
  0x81   : > { %4372 = vmatprep.subr.msk.mxu0 %vm235_vm0, %v3527_v18  ;;  %v3606_v18 = vld [vmem:[%s5309_s5 + $0xa] sm:$0xff] }
  0x83   : > { %4816 = vmatpush3.xpose.msk.msra.mxu1 %vm235_vm0, %v3543_v19  ;;  %v3621_v19 = vld [vmem:[%s5309_s5 + $0x82] sm:$0xff] }
  0x84   : > { %4373 = vmatpush3.xpose.msk.msra.mxu0 %vm235_vm0, %v3511_v20  ;;  %4817 = vmatprep.subr.mxu1 %v5215_v1  ;;  %v3637_v20 = vld [vmem:[%s5309_s5 + $0x102] sm:$0xff] }
  0x85   : > { %4374 = vmatprep.subr.msk.mxu0 %vm235_vm0, %v3526_v21  ;;  %v3605_v21 = vld [vmem:[%s5309_s5 + $0x2] sm:$0xff] }
  0x87   : > { %4818 = vmatpush3.xpose.msk.msra.mxu1 %vm235_vm0, %v3542_v22  ;;  %v3751_v22 = vld [vmem:[%s5309_s5 + $0x18a] sm:$0xff] }
  0x88   : > { %4375 = vmatpush3.xpose.msk.msra.mxu0 %vm235_vm0, %v3510_v23  ;;  %4819 = vmatprep.subr.mxu1 %v5215_v1  ;;  %v5809_v23 = vld [vmem:[%s6732_s1 + $0x18] sm:$0xff] }
  0x89   : > { %4376 = vmatprep.subr.msk.mxu0 %vm235_vm0, %v3525_v24  ;;  %v3750_v24 = vld [vmem:[%s5309_s5 + $0x182] sm:$0xff] }
  0x8b   : > { %4820 = vmatpush3.xpose.msk.msra.mxu1 %vm235_vm0, %v3541_v25  ;;  %v3834_v25 = vld [vmem:[%s5309_s5 + $0x10b] sm:$0xff] }
  0x8c   : > { %4377 = vmatpush3.xpose.msk.msra.mxu0 %vm235_vm0, %v3509_v26  ;;  %4821 = vmatprep.subr.mxu1 %v5215_v1  ;;  %v3850_v26 = vld [vmem:[%s5309_s5 + $0x18b] sm:$0xff] }
  0x8d   : > { %4378 = vmatprep.subr.msk.mxu0 %vm235_vm0, %v3524_v27  ;;  %v3818_v27 = vld [vmem:[%s5309_s5 + $0x8b] sm:$0xff] }
  0x8f   : > { %4822 = vmatpush3.xpose.msk.msra.mxu1 %vm235_vm0, %v3540_v28 }
  0x90   : > { %4379 = vmatpush3.xpose.msk.msra.mxu0 %vm235_vm0, %v3508_v29  ;;  %4823 = vmatprep.subr.mxu1 %v5215_v1  ;;  %v3833_v29 = vld [vmem:[%s5309_s5 + $0x103] sm:$0xff] }
  0x91   : > { %4380 = vmatprep.subr.msk.mxu0 %vm235_vm0, %v3523_v30  ;;  %v5935_v30 = vld [vmem:[%s6732_s1 + $0x20] sm:$0xff] }
  0x93   : > { %4824 = vmatpush3.xpose.msk.msra.mxu1 %vm235_vm0, %v3539_v31 }
  0x94   : > { %4381 = vmatpush3.xpose.msk.msra.mxu0 %vm235_vm0, %v3507_v32  ;;  %4825 = vmatprep.subr.mxu1 %v5215_v1  ;;  %v3849_v32 = vld [vmem:[%s5309_s5 + $0x183] sm:$0xff] }
  0x95   : > { %4382 = vmatprep.subr.msk.mxu0 %vm235_vm0, %v3522_v33  ;;  %v3817_v33 = vld [vmem:[%s5309_s5 + $0x83] sm:$0xff] }
  0x97   : > { %4826 = vmatpush3.xpose.msk.msra.mxu1 %vm235_vm0, %v3538_v34  ;;  %v3832_v34 = vld [vmem:[%s5309_s5 + $0xfb] sm:$0xff] }
  0x98   : > { %4383 = vmatpush3.xpose.msk.msra.mxu0 %vm235_vm0, %v3506_v35  ;;  %4830 = vmatprep.subr.mxu1 %v5215_v1  ;;  %v3848_v35 = vld [vmem:[%s5309_s5 + $0x17b] sm:$0xff] }
  0x99   : > { %4403 = vmatprep.subr.msk.mxu0 %vm235_vm0, %v5546_v36 }
  0x9a   : > { %4828 = vmatmul.mubr.msk.f32.vlgmr.msra.gmra.mxu1 %vm235_vm0, %v5436_v54 }
  0x9b   : > { %4385 = vmatmul.mubr.msk.f32.vlgmr.msra.gmra.mxu0 %vm235_vm0, %v5436_v54  ;;  %4831 = vmatpush3.xpose.msk.msra.mxu1 %vm235_vm0, %v5552_v37  ;;  %v5650_v54 = vld [vmem:[%s5309_s5 + $0x52] sm:$0xff] }
  0x9c   : > { %4404 = vmatpush3.xpose.msk.msra.mxu0 %vm235_vm0, %v5557_v38  ;;  %4832 = vmatprep.subr.mxu1 %v5215_v1 }
  0x9d   : > { %4405 = vmatprep.subr.msk.mxu0 %vm235_vm0, %v5562_v39  ;;  %4862 = vmatprep.mubr.msk.f32.mxu1 %vm5216_vm1, %v5215_v1 }
  0x9e   : > { %4435 = vmatprep.mubr.msk.f32.mxu0 %vm235_vm0, %v5571_v40 }
  0x9f   : > { %4833 = vmatpush3.xpose.msk.msra.mxu1 %vm235_vm0, %v5577_v41 }
  0xa0   : > { %4406 = vmatpush3.xpose.msk.msra.mxu0 %vm235_vm0, %v5582_v42  ;;  %4834 = vmatprep.subr.mxu1 %v5215_v1 }
  0xa1   : > { %4407 = vmatprep.subr.msk.mxu0 %vm235_vm0, %v5587_v43 }
  0xa3   : > { %4835 = vmatpush3.xpose.msk.msra.mxu1 %vm235_vm0, %v5597_v44 }
  0xa4   : > { %4408 = vmatpush3.xpose.msk.msra.mxu0 %vm235_vm0, %v5602_v45  ;;  %4836 = vmatprep.subr.mxu1 %v5215_v1 }
  0xa5   : > { %4409 = vmatprep.subr.msk.mxu0 %vm235_vm0, %v5605_v46 }
  0xa7   : > { %4837 = vmatpush3.xpose.msk.msra.mxu1 %vm235_vm0, %v5613_v47 }
  0xa8   : > { %4410 = vmatpush3.xpose.msk.msra.mxu0 %vm235_vm0, %v5618_v48  ;;  %4838 = vmatprep.subr.mxu1 %v5215_v1 }
  0xa9   : > { %4411 = vmatprep.subr.msk.mxu0 %vm235_vm0, %v5621_v49 }
  0xab   : > { %4839 = vmatpush3.xpose.msk.msra.mxu1 %vm235_vm0, %v5629_v50 }
  0xac   : > { %4412 = vmatpush3.xpose.msk.msra.mxu0 %vm235_vm0, %v5634_v51  ;;  %4840 = vmatprep.subr.mxu1 %v5215_v1 }
  0xad   : > { %4413 = vmatprep.subr.msk.mxu0 %vm235_vm0, %v5637_v52 }
  0xaf   : > { %4841 = vmatpush3.xpose.msk.msra.mxu1 %vm235_vm0, %v5645_v53 }
  0xb0   : > { %4414 = vmatpush3.xpose.msk.msra.mxu0 %vm235_vm0, %v5650_v54  ;;  %4842 = vmatprep.subr.mxu1 %v5215_v1 }
  0xb1   : > { %4415 = vmatprep.subr.msk.mxu0 %vm235_vm0, %v5653_v55 }
  0xb3   : > { %4843 = vmatpush3.xpose.msk.msra.mxu1 %vm235_vm0, %v5661_v56 }
  0xb4   : > { %4416 = vmatpush3.xpose.msk.msra.mxu0 %vm235_vm0, %v5666_v57  ;;  %4844 = vmatprep.subr.mxu1 %v5215_v1 }
  0xb5   : > { %4417 = vmatprep.subr.msk.mxu0 %vm235_vm0, %v5669_v58 }
  0xb7   : > { %4845 = vmatpush3.xpose.msk.msra.mxu1 %vm235_vm0, %v5677_v59 }
  0xb8   : > { %4418 = vmatpush3.xpose.msk.msra.mxu0 %vm235_vm0, %v5682_v60  ;;  %4846 = vmatprep.subr.mxu1 %v5215_v1 }
  0xb9   : > { %4419 = vmatprep.subr.msk.mxu0 %vm235_vm0, %v5685_v61 }
  0xbb   : > { %4847 = vmatpush3.xpose.msk.msra.mxu1 %vm235_vm0, %v5693_v62 }
  0xbc   : > { %4420 = vmatpush3.xpose.msk.msra.mxu0 %vm235_vm0, %v5698_v63  ;;  %4848 = vmatprep.subr.mxu1 %v5215_v1 }
  0xbd   : > { %4421 = vmatprep.subr.msk.mxu0 %vm235_vm0, %v5701_v0 }
  0xbf   : > { %4849 = vmatpush3.xpose.msk.msra.mxu1 %vm235_vm0, %v5709_v2 }
  0xc0   : > { %4422 = vmatpush3.xpose.msk.msra.mxu0 %vm235_vm0, %v5714_v3  ;;  %4850 = vmatprep.subr.mxu1 %v5215_v1 }
  0xc1   : > { %4423 = vmatprep.subr.msk.mxu0 %vm235_vm0, %v5717_v4 }
  0xc3   : > { %4851 = vmatpush3.xpose.msk.msra.mxu1 %vm235_vm0, %v5725_v5 }
  0xc4   : > { %4424 = vmatpush3.xpose.msk.msra.mxu0 %vm235_vm0, %v5730_v6  ;;  %4852 = vmatprep.subr.mxu1 %v5215_v1 }
  0xc5   : > { %4425 = vmatprep.subr.msk.mxu0 %vm235_vm0, %v5733_v7 }
  0xc7   : > { %4853 = vmatpush3.xpose.msk.msra.mxu1 %vm235_vm0, %v5741_v8 }
  0xc8   : > { %4426 = vmatpush3.xpose.msk.msra.mxu0 %vm235_vm0, %v5746_v9  ;;  %4854 = vmatprep.subr.mxu1 %v5215_v1 }
  0xc9   : > { %4427 = vmatprep.subr.msk.mxu0 %vm235_vm0, %v5749_v10 }
  0xcb   : > { %4855 = vmatpush3.xpose.msk.msra.mxu1 %vm235_vm0, %v5757_v11 }
  0xcc   : > { %4428 = vmatpush3.xpose.msk.msra.mxu0 %vm235_vm0, %v5762_v12  ;;  %4856 = vmatprep.subr.mxu1 %v5215_v1 }
  0xcd   : > { %4429 = vmatprep.subr.msk.mxu0 %vm235_vm0, %v5765_v13 }
  0xcf   : > { %4857 = vmatpush3.xpose.msk.msra.mxu1 %vm235_vm0, %v5773_v14 }
  0xd0   : > { %4430 = vmatpush3.xpose.msk.msra.mxu0 %vm235_vm0, %v5778_v15  ;;  %4858 = vmatprep.subr.mxu1 %v5215_v1 }
  0xd1   : > { %4431 = vmatprep.subr.msk.mxu0 %vm235_vm0, %v3622_v16 }
  0xd3   : > { %4859 = vmatpush3.xpose.msk.msra.mxu1 %vm235_vm0, %v3638_v17 }
  0xd4   : > { %4432 = vmatpush3.xpose.msk.msra.mxu0 %vm235_vm0, %v3606_v18  ;;  %4860 = vmatprep.subr.mxu1 %v5215_v1 }
  0xd5   : > { %4433 = vmatprep.subr.msk.mxu0 %vm235_vm0, %v3621_v19 }
  0xd7   : > { %4861 = vmatpush3.xpose.msk.msra.mxu1 %vm235_vm0, %v3637_v20 }
  0xd8   : > { %4434 = vmatpush3.xpose.msk.msra.mxu0 %vm235_vm0, %v3605_v21  ;;  %4865 = vmatprep.subr.mxu1 %v5215_v1  ;;  %v6079_v21 = vld [vmem:[%s5309_s5 + $0x184] sm:$0xff] }
  0xd9   : > { %4454 = vmatprep.subr.msk.mxu0 %vm235_vm0, %v3638_v17  ;;  %v6061_v17 = vld [vmem:[%s5309_s5 + $0x104] sm:$0xff] }
  0xda   : > { %4863 = vmatmul.mubr.msk.f32.vlgmr.msra.gmra.mxu1 %vm235_vm0, %v5571_v40 }
  0xdb   : > { %4436 = vmatmul.mubr.msk.f32.vlgmr.msra.gmra.mxu0 %vm235_vm0, %v5571_v40  ;;  %4866 = vmatpush3.xpose.msk.msra.mxu1 %vm235_vm0, %v3751_v22  ;;  %v3830_v40 = vld [vmem:[%s5309_s5 + $0xeb] sm:$0xff] }
  0xdc   : > { %4455 = vmatpush3.xpose.msk.msra.mxu0 %vm235_vm0, %v3622_v16  ;;  %4867 = vmatprep.subr.mxu1 %v5215_v1  ;;  %v6084_v22 = vld [vmem:[%s5309_s5 + $0x84] sm:$0xff] }
  0xdd   : > { %4456 = vmatprep.subr.msk.mxu0 %vm235_vm0, %v3637_v20  ;;  %4897 = vmatprep.mubr.msk.f32.mxu1 %vm5216_vm1, %v5215_v1 }
  0xde   : > { %4486 = vmatprep.mubr.msk.f32.mxu0 %vm235_vm0, %v5809_v23 }
  0xdf   : > { %4868 = vmatpush3.xpose.msk.msra.mxu1 %vm235_vm0, %v3750_v24  ;;  %v6099_v24 = vld [vmem:[%s5309_s5 + $0x17c] sm:$0xff] }
  0xe0   : > { %4457 = vmatpush3.xpose.msk.msra.mxu0 %vm235_vm0, %v3621_v19  ;;  %4869 = vmatprep.subr.mxu1 %v5215_v1  ;;  %v6073_v19 = vld [vmem:[%s6732_s1 + $0x28] sm:$0xff] }
  0xe1   : > { %4458 = vmatprep.subr.msk.mxu0 %vm235_vm0, %v5546_v36  ;;  %v3816_v36 = vld [vmem:[%s5309_s5 + $0x7b] sm:$0xff] }
  0xe3   : > { %4870 = vmatpush3.xpose.msk.msra.mxu1 %vm235_vm0, %v5552_v37  ;;  %v3831_v37 = vld [vmem:[%s5309_s5 + $0xf3] sm:$0xff] }
  0xe4   : > { %4459 = vmatpush3.xpose.msk.msra.mxu0 %vm235_vm0, %v5557_v38  ;;  %4871 = vmatprep.subr.mxu1 %v5215_v1  ;;  %v3847_v38 = vld [vmem:[%s5309_s5 + $0x173] sm:$0xff] }
  0xe5   : > { %4460 = vmatprep.subr.msk.mxu0 %vm235_vm0, %v5562_v39  ;;  %v3815_v39 = vld [vmem:[%s5309_s5 + $0x73] sm:$0xff] }
  0xe7   : > { %4872 = vmatpush3.xpose.msk.msra.mxu1 %vm235_vm0, %v5577_v41  ;;  %v3846_v41 = vld [vmem:[%s5309_s5 + $0x16b] sm:$0xff] }
  0xe8   : > { %4461 = vmatpush3.xpose.msk.msra.mxu0 %vm235_vm0, %v5582_v42  ;;  %4873 = vmatprep.subr.mxu1 %v5215_v1  ;;  %v3814_v42 = vld [vmem:[%s5309_s5 + $0x6b] sm:$0xff] }
  0xe9   : > { %4462 = vmatprep.subr.msk.mxu0 %vm235_vm0, %v5587_v43  ;;  %v3829_v43 = vld [vmem:[%s5309_s5 + $0xe3] sm:$0xff] }
  0xeb   : > { %4874 = vmatpush3.xpose.msk.msra.mxu1 %vm235_vm0, %v5597_v44  ;;  %v3845_v44 = vld [vmem:[%s5309_s5 + $0x163] sm:$0xff] }
  0xec   : > { %4463 = vmatpush3.xpose.msk.msra.mxu0 %vm235_vm0, %v5602_v45  ;;  %4875 = vmatprep.subr.mxu1 %v5215_v1  ;;  %v3813_v45 = vld [vmem:[%s5309_s5 + $0x63] sm:$0xff] }
  0xed   : > { %4464 = vmatprep.subr.msk.mxu0 %vm235_vm0, %v5605_v46  ;;  %v3828_v46 = vld [vmem:[%s5309_s5 + $0xdb] sm:$0xff] }
  0xef   : > { %4876 = vmatpush3.xpose.msk.msra.mxu1 %vm235_vm0, %v5613_v47  ;;  %v3844_v47 = vld [vmem:[%s5309_s5 + $0x15b] sm:$0xff] }
  0xf0   : > { %4465 = vmatpush3.xpose.msk.msra.mxu0 %vm235_vm0, %v5618_v48  ;;  %4877 = vmatprep.subr.mxu1 %v5215_v1  ;;  %v3812_v48 = vld [vmem:[%s5309_s5 + $0x5b] sm:$0xff] }
  0xf1   : > { %4466 = vmatprep.subr.msk.mxu0 %vm235_vm0, %v5621_v49  ;;  %v3827_v49 = vld [vmem:[%s5309_s5 + $0xd3] sm:$0xff] }
  0xf3   : > { %4878 = vmatpush3.xpose.msk.msra.mxu1 %vm235_vm0, %v5629_v50  ;;  %v3843_v50 = vld [vmem:[%s5309_s5 + $0x153] sm:$0xff] }
  0xf4   : > { %4467 = vmatpush3.xpose.msk.msra.mxu0 %vm235_vm0, %v5634_v51  ;;  %4879 = vmatprep.subr.mxu1 %v5215_v1  ;;  %v3811_v51 = vld [vmem:[%s5309_s5 + $0x53] sm:$0xff] }
  0xf5   : > { %4468 = vmatprep.subr.msk.mxu0 %vm235_vm0, %v5637_v52  ;;  %v3826_v52 = vld [vmem:[%s5309_s5 + $0xcb] sm:$0xff] }
  0xf7   : > { %4880 = vmatpush3.xpose.msk.msra.mxu1 %vm235_vm0, %v5645_v53  ;;  %v3842_v53 = vld [vmem:[%s5309_s5 + $0x14b] sm:$0xff] }
  0xf8   : > { %4469 = vmatpush3.xpose.msk.msra.mxu0 %vm235_vm0, %v5650_v54  ;;  %4881 = vmatprep.subr.mxu1 %v5215_v1  ;;  %v3810_v54 = vld [vmem:[%s5309_s5 + $0x4b] sm:$0xff] }
  0xf9   : > { %4470 = vmatprep.subr.msk.mxu0 %vm235_vm0, %v5653_v55  ;;  %v3825_v55 = vld [vmem:[%s5309_s5 + $0xc3] sm:$0xff] }
  0xfb   : > { %4882 = vmatpush3.xpose.msk.msra.mxu1 %vm235_vm0, %v5661_v56  ;;  %v3841_v56 = vld [vmem:[%s5309_s5 + $0x143] sm:$0xff] }
  0xfc   : > { %4471 = vmatpush3.xpose.msk.msra.mxu0 %vm235_vm0, %v5666_v57  ;;  %4883 = vmatprep.subr.mxu1 %v5215_v1  ;;  %v3809_v57 = vld [vmem:[%s5309_s5 + $0x43] sm:$0xff] }
  0xfd   : > { %4472 = vmatprep.subr.msk.mxu0 %vm235_vm0, %v5669_v58  ;;  %v3824_v58 = vld [vmem:[%s5309_s5 + $0xbb] sm:$0xff] }
  0xff   : > { %4884 = vmatpush3.xpose.msk.msra.mxu1 %vm235_vm0, %v5677_v59  ;;  %v3840_v59 = vld [vmem:[%s5309_s5 + $0x13b] sm:$0xff] }
 0x100   : > { %4473 = vmatpush3.xpose.msk.msra.mxu0 %vm235_vm0, %v5682_v60  ;;  %4885 = vmatprep.subr.mxu1 %v5215_v1  ;;  %v3808_v60 = vld [vmem:[%s5309_s5 + $0x3b] sm:$0xff] }
 0x101   : > { %4474 = vmatprep.subr.msk.mxu0 %vm235_vm0, %v5685_v61  ;;  %v3823_v61 = vld [vmem:[%s5309_s5 + $0xb3] sm:$0xff] }
 0x103   : > { %4886 = vmatpush3.xpose.msk.msra.mxu1 %vm235_vm0, %v5693_v62  ;;  %v3839_v62 = vld [vmem:[%s5309_s5 + $0x133] sm:$0xff] }
 0x104   : > { %4475 = vmatpush3.xpose.msk.msra.mxu0 %vm235_vm0, %v5698_v63  ;;  %4887 = vmatprep.subr.mxu1 %v5215_v1  ;;  %v3807_v63 = vld [vmem:[%s5309_s5 + $0x33] sm:$0xff] }
 0x105   : > { %4476 = vmatprep.subr.msk.mxu0 %vm235_vm0, %v5701_v0  ;;  %v3822_v0 = vld [vmem:[%s5309_s5 + $0xab] sm:$0xff] }
 0x107   : > { %4888 = vmatpush3.xpose.msk.msra.mxu1 %vm235_vm0, %v5709_v2  ;;  %v3838_v2 = vld [vmem:[%s5309_s5 + $0x12b] sm:$0xff] }
 0x108   : > { %4477 = vmatpush3.xpose.msk.msra.mxu0 %vm235_vm0, %v5714_v3  ;;  %4889 = vmatprep.subr.mxu1 %v5215_v1  ;;  %v3806_v3 = vld [vmem:[%s5309_s5 + $0x2b] sm:$0xff] }
 0x109   : > { %4478 = vmatprep.subr.msk.mxu0 %vm235_vm0, %v5717_v4  ;;  %v3821_v4 = vld [vmem:[%s5309_s5 + $0xa3] sm:$0xff] }
 0x10b   : > { %4890 = vmatpush3.xpose.msk.msra.mxu1 %vm235_vm0, %v5725_v5  ;;  %v3837_v5 = vld [vmem:[%s5309_s5 + $0x123] sm:$0xff] }
 0x10c   : > { %4479 = vmatpush3.xpose.msk.msra.mxu0 %vm235_vm0, %v5730_v6  ;;  %4891 = vmatprep.subr.mxu1 %v5215_v1  ;;  %v3805_v6 = vld [vmem:[%s5309_s5 + $0x23] sm:$0xff] }
 0x10d   : > { %4480 = vmatprep.subr.msk.mxu0 %vm235_vm0, %v5733_v7  ;;  %v3820_v7 = vld [vmem:[%s5309_s5 + $0x9b] sm:$0xff] }
 0x10f   : > { %4892 = vmatpush3.xpose.msk.msra.mxu1 %vm235_vm0, %v5741_v8  ;;  %v3836_v8 = vld [vmem:[%s5309_s5 + $0x11b] sm:$0xff] }
 0x110   : > { %4481 = vmatpush3.xpose.msk.msra.mxu0 %vm235_vm0, %v5746_v9  ;;  %4893 = vmatprep.subr.mxu1 %v5215_v1  ;;  %v3804_v9 = vld [vmem:[%s5309_s5 + $0x1b] sm:$0xff] }
 0x111   : > { %4482 = vmatprep.subr.msk.mxu0 %vm235_vm0, %v5749_v10  ;;  %v3819_v10 = vld [vmem:[%s5309_s5 + $0x93] sm:$0xff] }
 0x113   : > { %4894 = vmatpush3.xpose.msk.msra.mxu1 %vm235_vm0, %v5757_v11  ;;  %v3835_v11 = vld [vmem:[%s5309_s5 + $0x113] sm:$0xff] }
 0x114   : > { %4483 = vmatpush3.xpose.msk.msra.mxu0 %vm235_vm0, %v5762_v12  ;;  %4895 = vmatprep.subr.mxu1 %v5215_v1  ;;  %v3803_v12 = vld [vmem:[%s5309_s5 + $0x13] sm:$0xff] }
 0x115   : > { %4484 = vmatprep.subr.msk.mxu0 %vm235_vm0, %v5765_v13  ;;  %v6045_v13 = vld [vmem:[%s5309_s5 + $0x10c] sm:$0xff] }
 0x117   : > { %4896 = vmatpush3.xpose.msk.msra.mxu1 %vm235_vm0, %v5773_v14  ;;  %v6051_v14 = vld [vmem:[%s5309_s5 + $0x18c] sm:$0xff] }
 0x118   : > { %4485 = vmatpush3.xpose.msk.msra.mxu0 %vm235_vm0, %v5778_v15  ;;  %4900 = vmatprep.subr.mxu1 %v5215_v1  ;;  %v6056_v15 = vld [vmem:[%s5309_s5 + $0x8c] sm:$0xff] }
 0x119   : > { %4505 = vmatprep.subr.msk.mxu0 %vm235_vm0, %v3834_v25  ;;  %v6104_v25 = vld [vmem:[%s5309_s5 + $0x7c] sm:$0xff] }
 0x11a   : > { %4898 = vmatmul.mubr.msk.f32.vlgmr.msra.gmra.mxu1 %vm235_vm0, %v5809_v23  ;;  %v5926_v28 = vpop.f32.mrf.mxu1 }
 0x11b   : > { %4487 = vmatmul.mubr.msk.f32.vlgmr.msra.gmra.mxu0 %vm235_vm0, %v5809_v23  ;;  %4901 = vmatpush3.xpose.msk.msra.mxu1 %vm235_vm0, %v3850_v26  ;;  %v6089_v23 = vld [vmem:[%s5309_s5 + $0xfc] sm:$0xff]  ;;  %v6107_v26 = vld [vmem:[%s5309_s5 + $0xf4] sm:$0xff] }
 0x11c   : > { %4506 = vmatpush3.xpose.msk.msra.mxu0 %vm235_vm0, %v3818_v27  ;;  %v4794_v31 = vpop.f32.mrf.mxu1  ;;  %4902 = vmatprep.subr.mxu1 %v5215_v1  ;;  %v6115_v27 = vld [vmem:[%s5309_s5 + $0x174] sm:$0xff] }
 0x11d   : > { %4507 = vmatprep.subr.msk.mxu0 %vm235_vm0, %v3833_v29  ;;  %4932 = vmatprep.mubr.msk.f32.mxu1 %vm5216_vm1, %v5215_v1  ;;  %v6123_v29 = vld [vmem:[%s5309_s5 + $0xec] sm:$0xff] }
 0x11e   : > { %4537 = vmatprep.mubr.msk.f32.mxu0 %vm235_vm0, %v5935_v30  ;;  %v6136_v31 = vld [vmem:[%s5309_s5 + $0x6c] sm:$0xff] }
 0x11f   : > { %4903 = vmatpush3.xpose.msk.msra.mxu1 %vm235_vm0, %v3849_v32  ;;  %v6139_v32 = vld [vmem:[%s5309_s5 + $0xe4] sm:$0xff] }
 0x120   : > { %4508 = vmatpush3.xpose.msk.msra.mxu0 %vm235_vm0, %v3817_v33  ;;  %4904 = vmatprep.subr.mxu1 %v5215_v1  ;;  %v6147_v33 = vld [vmem:[%s5309_s5 + $0x164] sm:$0xff] }
 0x121   : > { %4509 = vmatprep.subr.msk.mxu0 %vm235_vm0, %v3832_v34  ;;  %v6152_v34 = vld [vmem:[%s5309_s5 + $0x64] sm:$0xff] }
 0x123   : > { %4905 = vmatpush3.xpose.msk.msra.mxu1 %vm235_vm0, %v3848_v35  ;;  %v6155_v35 = vld [vmem:[%s5309_s5 + $0xdc] sm:$0xff] }
 0x124   : > { %4510 = vmatpush3.xpose.msk.msra.mxu0 %vm235_vm0, %v3816_v36  ;;  %4906 = vmatprep.subr.mxu1 %v5215_v1  ;;  %v6163_v36 = vld [vmem:[%s5309_s5 + $0x15c] sm:$0xff] }
 0x125   : > { %4511 = vmatprep.subr.msk.mxu0 %vm235_vm0, %v3831_v37  ;;  %v6168_v37 = vld [vmem:[%s5309_s5 + $0x5c] sm:$0xff] }
 0x127   : > { %4907 = vmatpush3.xpose.msk.msra.mxu1 %vm235_vm0, %v3847_v38  ;;  %v6171_v38 = vld [vmem:[%s5309_s5 + $0xd4] sm:$0xff] }
 0x128   : > { %4512 = vmatpush3.xpose.msk.msra.mxu0 %vm235_vm0, %v3815_v39  ;;  %4908 = vmatprep.subr.mxu1 %v5215_v1  ;;  %v6179_v39 = vld [vmem:[%s5309_s5 + $0x154] sm:$0xff] }
 0x129   : > { %4513 = vmatprep.subr.msk.mxu0 %vm235_vm0, %v3830_v40  ;;  %v6184_v40 = vld [vmem:[%s5309_s5 + $0x54] sm:$0xff] }
 0x12b   : > { %4909 = vmatpush3.xpose.msk.msra.mxu1 %vm235_vm0, %v3846_v41  ;;  %v6187_v41 = vld [vmem:[%s5309_s5 + $0xcc] sm:$0xff] }
 0x12c   : > { %4514 = vmatpush3.xpose.msk.msra.mxu0 %vm235_vm0, %v3814_v42  ;;  %4910 = vmatprep.subr.mxu1 %v5215_v1  ;;  %v6195_v42 = vld [vmem:[%s5309_s5 + $0x14c] sm:$0xff] }
 0x12d   : > { %4515 = vmatprep.subr.msk.mxu0 %vm235_vm0, %v3829_v43  ;;  %v6200_v43 = vld [vmem:[%s5309_s5 + $0x4c] sm:$0xff] }
 0x12f   : > { %4911 = vmatpush3.xpose.msk.msra.mxu1 %vm235_vm0, %v3845_v44  ;;  %v6203_v44 = vld [vmem:[%s5309_s5 + $0xc4] sm:$0xff] }
 0x130   : > { %4516 = vmatpush3.xpose.msk.msra.mxu0 %vm235_vm0, %v3813_v45  ;;  %4912 = vmatprep.subr.mxu1 %v5215_v1  ;;  %v6211_v45 = vld [vmem:[%s5309_s5 + $0x144] sm:$0xff] }
 0x131   : > { %4517 = vmatprep.subr.msk.mxu0 %vm235_vm0, %v3828_v46  ;;  %v6216_v46 = vld [vmem:[%s5309_s5 + $0x44] sm:$0xff] }
 0x133   : > { %4913 = vmatpush3.xpose.msk.msra.mxu1 %vm235_vm0, %v3844_v47  ;;  %v6219_v47 = vld [vmem:[%s5309_s5 + $0xbc] sm:$0xff] }
 0x134   : > { %4518 = vmatpush3.xpose.msk.msra.mxu0 %vm235_vm0, %v3812_v48  ;;  %4914 = vmatprep.subr.mxu1 %v5215_v1  ;;  %v6227_v48 = vld [vmem:[%s5309_s5 + $0x13c] sm:$0xff] }
 0x135   : > { %4519 = vmatprep.subr.msk.mxu0 %vm235_vm0, %v3827_v49  ;;  %v6232_v49 = vld [vmem:[%s5309_s5 + $0x3c] sm:$0xff] }
 0x137   : > { %4915 = vmatpush3.xpose.msk.msra.mxu1 %vm235_vm0, %v3843_v50  ;;  %v6235_v50 = vld [vmem:[%s5309_s5 + $0xb4] sm:$0xff] }
 0x138   : > { %4520 = vmatpush3.xpose.msk.msra.mxu0 %vm235_vm0, %v3811_v51  ;;  %4916 = vmatprep.subr.mxu1 %v5215_v1  ;;  %v6243_v51 = vld [vmem:[%s5309_s5 + $0x134] sm:$0xff] }
 0x139   : > { %4521 = vmatprep.subr.msk.mxu0 %vm235_vm0, %v3826_v52  ;;  %v6248_v52 = vld [vmem:[%s5309_s5 + $0x34] sm:$0xff] }
 0x13b   : > { %4917 = vmatpush3.xpose.msk.msra.mxu1 %vm235_vm0, %v3842_v53  ;;  %v6251_v53 = vld [vmem:[%s5309_s5 + $0xac] sm:$0xff] }
 0x13c   : > { %4522 = vmatpush3.xpose.msk.msra.mxu0 %vm235_vm0, %v3810_v54  ;;  %4918 = vmatprep.subr.mxu1 %v5215_v1  ;;  %v6259_v54 = vld [vmem:[%s5309_s5 + $0x12c] sm:$0xff] }
 0x13d   : > { %4523 = vmatprep.subr.msk.mxu0 %vm235_vm0, %v3825_v55  ;;  %v6264_v55 = vld [vmem:[%s5309_s5 + $0x2c] sm:$0xff] }
 0x13f   : > { %4919 = vmatpush3.xpose.msk.msra.mxu1 %vm235_vm0, %v3841_v56  ;;  %v6267_v56 = vld [vmem:[%s5309_s5 + $0xa4] sm:$0xff] }
 0x140   : > { %4524 = vmatpush3.xpose.msk.msra.mxu0 %vm235_vm0, %v3809_v57  ;;  %4920 = vmatprep.subr.mxu1 %v5215_v1  ;;  %v6275_v57 = vld [vmem:[%s5309_s5 + $0x124] sm:$0xff] }
 0x141   : > { %4525 = vmatprep.subr.msk.mxu0 %vm235_vm0, %v3824_v58  ;;  %v6280_v58 = vld [vmem:[%s5309_s5 + $0x24] sm:$0xff] }
 0x143   : > { %4921 = vmatpush3.xpose.msk.msra.mxu1 %vm235_vm0, %v3840_v59  ;;  %v3919_v59 = vld [vmem:[%s5309_s5 + $0x9c] sm:$0xff] }
 0x144   : > { %4526 = vmatpush3.xpose.msk.msra.mxu0 %vm235_vm0, %v3808_v60  ;;  %4922 = vmatprep.subr.mxu1 %v5215_v1  ;;  %v3935_v60 = vld [vmem:[%s5309_s5 + $0x11c] sm:$0xff] }
 0x145   : > { %4527 = vmatprep.subr.msk.mxu0 %vm235_vm0, %v3823_v61  ;;  %v3903_v61 = vld [vmem:[%s5309_s5 + $0x1c] sm:$0xff] }
 0x147   : > { %4923 = vmatpush3.xpose.msk.msra.mxu1 %vm235_vm0, %v3839_v62  ;;  %v3918_v62 = vld [vmem:[%s5309_s5 + $0x94] sm:$0xff] }
 0x148   : > { %4528 = vmatpush3.xpose.msk.msra.mxu0 %vm235_vm0, %v3807_v63  ;;  %4924 = vmatprep.subr.mxu1 %v5215_v1  ;;  %v3934_v63 = vld [vmem:[%s5309_s5 + $0x114] sm:$0xff] }
 0x149   : > { %4529 = vmatprep.subr.msk.mxu0 %vm235_vm0, %v3822_v0  ;;  %v3902_v0 = vld [vmem:[%s5309_s5 + $0x14] sm:$0xff] }
 0x14b   : > { %4925 = vmatpush3.xpose.msk.msra.mxu1 %vm235_vm0, %v3838_v2  ;;  %v4048_v2 = vld [vmem:[%s5309_s5 + $0x19c] sm:$0xff] }
 0x14c   : > { %4530 = vmatpush3.xpose.msk.msra.mxu0 %vm235_vm0, %v3806_v3  ;;  %4926 = vmatprep.subr.mxu1 %v5215_v1 }
 0x14d   : > { %4531 = vmatprep.subr.msk.mxu0 %vm235_vm0, %v3821_v4 }
 0x14f   : > { %4927 = vmatpush3.xpose.msk.msra.mxu1 %vm235_vm0, %v3837_v5  ;;  %v6314_v5 = vld [vmem:[%s6732_s1 + $0x30] sm:$0xff] }
 0x150   : > { %4532 = vmatpush3.xpose.msk.msra.mxu0 %vm235_vm0, %v3805_v6  ;;  %4928 = vmatprep.subr.mxu1 %v5215_v1 }
 0x151   : > { %4533 = vmatprep.subr.msk.mxu0 %vm235_vm0, %v3820_v7  ;;  %v4047_v7 = vld [vmem:[%s5309_s5 + $0x194] sm:$0xff] }
 0x153   : > { %4929 = vmatpush3.xpose.msk.msra.mxu1 %vm235_vm0, %v3836_v8  ;;  %v4131_v8 = vld [vmem:[%s5309_s5 + $0x11d] sm:$0xff] }
 0x154   : > { %4534 = vmatpush3.xpose.msk.msra.mxu0 %vm235_vm0, %v3804_v9  ;;  %4930 = vmatprep.subr.mxu1 %v5215_v1  ;;  %v4147_v9 = vld [vmem:[%s5309_s5 + $0x19d] sm:$0xff] }
 0x155   : > { %4535 = vmatprep.subr.msk.mxu0 %vm235_vm0, %v3819_v10  ;;  %v4115_v10 = vld [vmem:[%s5309_s5 + $0x9d] sm:$0xff] }
 0x157   : > { %4931 = vmatpush3.xpose.msk.msra.mxu1 %vm235_vm0, %v3835_v11 }
 0x158   : > { %4536 = vmatpush3.xpose.msk.msra.mxu0 %vm235_vm0, %v3803_v12  ;;  %4935 = vmatprep.subr.mxu1 %v5215_v1  ;;  %v4130_v12 = vld [vmem:[%s5309_s5 + $0x115] sm:$0xff] }
 0x159   : > { %4556 = vmatprep.subr.msk.mxu0 %vm235_vm0, %v6045_v13 }
 0x15a   : > { %v863_v16 = vpop.f32.mrf.mxu1  ;;  %4933 = vmatmul.mubr.msk.f32.vlgmr.msra.gmra.mxu1 %vm235_vm0, %v5935_v30 }
 0x15b   : > { %v6064_v18 = vadd.f32 %v863_v16, %v5926_v28  ;;  %4538 = vmatmul.mubr.msk.f32.vlgmr.msra.gmra.mxu0 %vm235_vm0, %v5935_v30  ;;  %4936 = vmatpush3.xpose.msk.msra.mxu1 %vm235_vm0, %v6051_v14  ;;  %v6120_v28 = vld [vmem:[%s5309_s5 + $0x74] sm:$0xff]  ;;  %v6131_v30 = vld [vmem:[%s5309_s5 + $0x16c] sm:$0xff] }
 0x15c   : > { %4557 = vmatpush3.xpose.msk.msra.mxu0 %vm235_vm0, %v6056_v15  ;;  %v4829_v20 = vpop.f32.mrf.mxu1  ;;  %4937 = vmatprep.subr.mxu1 %v5215_v1  ;;  %v4146_v16 = vld [vmem:[%s5309_s5 + $0x195] sm:$0xff] }
 0x15d   : > { %4558 = vmatprep.subr.msk.mxu0 %vm235_vm0, %v6061_v17  ;;  %4967 = vmatprep.mubr.msk.f32.mxu1 %vm5216_vm1, %v5215_v1  ;;  %v4113_v20 = vld [vmem:[%s5309_s5 + $0x8d] sm:$0xff] }
 0x15e   : > { %4588 = vmatprep.mubr.msk.f32.mxu0 %vm235_vm0, %v6073_v19 }
 0x15f   : > { %4938 = vmatpush3.xpose.msk.msra.mxu1 %vm235_vm0, %v6079_v21 }
 0x160   : > { %4559 = vmatpush3.xpose.msk.msra.mxu0 %vm235_vm0, %v6084_v22  ;;  %4939 = vmatprep.subr.mxu1 %v5215_v1 }
 0x161   : > { %4560 = vmatprep.subr.msk.mxu0 %vm235_vm0, %v6089_v23 }
 0x163   : > { %4940 = vmatpush3.xpose.msk.msra.mxu1 %vm235_vm0, %v6099_v24 }
 0x164   : > { %4561 = vmatpush3.xpose.msk.msra.mxu0 %vm235_vm0, %v6104_v25  ;;  %4941 = vmatprep.subr.mxu1 %v5215_v1 }
 0x165   : > { %4562 = vmatprep.subr.msk.mxu0 %vm235_vm0, %v6107_v26 }
 0x167   : > { %4942 = vmatpush3.xpose.msk.msra.mxu1 %vm235_vm0, %v6115_v27 }
 0x168   : > { %4563 = vmatpush3.xpose.msk.msra.mxu0 %vm235_vm0, %v6120_v28  ;;  %4943 = vmatprep.subr.mxu1 %v5215_v1 }
 0x169   : > { %4564 = vmatprep.subr.msk.mxu0 %vm235_vm0, %v6123_v29 }
 0x16b   : > { %4944 = vmatpush3.xpose.msk.msra.mxu1 %vm235_vm0, %v6131_v30 }
 0x16c   : > { %4565 = vmatpush3.xpose.msk.msra.mxu0 %vm235_vm0, %v6136_v31  ;;  %4945 = vmatprep.subr.mxu1 %v5215_v1 }
 0x16d   : > { %4566 = vmatprep.subr.msk.mxu0 %vm235_vm0, %v6139_v32 }
 0x16f   : > { %4946 = vmatpush3.xpose.msk.msra.mxu1 %vm235_vm0, %v6147_v33 }
 0x170   : > { %4567 = vmatpush3.xpose.msk.msra.mxu0 %vm235_vm0, %v6152_v34  ;;  %4947 = vmatprep.subr.mxu1 %v5215_v1 }
 0x171   : > { %4568 = vmatprep.subr.msk.mxu0 %vm235_vm0, %v6155_v35 }
 0x173   : > { %4948 = vmatpush3.xpose.msk.msra.mxu1 %vm235_vm0, %v6163_v36 }
 0x174   : > { %4569 = vmatpush3.xpose.msk.msra.mxu0 %vm235_vm0, %v6168_v37  ;;  %4949 = vmatprep.subr.mxu1 %v5215_v1 }
 0x175   : > { %4570 = vmatprep.subr.msk.mxu0 %vm235_vm0, %v6171_v38 }
 0x177   : > { %4950 = vmatpush3.xpose.msk.msra.mxu1 %vm235_vm0, %v6179_v39 }
 0x178   : > { %4571 = vmatpush3.xpose.msk.msra.mxu0 %vm235_vm0, %v6184_v40  ;;  %4951 = vmatprep.subr.mxu1 %v5215_v1 }
 0x179   : > { %4572 = vmatprep.subr.msk.mxu0 %vm235_vm0, %v6187_v41 }
 0x17b   : > { %4952 = vmatpush3.xpose.msk.msra.mxu1 %vm235_vm0, %v6195_v42 }
 0x17c   : > { %4573 = vmatpush3.xpose.msk.msra.mxu0 %vm235_vm0, %v6200_v43  ;;  %4953 = vmatprep.subr.mxu1 %v5215_v1 }
 0x17d   : > { %4574 = vmatprep.subr.msk.mxu0 %vm235_vm0, %v6203_v44 }
 0x17f   : > { %4954 = vmatpush3.xpose.msk.msra.mxu1 %vm235_vm0, %v6211_v45 }
 0x180   : > { %4575 = vmatpush3.xpose.msk.msra.mxu0 %vm235_vm0, %v6216_v46  ;;  %4955 = vmatprep.subr.mxu1 %v5215_v1 }
 0x181   : > { %4576 = vmatprep.subr.msk.mxu0 %vm235_vm0, %v6219_v47 }
 0x183   : > { %4956 = vmatpush3.xpose.msk.msra.mxu1 %vm235_vm0, %v6227_v48 }
 0x184   : > { %4577 = vmatpush3.xpose.msk.msra.mxu0 %vm235_vm0, %v6232_v49  ;;  %4957 = vmatprep.subr.mxu1 %v5215_v1 }
 0x185   : > { %4578 = vmatprep.subr.msk.mxu0 %vm235_vm0, %v6235_v50 }
 0x187   : > { %4958 = vmatpush3.xpose.msk.msra.mxu1 %vm235_vm0, %v6243_v51 }
 0x188   : > { %4579 = vmatpush3.xpose.msk.msra.mxu0 %vm235_vm0, %v6248_v52  ;;  %4959 = vmatprep.subr.mxu1 %v5215_v1 }
 0x189   : > { %4580 = vmatprep.subr.msk.mxu0 %vm235_vm0, %v6251_v53 }
 0x18b   : > { %4960 = vmatpush3.xpose.msk.msra.mxu1 %vm235_vm0, %v6259_v54 }
 0x18c   : > { %4581 = vmatpush3.xpose.msk.msra.mxu0 %vm235_vm0, %v6264_v55  ;;  %4961 = vmatprep.subr.mxu1 %v5215_v1 }
 0x18d   : > { %4582 = vmatprep.subr.msk.mxu0 %vm235_vm0, %v6267_v56 }
 0x18f   : > { %4962 = vmatpush3.xpose.msk.msra.mxu1 %vm235_vm0, %v6275_v57 }
 0x190   : > { %4583 = vmatpush3.xpose.msk.msra.mxu0 %vm235_vm0, %v6280_v58  ;;  %4963 = vmatprep.subr.mxu1 %v5215_v1 }
 0x191   : > { %4584 = vmatprep.subr.msk.mxu0 %vm235_vm0, %v3919_v59 }
 0x193   : > { %4964 = vmatpush3.xpose.msk.msra.mxu1 %vm235_vm0, %v3935_v60 }
 0x194   : > { %4585 = vmatpush3.xpose.msk.msra.mxu0 %vm235_vm0, %v3903_v61  ;;  %4965 = vmatprep.subr.mxu1 %v5215_v1  ;;  %v4246_v61 = vld [vmem:[%s5309_s5 + $0x19e] sm:$0xff] }
 0x195   : > { %4586 = vmatprep.subr.msk.mxu0 %vm235_vm0, %v3918_v62 }
 0x197   : > { %4966 = vmatpush3.xpose.msk.msra.mxu1 %vm235_vm0, %v3934_v63 }
 0x198   : > { %4587 = vmatpush3.xpose.msk.msra.mxu0 %vm235_vm0, %v3902_v0  ;;  %4970 = vmatprep.subr.mxu1 %v5215_v1  ;;  %v4229_v0 = vld [vmem:[%s5309_s5 + $0x116] sm:$0xff] }
 0x199   : > { %4607 = vmatprep.subr.msk.mxu0 %vm235_vm0, %v3935_v60  ;;  %v4230_v60 = vld [vmem:[%s5309_s5 + $0x11e] sm:$0xff] }
 0x19a   : > { %v1212_v3 = vpop.f32.mrf.mxu1  ;;  %4968 = vmatmul.mubr.msk.f32.vlgmr.msra.gmra.mxu1 %vm235_vm0, %v6073_v19 }
 0x19b   : > { %v6306_v4 = vadd.f32 %v1212_v3, %v6064_v18  ;;  %4589 = vmatmul.mubr.msk.f32.vlgmr.msra.gmra.mxu0 %vm235_vm0, %v6073_v19  ;;  %4971 = vmatpush3.xpose.msk.msra.mxu1 %vm235_vm0, %v4048_v2  ;;  %v4129_v18 = vld [vmem:[%s5309_s5 + $0x10d] sm:$0xff]  ;;  %v6569_v3 = vld [vmem:[%s6732_s1 + $0x40] sm:$0xff] }
 0x19c   : > { %4608 = vmatpush3.xpose.msk.msra.mxu0 %vm235_vm0, %v3919_v59  ;;  %v4864_v6 = vpop.f32.mrf.mxu1  ;;  %4972 = vmatprep.subr.mxu1 %v5215_v1  ;;  %v4145_v19 = vld [vmem:[%s5309_s5 + $0x18d] sm:$0xff]  ;;  %v4100_v59 = vld [vmem:[%s5309_s5 + $0x25] sm:$0xff] }
 0x19d   : > { %4609 = vmatprep.subr.msk.mxu0 %vm235_vm0, %v3934_v63  ;;  %5002 = vmatprep.mubr.msk.f32.mxu1 %vm5216_vm1, %v5215_v1  ;;  %v4213_v6 = vld [vmem:[%s5309_s5 + $0x96] sm:$0xff] }
 0x19e   : > { %4639 = vmatprep.mubr.msk.f32.mxu0 %vm235_vm0, %v6314_v5 }
 0x19f   : > { %4973 = vmatpush3.xpose.msk.msra.mxu1 %vm235_vm0, %v4047_v7  ;;  %v4228_v7 = vld [vmem:[%s5309_s5 + $0x10e] sm:$0xff] }
 0x1a0   : > { %4610 = vmatpush3.xpose.msk.msra.mxu0 %vm235_vm0, %v3918_v62  ;;  %4974 = vmatprep.subr.mxu1 %v5215_v1  ;;  %v4214_v62 = vld [vmem:[%s5309_s5 + $0x9e] sm:$0xff] }
 0x1a1   : > { %4611 = vmatprep.subr.msk.mxu0 %vm235_vm0, %v6045_v13 }
 0x1a3   : > { %4975 = vmatpush3.xpose.msk.msra.mxu1 %vm235_vm0, %v6051_v14  ;;  %v6441_v14 = vld [vmem:[%s6732_s1 + $0x38] sm:$0xff] }
 0x1a4   : > { %4612 = vmatpush3.xpose.msk.msra.mxu0 %vm235_vm0, %v6056_v15  ;;  %4976 = vmatprep.subr.mxu1 %v5215_v1 }
 0x1a5   : > { %4613 = vmatprep.subr.msk.mxu0 %vm235_vm0, %v6061_v17  ;;  %v4114_v17 = vld [vmem:[%s5309_s5 + $0x95] sm:$0xff] }
 0x1a7   : > { %4977 = vmatpush3.xpose.msk.msra.mxu1 %vm235_vm0, %v6079_v21  ;;  %v4128_v21 = vld [vmem:[%s5309_s5 + $0x105] sm:$0xff] }
 0x1a8   : > { %4614 = vmatpush3.xpose.msk.msra.mxu0 %vm235_vm0, %v6084_v22  ;;  %4978 = vmatprep.subr.mxu1 %v5215_v1  ;;  %v4144_v22 = vld [vmem:[%s5309_s5 + $0x185] sm:$0xff] }
 0x1a9   : > { %4615 = vmatprep.subr.msk.mxu0 %vm235_vm0, %v6089_v23  ;;  %v4112_v23 = vld [vmem:[%s5309_s5 + $0x85] sm:$0xff] }
 0x1ab   : > { %4979 = vmatpush3.xpose.msk.msra.mxu1 %vm235_vm0, %v6099_v24  ;;  %v4127_v24 = vld [vmem:[%s5309_s5 + $0xfd] sm:$0xff] }
 0x1ac   : > { %4616 = vmatpush3.xpose.msk.msra.mxu0 %vm235_vm0, %v6104_v25  ;;  %4980 = vmatprep.subr.mxu1 %v5215_v1  ;;  %v4143_v25 = vld [vmem:[%s5309_s5 + $0x17d] sm:$0xff] }
 0x1ad   : > { %4617 = vmatprep.subr.msk.mxu0 %vm235_vm0, %v6107_v26  ;;  %v4111_v26 = vld [vmem:[%s5309_s5 + $0x7d] sm:$0xff] }
 0x1af   : > { %4981 = vmatpush3.xpose.msk.msra.mxu1 %vm235_vm0, %v6115_v27  ;;  %v4126_v27 = vld [vmem:[%s5309_s5 + $0xf5] sm:$0xff] }
 0x1b0   : > { %4618 = vmatpush3.xpose.msk.msra.mxu0 %vm235_vm0, %v6120_v28  ;;  %4982 = vmatprep.subr.mxu1 %v5215_v1  ;;  %v4142_v28 = vld [vmem:[%s5309_s5 + $0x175] sm:$0xff] }
 0x1b1   : > { %4619 = vmatprep.subr.msk.mxu0 %vm235_vm0, %v6123_v29  ;;  %v4110_v29 = vld [vmem:[%s5309_s5 + $0x75] sm:$0xff] }
 0x1b3   : > { %4983 = vmatpush3.xpose.msk.msra.mxu1 %vm235_vm0, %v6131_v30  ;;  %v4125_v30 = vld [vmem:[%s5309_s5 + $0xed] sm:$0xff] }
 0x1b4   : > { %4620 = vmatpush3.xpose.msk.msra.mxu0 %vm235_vm0, %v6136_v31  ;;  %4984 = vmatprep.subr.mxu1 %v5215_v1  ;;  %v4141_v31 = vld [vmem:[%s5309_s5 + $0x16d] sm:$0xff] }
 0x1b5   : > { %4621 = vmatprep.subr.msk.mxu0 %vm235_vm0, %v6139_v32  ;;  %v4109_v32 = vld [vmem:[%s5309_s5 + $0x6d] sm:$0xff] }
 0x1b7   : > { %4985 = vmatpush3.xpose.msk.msra.mxu1 %vm235_vm0, %v6147_v33  ;;  %v4124_v33 = vld [vmem:[%s5309_s5 + $0xe5] sm:$0xff] }
 0x1b8   : > { %4622 = vmatpush3.xpose.msk.msra.mxu0 %vm235_vm0, %v6152_v34  ;;  %4986 = vmatprep.subr.mxu1 %v5215_v1  ;;  %v4140_v34 = vld [vmem:[%s5309_s5 + $0x165] sm:$0xff] }
 0x1b9   : > { %4623 = vmatprep.subr.msk.mxu0 %vm235_vm0, %v6155_v35  ;;  %v4108_v35 = vld [vmem:[%s5309_s5 + $0x65] sm:$0xff] }
 0x1bb   : > { %4987 = vmatpush3.xpose.msk.msra.mxu1 %vm235_vm0, %v6163_v36  ;;  %v4123_v36 = vld [vmem:[%s5309_s5 + $0xdd] sm:$0xff] }
 0x1bc   : > { %4624 = vmatpush3.xpose.msk.msra.mxu0 %vm235_vm0, %v6168_v37  ;;  %4988 = vmatprep.subr.mxu1 %v5215_v1  ;;  %v4139_v37 = vld [vmem:[%s5309_s5 + $0x15d] sm:$0xff] }
 0x1bd   : > { %4625 = vmatprep.subr.msk.mxu0 %vm235_vm0, %v6171_v38  ;;  %v4107_v38 = vld [vmem:[%s5309_s5 + $0x5d] sm:$0xff] }
 0x1bf   : > { %4989 = vmatpush3.xpose.msk.msra.mxu1 %vm235_vm0, %v6179_v39  ;;  %v4122_v39 = vld [vmem:[%s5309_s5 + $0xd5] sm:$0xff] }
 0x1c0   : > { %4626 = vmatpush3.xpose.msk.msra.mxu0 %vm235_vm0, %v6184_v40  ;;  %4990 = vmatprep.subr.mxu1 %v5215_v1  ;;  %v4138_v40 = vld [vmem:[%s5309_s5 + $0x155] sm:$0xff] }
 0x1c1   : > { %4627 = vmatprep.subr.msk.mxu0 %vm235_vm0, %v6187_v41  ;;  %v4106_v41 = vld [vmem:[%s5309_s5 + $0x55] sm:$0xff] }
 0x1c3   : > { %4991 = vmatpush3.xpose.msk.msra.mxu1 %vm235_vm0, %v6195_v42  ;;  %v4121_v42 = vld [vmem:[%s5309_s5 + $0xcd] sm:$0xff] }
 0x1c4   : > { %4628 = vmatpush3.xpose.msk.msra.mxu0 %vm235_vm0, %v6200_v43  ;;  %4992 = vmatprep.subr.mxu1 %v5215_v1  ;;  %v4137_v43 = vld [vmem:[%s5309_s5 + $0x14d] sm:$0xff] }
 0x1c5   : > { %4629 = vmatprep.subr.msk.mxu0 %vm235_vm0, %v6203_v44  ;;  %v4105_v44 = vld [vmem:[%s5309_s5 + $0x4d] sm:$0xff] }
 0x1c7   : > { %4993 = vmatpush3.xpose.msk.msra.mxu1 %vm235_vm0, %v6211_v45  ;;  %v4120_v45 = vld [vmem:[%s5309_s5 + $0xc5] sm:$0xff] }
 0x1c8   : > { %4630 = vmatpush3.xpose.msk.msra.mxu0 %vm235_vm0, %v6216_v46  ;;  %4994 = vmatprep.subr.mxu1 %v5215_v1  ;;  %v4136_v46 = vld [vmem:[%s5309_s5 + $0x145] sm:$0xff] }
 0x1c9   : > { %4631 = vmatprep.subr.msk.mxu0 %vm235_vm0, %v6219_v47  ;;  %v4104_v47 = vld [vmem:[%s5309_s5 + $0x45] sm:$0xff] }
 0x1cb   : > { %4995 = vmatpush3.xpose.msk.msra.mxu1 %vm235_vm0, %v6227_v48  ;;  %v4119_v48 = vld [vmem:[%s5309_s5 + $0xbd] sm:$0xff] }
 0x1cc   : > { %4632 = vmatpush3.xpose.msk.msra.mxu0 %vm235_vm0, %v6232_v49  ;;  %4996 = vmatprep.subr.mxu1 %v5215_v1  ;;  %v4135_v49 = vld [vmem:[%s5309_s5 + $0x13d] sm:$0xff] }
 0x1cd   : > { %4633 = vmatprep.subr.msk.mxu0 %vm235_vm0, %v6235_v50  ;;  %v4103_v50 = vld [vmem:[%s5309_s5 + $0x3d] sm:$0xff] }
 0x1cf   : > { %4997 = vmatpush3.xpose.msk.msra.mxu1 %vm235_vm0, %v6243_v51  ;;  %v4118_v51 = vld [vmem:[%s5309_s5 + $0xb5] sm:$0xff] }
 0x1d0   : > { %4634 = vmatpush3.xpose.msk.msra.mxu0 %vm235_vm0, %v6248_v52  ;;  %4998 = vmatprep.subr.mxu1 %v5215_v1  ;;  %v4134_v52 = vld [vmem:[%s5309_s5 + $0x135] sm:$0xff] }
 0x1d1   : > { %4635 = vmatprep.subr.msk.mxu0 %vm235_vm0, %v6251_v53  ;;  %v4102_v53 = vld [vmem:[%s5309_s5 + $0x35] sm:$0xff] }
 0x1d3   : > { %4999 = vmatpush3.xpose.msk.msra.mxu1 %vm235_vm0, %v6259_v54  ;;  %v4117_v54 = vld [vmem:[%s5309_s5 + $0xad] sm:$0xff] }
 0x1d4   : > { %4636 = vmatpush3.xpose.msk.msra.mxu0 %vm235_vm0, %v6264_v55  ;;  %5000 = vmatprep.subr.mxu1 %v5215_v1  ;;  %v4133_v55 = vld [vmem:[%s5309_s5 + $0x12d] sm:$0xff] }
 0x1d5   : > { %4637 = vmatprep.subr.msk.mxu0 %vm235_vm0, %v6267_v56  ;;  %v4101_v56 = vld [vmem:[%s5309_s5 + $0x2d] sm:$0xff] }
 0x1d7   : > { %5001 = vmatpush3.xpose.msk.msra.mxu1 %vm235_vm0, %v6275_v57  ;;  %v4116_v57 = vld [vmem:[%s5309_s5 + $0xa5] sm:$0xff] }
 0x1d8   : > { %4638 = vmatpush3.xpose.msk.msra.mxu0 %vm235_vm0, %v6280_v58  ;;  %5005 = vmatprep.subr.mxu1 %v5215_v1  ;;  %v4132_v58 = vld [vmem:[%s5309_s5 + $0x125] sm:$0xff] }
 0x1d9   : > { %4658 = vmatprep.subr.msk.mxu0 %vm235_vm0, %v4131_v8  ;;  %v3322_v8 = vld [vmem:[%s6733_s2] sm:$0xff] }
 0x1da   : > { %v1561_v11 = vpop.f32.mrf.mxu1  ;;  %5003 = vmatmul.mubr.msk.f32.vlgmr.msra.gmra.mxu1 %vm235_vm0, %v6314_v5 }
 0x1db   : > { %v6433_v13 = vadd.f32 %v1561_v11, %v6306_v4  ;;  %4640 = vmatmul.mubr.msk.f32.vlgmr.msra.gmra.mxu0 %vm235_vm0, %v6314_v5  ;;  %5006 = vmatpush3.xpose.msk.msra.mxu1 %vm235_vm0, %v4147_v9  ;;  %v4245_v5 = vld [vmem:[%s5309_s5 + $0x196] sm:$0xff]  ;;  %v5217_v9 = vmov 0   ;;  %v4212_v11 = vld [vmem:[%s5309_s5 + $0x8e] sm:$0xff] }
 0x1dc   : > { %4659 = vmatpush3.xpose.msk.msra.mxu0 %vm235_vm0, %v4115_v10  ;;  %v4899_v15 = vpop.f32.mrf.mxu1  ;;  %5007 = vmatprep.subr.mxu1 %v5215_v1  ;;  %v4244_v10 = vld [vmem:[%s5309_s5 + $0x18e] sm:$0xff] }
 0x1dd   : > { %4660 = vmatprep.subr.msk.mxu0 %vm235_vm0, %v4130_v12  ;;  %5037 = vmatprep.mubr.msk.f32.mxu1 %vm5216_vm1, %v5215_v1  ;;  %v4227_v12 = vld [vmem:[%s5309_s5 + $0x106] sm:$0xff]  ;;  %v4226_v15 = vld [vmem:[%s5309_s5 + $0xfe] sm:$0xff] }
 0x1de   : > { %4690 = vmatprep.mubr.msk.f32.mxu0 %vm235_vm0, %v6441_v14  ;;  %5136 = vset.pattern.permute.xlu0 %v5217_v9 }
 0x1df   : > { %5008 = vmatpush3.xpose.msk.msra.mxu1 %vm235_vm0, %v4146_v16  ;;  %3325 = vperm.xlu0 %5136, %v3322_v8   ;;  %v4242_v16 = vld [vmem:[%s5309_s5 + $0x17e] sm:$0xff] }
 0x1e0   : > { %4661 = vmatpush3.xpose.msk.msra.mxu0 %vm235_vm0, %v4114_v17  ;;  %5009 = vmatprep.subr.mxu1 %v5215_v1  ;;  %v4210_v17 = vld [vmem:[%s5309_s5 + $0x7e] sm:$0xff] }
 0x1e1   : > { %4662 = vmatprep.subr.msk.mxu0 %vm235_vm0, %v4129_v18  ;;  %v4225_v18 = vld [vmem:[%s5309_s5 + $0xf6] sm:$0xff] }
 0x1e3   : > { %5010 = vmatpush3.xpose.msk.msra.mxu1 %vm235_vm0, %v4145_v19  ;;  %v4241_v19 = vld [vmem:[%s5309_s5 + $0x176] sm:$0xff] }
 0x1e4   : > { %4663 = vmatpush3.xpose.msk.msra.mxu0 %vm235_vm0, %v4113_v20  ;;  %5011 = vmatprep.subr.mxu1 %v5215_v1  ;;  %v4209_v20 = vld [vmem:[%s5309_s5 + $0x76] sm:$0xff] }
 0x1e5   : > { %4664 = vmatprep.subr.msk.mxu0 %vm235_vm0, %v4128_v21  ;;  %v4224_v21 = vld [vmem:[%s5309_s5 + $0xee] sm:$0xff] }
 0x1e7   : > { %5012 = vmatpush3.xpose.msk.msra.mxu1 %vm235_vm0, %v4144_v22  ;;  %v4240_v22 = vld [vmem:[%s5309_s5 + $0x16e] sm:$0xff] }
 0x1e8   : > { %4665 = vmatpush3.xpose.msk.msra.mxu0 %vm235_vm0, %v4112_v23  ;;  %5013 = vmatprep.subr.mxu1 %v5215_v1  ;;  %v4208_v23 = vld [vmem:[%s5309_s5 + $0x6e] sm:$0xff] }
 0x1e9   : > { %4666 = vmatprep.subr.msk.mxu0 %vm235_vm0, %v4127_v24  ;;  %v4223_v24 = vld [vmem:[%s5309_s5 + $0xe6] sm:$0xff] }
 0x1eb   : > { %5014 = vmatpush3.xpose.msk.msra.mxu1 %vm235_vm0, %v4143_v25  ;;  %v4239_v25 = vld [vmem:[%s5309_s5 + $0x166] sm:$0xff] }
 0x1ec   : > { %4667 = vmatpush3.xpose.msk.msra.mxu0 %vm235_vm0, %v4111_v26  ;;  %5015 = vmatprep.subr.mxu1 %v5215_v1  ;;  %v4207_v26 = vld [vmem:[%s5309_s5 + $0x66] sm:$0xff] }
 0x1ed   : > { %4668 = vmatprep.subr.msk.mxu0 %vm235_vm0, %v4126_v27  ;;  %v4222_v27 = vld [vmem:[%s5309_s5 + $0xde] sm:$0xff] }
 0x1ef   : > { %5016 = vmatpush3.xpose.msk.msra.mxu1 %vm235_vm0, %v4142_v28  ;;  %v4238_v28 = vld [vmem:[%s5309_s5 + $0x15e] sm:$0xff] }
 0x1f0   : > { %4669 = vmatpush3.xpose.msk.msra.mxu0 %vm235_vm0, %v4110_v29  ;;  %5017 = vmatprep.subr.mxu1 %v5215_v1  ;;  %v4206_v29 = vld [vmem:[%s5309_s5 + $0x5e] sm:$0xff] }
 0x1f1   : > { %4670 = vmatprep.subr.msk.mxu0 %vm235_vm0, %v4125_v30  ;;  %v4221_v30 = vld [vmem:[%s5309_s5 + $0xd6] sm:$0xff] }
 0x1f3   : > { %5018 = vmatpush3.xpose.msk.msra.mxu1 %vm235_vm0, %v4141_v31  ;;  %v4237_v31 = vld [vmem:[%s5309_s5 + $0x156] sm:$0xff] }
 0x1f4   : > { %4671 = vmatpush3.xpose.msk.msra.mxu0 %vm235_vm0, %v4109_v32  ;;  %5019 = vmatprep.subr.mxu1 %v5215_v1  ;;  %v4205_v32 = vld [vmem:[%s5309_s5 + $0x56] sm:$0xff] }
 0x1f5   : > { %4672 = vmatprep.subr.msk.mxu0 %vm235_vm0, %v4124_v33  ;;  %v4220_v33 = vld [vmem:[%s5309_s5 + $0xce] sm:$0xff] }
 0x1f7   : > { %5020 = vmatpush3.xpose.msk.msra.mxu1 %vm235_vm0, %v4140_v34  ;;  %v4236_v34 = vld [vmem:[%s5309_s5 + $0x14e] sm:$0xff] }
 0x1f8   : > { %4673 = vmatpush3.xpose.msk.msra.mxu0 %vm235_vm0, %v4108_v35  ;;  %5021 = vmatprep.subr.mxu1 %v5215_v1  ;;  %v4204_v35 = vld [vmem:[%s5309_s5 + $0x4e] sm:$0xff] }
 0x1f9   : > { %4674 = vmatprep.subr.msk.mxu0 %vm235_vm0, %v4123_v36  ;;  %v4219_v36 = vld [vmem:[%s5309_s5 + $0xc6] sm:$0xff] }
 0x1fb   : > { %5022 = vmatpush3.xpose.msk.msra.mxu1 %vm235_vm0, %v4139_v37  ;;  %v4235_v37 = vld [vmem:[%s5309_s5 + $0x146] sm:$0xff] }
 0x1fc   : > { %4675 = vmatpush3.xpose.msk.msra.mxu0 %vm235_vm0, %v4107_v38  ;;  %5023 = vmatprep.subr.mxu1 %v5215_v1  ;;  %v4203_v38 = vld [vmem:[%s5309_s5 + $0x46] sm:$0xff] }
 0x1fd   : > { %4676 = vmatprep.subr.msk.mxu0 %vm235_vm0, %v4122_v39  ;;  %v4218_v39 = vld [vmem:[%s5309_s5 + $0xbe] sm:$0xff] }
 0x1ff   : > { %5024 = vmatpush3.xpose.msk.msra.mxu1 %vm235_vm0, %v4138_v40  ;;  %v4234_v40 = vld [vmem:[%s5309_s5 + $0x13e] sm:$0xff] }
 0x200   : > { %4677 = vmatpush3.xpose.msk.msra.mxu0 %vm235_vm0, %v4106_v41  ;;  %5025 = vmatprep.subr.mxu1 %v5215_v1  ;;  %v4202_v41 = vld [vmem:[%s5309_s5 + $0x3e] sm:$0xff] }
 0x201   : > { %4678 = vmatprep.subr.msk.mxu0 %vm235_vm0, %v4121_v42  ;;  %v4217_v42 = vld [vmem:[%s5309_s5 + $0xb6] sm:$0xff] }
 0x203   : > { %5026 = vmatpush3.xpose.msk.msra.mxu1 %vm235_vm0, %v4137_v43  ;;  %v4233_v43 = vld [vmem:[%s5309_s5 + $0x136] sm:$0xff] }
 0x204   : > { %4679 = vmatpush3.xpose.msk.msra.mxu0 %vm235_vm0, %v4105_v44  ;;  %5027 = vmatprep.subr.mxu1 %v5215_v1  ;;  %v4201_v44 = vld [vmem:[%s5309_s5 + $0x36] sm:$0xff] }
 0x205   : > { %4680 = vmatprep.subr.msk.mxu0 %vm235_vm0, %v4120_v45  ;;  %v4216_v45 = vld [vmem:[%s5309_s5 + $0xae] sm:$0xff] }
 0x207   : > { %5028 = vmatpush3.xpose.msk.msra.mxu1 %vm235_vm0, %v4136_v46  ;;  %v4232_v46 = vld [vmem:[%s5309_s5 + $0x12e] sm:$0xff] }
 0x208   : > { %4681 = vmatpush3.xpose.msk.msra.mxu0 %vm235_vm0, %v4104_v47  ;;  %5029 = vmatprep.subr.mxu1 %v5215_v1  ;;  %v4200_v47 = vld [vmem:[%s5309_s5 + $0x2e] sm:$0xff] }
 0x209   : > { %4682 = vmatprep.subr.msk.mxu0 %vm235_vm0, %v4119_v48  ;;  %v4215_v48 = vld [vmem:[%s5309_s5 + $0xa6] sm:$0xff] }
 0x20b   : > { %5030 = vmatpush3.xpose.msk.msra.mxu1 %vm235_vm0, %v4135_v49  ;;  %v4231_v49 = vld [vmem:[%s5309_s5 + $0x126] sm:$0xff] }
 0x20c   : > { %4683 = vmatpush3.xpose.msk.msra.mxu0 %vm235_vm0, %v4103_v50  ;;  %5031 = vmatprep.subr.mxu1 %v5215_v1  ;;  %v4199_v50 = vld [vmem:[%s5309_s5 + $0x26] sm:$0xff] }
 0x20d   : > { %4684 = vmatprep.subr.msk.mxu0 %vm235_vm0, %v4118_v51 }
 0x20f   : > { %5032 = vmatpush3.xpose.msk.msra.mxu1 %vm235_vm0, %v4134_v52 }
 0x210   : > { %4685 = vmatpush3.xpose.msk.msra.mxu0 %vm235_vm0, %v4102_v53  ;;  %5033 = vmatprep.subr.mxu1 %v5215_v1 }
 0x211   : > { %4686 = vmatprep.subr.msk.mxu0 %vm235_vm0, %v4117_v54 }
 0x213   : > { %5034 = vmatpush3.xpose.msk.msra.mxu1 %vm235_vm0, %v4133_v55 }
 0x214   : > { %4687 = vmatpush3.xpose.msk.msra.mxu0 %vm235_vm0, %v4101_v56  ;;  %5035 = vmatprep.subr.mxu1 %v5215_v1 }
 0x215   : > { %4688 = vmatprep.subr.msk.mxu0 %vm235_vm0, %v4116_v57 }
 0x217   : > { %5036 = vmatpush3.xpose.msk.msra.mxu1 %vm235_vm0, %v4132_v58  ;;  %v449_v58 = vpop.f32.mrf.mxu0 }
 0x218   : > { %4689 = vmatpush3.xpose.msk.msra.mxu0 %vm235_vm0, %v4100_v59  ;;  %5040 = vmatprep.subr.mxu1 %v5215_v1 }
 0x219   : > { %4709 = vmatprep.subr.msk.mxu0 %vm235_vm0, %v4230_v60  ;;  %v451_v59 = vpop.f32.mrf.mxu0 }
 0x21a   : > { %v1910_v63 = vpop.f32.mrf.mxu1  ;;  %5038 = vmatmul.mubr.msk.f32.vlgmr.msra.gmra.mxu1 %vm235_vm0, %v6441_v14 }
 0x21b   : > { %v6561_v2 = vadd.f32 %v1910_v63, %v6433_v13  ;;  %4691 = vmatmul.mubr.msk.f32.vlgmr.msra.gmra.mxu0 %vm235_vm0, %v6441_v14  ;;  %5041 = vmatpush3.xpose.msk.msra.mxu1 %vm235_vm0, %v4246_v61  ;;  %v4243_v13 = vld [vmem:[%s5309_s5 + $0x186] sm:$0xff]  ;;  %v792_v60 = vpop.f32.mrf.mxu0 }
 0x21c   : > { %4710 = vmatpush3.xpose.msk.msra.mxu0 %vm235_vm0, %v4214_v62  ;;  %v4934_v4 = vpop.f32.mrf.mxu1  ;;  %5042 = vmatprep.subr.mxu1 %v5215_v1  ;;  %v4211_v14 = vld [vmem:[%s5309_s5 + $0x86] sm:$0xff]  ;;  %s175_s5 = sand.u32 1, %s5197_s13  }
 0x21d   : > { %4711 = vmatprep.subr.msk.mxu0 %vm235_vm0, %v4229_v0  ;;  %5072 = vmatprep.mubr.msk.f32.mxu1 %vm5216_vm1, %v5215_v1  ;;  %v794_v61 = vpop.f32.mrf.mxu0  ;;  %s5075_s8 = smul.u32 24, %s175_s5  ;;  %s3338_s23 = scalar_lea.sflag [#allocation4], %s175_s5 }
 0x21e   : > { %4741 = vmatprep.mubr.msk.f32.mxu0 %vm235_vm0, %v6569_v3  ;;  %v871_v9 = vadd.f32 %v794_v61, %v451_v59 }
 0x21f   : > { %5043 = vmatpush3.xpose.msk.msra.mxu1 %vm235_vm0, %v4245_v5  ;;  %v1141_v62 = vpop.f32.mrf.mxu0  ;;  %s177_s10 = scalar_lea.vmem [#allocation3], %s5075_s8 }
 0x220   : > { %4712 = vmatpush3.xpose.msk.msra.mxu0 %vm235_vm0, %v4213_v6  ;;  %5044 = vmatprep.subr.mxu1 %v5215_v1  ;;  %s3354_s11 = sshll.u32 %s177_s10, 4  ;;  %s3355_s11 = int_to_ptr.vmem [resolvable:$true] %s3354_s11 }
 0x221   : > { %4713 = vmatprep.subr.msk.mxu0 %vm235_vm0, %v4228_v7  ;;  %v1143_v63 = vpop.f32.mrf.mxu0  ;;  %s5137_s26 = scalar_lea.vmem %s3355_s11, 384  ;;  %p5144_p1 = scmp.lt.s32.totalorder %s3355_s11, %s5142_s27 }
 0x222   : > { %p5138_p12 = scmp.ne.s32.totalorder %s3355_s11, %s5137_s26  ;;  %p5145_p2 = scmp.lt.s32.totalorder %s5143_s28, %s5137_s26 }
 0x223   : > { %5045 = vmatpush3.xpose.msk.msra.mxu1 %vm235_vm0, %v4244_v10  ;;  %v1490_v0 = vpop.f32.mrf.mxu0 }
 0x224   : > { %4714 = vmatpush3.xpose.msk.msra.mxu0 %vm235_vm0, %v4212_v11  ;;  %5046 = vmatprep.subr.mxu1 %v5215_v1  ;;  %v1220_v11 = vadd.f32 %v1143_v63, %v871_v9  ;;  %p5139_p13 = pnand %p5138_p12, %p5279_p4  ;;  %p5146_p3 = por %p5145_p2, %p5144_p1 }
 0x225   : > { %4715 = vmatprep.subr.msk.mxu0 %vm235_vm0, %v4227_v12  ;;  %v1492_v4 = vpop.f32.mrf.mxu0 }
 0x226   : > { %p5140_p0 = pneg %p5139_p13 }
 0x227   : > { %5047 = vmatpush3.xpose.msk.msra.mxu1 %vm235_vm0, %v4243_v13  ;;  %v1839_v5 = vpop.f32.mrf.mxu0 }
 0x228   : > { %4716 = vmatpush3.xpose.msk.msra.mxu0 %vm235_vm0, %v4211_v14  ;;  %5048 = vmatprep.subr.mxu1 %v5215_v1  ;;  %v1569_v14 = vadd.f32 %v1492_v4, %v1220_v11  ;;  %p5147_p5 = pnand %p5146_p3, %p5140_p0 }
 0x229   : > { %4717 = vmatprep.subr.msk.mxu0 %vm235_vm0, %v4226_v15 }
 0x22b   : > { %5049 = vmatpush3.xpose.msk.msra.mxu1 %vm235_vm0, %v4242_v16 }
 0x22c   : > { %4718 = vmatpush3.xpose.msk.msra.mxu0 %vm235_vm0, %v4210_v17  ;;  %5050 = vmatprep.subr.mxu1 %v5215_v1 }
 0x22d   : > { %4719 = vmatprep.subr.msk.mxu0 %vm235_vm0, %v4225_v18 }
 0x22f   : > { %5051 = vmatpush3.xpose.msk.msra.mxu1 %vm235_vm0, %v4241_v19 }
 0x230   : > { %4720 = vmatpush3.xpose.msk.msra.mxu0 %vm235_vm0, %v4209_v20  ;;  %5052 = vmatprep.subr.mxu1 %v5215_v1 }
 0x231   : > { %4721 = vmatprep.subr.msk.mxu0 %vm235_vm0, %v4224_v21 }
 0x233   : > { %5053 = vmatpush3.xpose.msk.msra.mxu1 %vm235_vm0, %v4240_v22 }
 0x234   : > { %4722 = vmatpush3.xpose.msk.msra.mxu0 %vm235_vm0, %v4208_v23  ;;  %5054 = vmatprep.subr.mxu1 %v5215_v1 }
 0x235   : > { %4723 = vmatprep.subr.msk.mxu0 %vm235_vm0, %v4223_v24 }
 0x237   : > { %5055 = vmatpush3.xpose.msk.msra.mxu1 %vm235_vm0, %v4239_v25 }
 0x238   : > { %4724 = vmatpush3.xpose.msk.msra.mxu0 %vm235_vm0, %v4207_v26  ;;  %5056 = vmatprep.subr.mxu1 %v5215_v1 }
 0x239   : > { %4725 = vmatprep.subr.msk.mxu0 %vm235_vm0, %v4222_v27 }
 0x23b   : > { %5057 = vmatpush3.xpose.msk.msra.mxu1 %vm235_vm0, %v4238_v28 }
 0x23c   : > { %4726 = vmatpush3.xpose.msk.msra.mxu0 %vm235_vm0, %v4206_v29  ;;  %5058 = vmatprep.subr.mxu1 %v5215_v1 }
 0x23d   : > { %4727 = vmatprep.subr.msk.mxu0 %vm235_vm0, %v4221_v30 }
 0x23f   : > { %5059 = vmatpush3.xpose.msk.msra.mxu1 %vm235_vm0, %v4237_v31 }
 0x240   : > { %4728 = vmatpush3.xpose.msk.msra.mxu0 %vm235_vm0, %v4205_v32  ;;  %5060 = vmatprep.subr.mxu1 %v5215_v1 }
 0x241   : > { %4729 = vmatprep.subr.msk.mxu0 %vm235_vm0, %v4220_v33 }
 0x243   : > { %5061 = vmatpush3.xpose.msk.msra.mxu1 %vm235_vm0, %v4236_v34 }
 0x244   : > { %4730 = vmatpush3.xpose.msk.msra.mxu0 %vm235_vm0, %v4204_v35  ;;  %5062 = vmatprep.subr.mxu1 %v5215_v1 }
 0x245   : > { %4731 = vmatprep.subr.msk.mxu0 %vm235_vm0, %v4219_v36 }
 0x247   : > { %5063 = vmatpush3.xpose.msk.msra.mxu1 %vm235_vm0, %v4235_v37 }
 0x248   : > { %4732 = vmatpush3.xpose.msk.msra.mxu0 %vm235_vm0, %v4203_v38  ;;  %5064 = vmatprep.subr.mxu1 %v5215_v1 }
 0x249   : > { %4733 = vmatprep.subr.msk.mxu0 %vm235_vm0, %v4218_v39 }
 0x24b   : > { %5065 = vmatpush3.xpose.msk.msra.mxu1 %vm235_vm0, %v4234_v40 }
 0x24c   : > { %4734 = vmatpush3.xpose.msk.msra.mxu0 %vm235_vm0, %v4202_v41  ;;  %5066 = vmatprep.subr.mxu1 %v5215_v1 }
 0x24d   : > { %4735 = vmatprep.subr.msk.mxu0 %vm235_vm0, %v4217_v42 }
 0x24f   : > { %5067 = vmatpush3.xpose.msk.msra.mxu1 %vm235_vm0, %v4233_v43 }
 0x250   : > { %4736 = vmatpush3.xpose.msk.msra.mxu0 %vm235_vm0, %v4201_v44  ;;  %5068 = vmatprep.subr.mxu1 %v5215_v1 }
 0x251   : > { %4737 = vmatprep.subr.msk.mxu0 %vm235_vm0, %v4216_v45 }
 0x253   : > { %5069 = vmatpush3.xpose.msk.msra.mxu1 %vm235_vm0, %v4232_v46 }
 0x254   : > { %4738 = vmatpush3.xpose.msk.msra.mxu0 %vm235_vm0, %v4200_v47  ;;  %5070 = vmatprep.subr.mxu1 %v5215_v1 }
 0x255   : > { %4739 = vmatprep.subr.msk.mxu0 %vm235_vm0, %v4215_v48 }
 0x257   : > { %5071 = vmatpush3.xpose.msk.msra.mxu1 %vm235_vm0, %v4231_v49 }
 0x258   : > { %4740 = vmatpush3.xpose.msk.msra.mxu0 %vm235_vm0, %v4199_v50 }
 0x25a   : > { %v2259_v51 = vpop.f32.mrf.mxu1  ;;  %5073 = vmatmul.mubr.msk.f32.vlgmr.msra.gmra.mxu1 %vm235_vm0, %v6569_v3  ;;  %v3326_v26 = vpop.permute.xlu0 %3325 }
 0x25b   : > { %v2268_v52 = vadd.f32 %v2259_v51, %v6561_v2  ;;  %4742 = vmatmul.mubr.msk.f32.vlgmr.msra.gmra.mxu0 %vm235_vm0, %v6569_v3  ;;  %v1841_v2 = vpop.f32.mrf.mxu0  ;;  %v870_v3 = vadd.f32 %v792_v60, %v449_v58 }
 0x25c   : > { %v4969_v53 = vpop.f32.mrf.mxu1  ;;  %v1918_v17 = vadd.f32 %v1841_v2, %v1569_v14 }
 0x25d   : > { %v2188_v6 = vpop.f32.mrf.mxu0  ;;  %v1219_v10 = vadd.f32 %v1141_v62, %v870_v3 }
 0x25f   : > { %v2190_v7 = vpop.f32.mrf.mxu0  ;;  %v1568_v12 = vadd.f32 %v1490_v0, %v1219_v10 }
 0x260   : > { %v2267_v19 = vadd.f32 %v2190_v7, %v1918_v17 }
 0x261   : > { %v1917_v15 = vadd.f32 %v1839_v5, %v1568_v12 }
 0x263   : > { %v2266_v18 = vadd.f32 %v2188_v6, %v1917_v15 }
 0x29a   : > { %v2608_v54 = vpop.f32.mrf.mxu1 }
 0x29b   : > { %v2617_v1 = vadd.f32 %v2608_v54, %v2268_v52  ;;  %v2537_v8 = vpop.f32.mrf.mxu0 }
 0x29c   : > { %v5004_v55 = vpop.f32.mrf.mxu1  ;;  %v2615_v20 = vadd.f32 %v2537_v8, %v2266_v18 }
 0x29d   : > { %v2539_v13 = vpop.f32.mrf.mxu0 }
 0x29e   : > { %v2616_v23 = vadd.f32 %v2539_v13, %v2267_v19 }
 0x2da   : > { %v2957_v56 = vpop.f32.mrf.mxu1 }
 0x2db   : > { %v2886_v16 = vpop.f32.mrf.mxu0  ;;  %v2966_v21 = vadd.f32 %v2957_v56, %v2617_v1 }
 0x2dc   : > { %v5039_v57 = vpop.f32.mrf.mxu1  ;;  %v2964_v24 = vadd.f32 %v2886_v16, %v2615_v20 }
 0x2dd   : > { %v2888_v22 = vpop.f32.mrf.mxu0 }
 0x2de   : > { %v2965_v29 = vadd.f32 %v2888_v22, %v2616_v23 }
 0x31a   : > { %v3306_v25 = vpop.f32.mrf.mxu1 }
 0x31b   : > { %v3315_v27 = vadd.f32 %v3306_v25, %v2966_v21  ;;  %v3235_v28 = vpop.f32.mrf.mxu0 }
 0x31c   : > { %v3313_v30 = vadd.f32 %v3235_v28, %v2964_v24  ;;  %v5074_v31 = vpop.f32.mrf.mxu1 }
 0x31d   : > { %v3330_v32 = vadd.f32 %v3326_v26, %v3315_v27  ;;  %v3237_v33 = vpop.f32.mrf.mxu0 }
 0x31e   : > { %v3328_v34 = vadd.f32 %v3326_v26, %v3313_v30  ;;  %v3314_v35 = vadd.f32 %v3237_v33, %v2965_v29 }
 0x31f   : > { %v3333_v36 = vmax.f32 %v3330_v32, 0.0 }
 0x320   : > { %v3331_v37 = vmax.f32 %v3328_v34, 0.0  ;;  %v3329_v38 = vadd.f32 %v3326_v26, %v3314_v35 }
 0x321   : > { %3336 = vst [vmem:[%s177_s10 + $0x10] sm:$0xff] %v3333_v36 }
 0x322   : > { %3334 = vst [vmem:[%s177_s10] sm:$0xff] %v3331_v37  ;;  %v3332_v39 = vmax.f32 %v3329_v38, 0.0 }
 0x324   : > { %3335 = vst [vmem:[%s177_s10 + $0x8] sm:$0xff] %v3332_v39 }
 0x325   : > { %5150 = shalt.err (!%p5147_p5)
}
 0x326   : > { %s5151_s29 = scalar_lea.hbm %s3352_s21, 384  ;;  %s5155_s6 = scalar_lea.hbm %s6734_s3, 768 }
 0x327   : > { %p5152_p6 = scmp.ne.s32.totalorder %s3352_s21, %s5151_s29  ;;  %p5156_p10 = scmp.lt.s32.totalorder %s3352_s21, %s6734_s3 }
 0x328   : > { %p5157_p11 = scmp.lt.s32.totalorder %s5155_s6, %s5151_s29 }
 0x329   : > { %p5153_p7 = pnand %p5152_p6, %p5279_p4 }
 0x32a   : > { %p5158_p12 = por %p5157_p11, %p5156_p10 }
 0x32b   : > { %p5154_p9 = pneg %p5153_p7 }
 0x32d   : > { %p5159_p13 = pnand %p5158_p12, %p5154_p9 }
 0x32f   : > { %5162 = shalt.err (!%p5159_p13)
}
 0x330   : > { %5078 = dma.vmem_to_hbm [thread:$0]  (%p5279_p4), %s3355_s11, 384, %s3352_s21, %s3338_s23  }
 0x331 PF: > { %p5084_p0 = scmp.ge.s32.totalorder %s5213_s17, 2  ;;  %s3366_s8 = sand.u32 1, %s5193_s12  }
 0x332   : > { %s3367_s9 = scalar_lea.sflag [#allocation4], %s3366_s8 }
 0x333   : > { %p5081_p1 = pnand %p5084_p0, %p5286_p8 }
 0x335   : > { %p5082_p2 = pneg %p5081_p1 }
 0x337   : > { %5188 = dma.done.wait (%p5082_p2), %s3367_s9, 384  }
 0x338   : > { %5190 = vsyncadd (%p5082_p2), %s3367_s9, 4294966912  ;;  %s16_s17 = sadd.s32 1, %s5213_s17   ;;  %s6737_s12 = smov %s5197_s13 }
 0x339   : > { %p13_p3 = scmp.ge.s32.totalorder %s16_s17, 4   ;;  %s6738_s13 = smov %s5201_s14 }
 0x33a   : > { %s6739_s14 = smov %s5292_s25  ;;  %s6740_s15 = smov %s5209_s16 }
 0x33b   : > { %s6741_s16 = smov %s6743_s20  ;;  %15 = sbr.rel (!%p13_p3) target bundleno = 4 (0x4), region = 84 }
 0x340   :  { %3372 = vsyncpa [#allocation4], 1 }
 0x341   :  { %3374 = vsyncpa [#allocation4 + $0x1], 1 }

</bundles_post_ra>
